<compile_context>
chip_gen: v7x
topology: tpu7x:2x2x1
jax: 0.10.0
libtpu: 0.0.40
codegen_flags: <defaults>
</compile_context>

<pallas_src>
import functools

import numpy as np
import jax
import jax.numpy as jnp
from jax.experimental import pallas as pl
from jax.experimental.pallas import tpu as pltpu


_LOW = 8                    # decoder spatial size the 1x1 convs actually run at
_UP = 16                    # folded nearest-neighbor upsample factor (2**4)
_OUT = 100                  # AdaptiveMaxPool2d output size
_LANES = 128                # lane-dense padded output width
_N_TOK = _LOW * _LOW        # 64 tokens per stream per batch element
_D_MODEL = 48               # encoder channel width
_N_LAYERS = 5               # number of T_block layers

# ---- packed-parameter row offsets (all multiples of 16 so every static slice
# ---- stays aligned to the native (8,128)/(16,128) sublane tiling) -----------
_OFF_WQ, _OFF_WK, _OFF_WV = 0, 16, 32
_OFF_BQ, _OFF_BK, _OFF_BV = 48, 64, 80
_OFF_W1, _OFF_B1 = 96, 144
_OFF_W2, _OFF_B2 = 160, 208
_OFF_W3, _OFF_B3 = 224, 256
_OFF_W4 = 272
_OFF_G = 288                # stacked row-selection tables (two 112-row halves)
_G_HALF = 112
_OFF_C0 = 512               # column-selection tables (8, 128) each
_OFF_C1 = 528
_PK_ROWS = 544


# -----------------------------------------------------------------------------
# Static one-hot tables implementing AdaptiveMaxPool2d((100,100)) of the 16x
# nearest-upsampled 8x8 map (separable row-then-column selection).
# -----------------------------------------------------------------------------
def _pool_tables():
    """PyTorch pooling window i on the 128-grid is
    [floor(i*128/100), ceil((i+1)*128/100)); under 16x nearest upsampling it
    covers at most the two low-res indices start//16 and (end-1)//16, so the
    pooled value is the max over a <=2 x <=2 set of low-res cells."""
    hi = _LOW * _UP                                  # 128
    i = np.arange(_OUT)
    st = (i * hi) // _OUT
    en = -((-(i + 1) * hi) // _OUT)
    lo0 = st // _UP                                  # (100,) in [0, 8)
    lo1 = (en - 1) // _UP
    p = np.arange(_N_TOK)                            # flat pixel index h*8+w
    g0 = (p[None, :] // _LOW == lo0[:, None]).astype(np.float32)   # (100, 64)
    g1 = (p[None, :] // _LOW == lo1[:, None]).astype(np.float32)
    c0 = np.zeros((_LOW, _LANES), np.float32)        # (8, 128), cols >=100 zero
    c1 = np.zeros((_LOW, _LANES), np.float32)
    c0[lo0, i] = 1.0
    c1[lo1, i] = 1.0
    return g0, g1, c0, c1


# -----------------------------------------------------------------------------
# The fused Pallas kernel (one grid step == `nb` batch elements).
# -----------------------------------------------------------------------------
def _tracknet_kernel(tok_ref, pk_ref, scal_ref, out_ref, *, nb, n_layers, scale):
    f32, bf16 = jnp.float32, jnp.bfloat16
    tb = nb * _N_TOK                                  # folded token rows

    def matrelu(x, w_off, w_rows, w_cols, b_off):
        w = pk_ref[w_off:w_off + w_rows, 0:w_cols].astype(bf16)
        y = jnp.dot(x.astype(bf16), w, preferred_element_type=f32)
        return jnp.maximum(y + pk_ref[b_off:b_off + 1, 0:w_cols], 0.0)

    # ---- token slab: per batch, rows 0:64 = image (query) tokens,
    # ---- rows 64:128 = patch (key/value) tokens; fold batch into M ----------
    q_parts, kv_parts = [], []
    for b in range(nb):
        t = tok_ref[b]                                # (128, 3) f32
        q_parts.append(t[0:_N_TOK, :])
        kv_parts.append(t[_N_TOK:2 * _N_TOK, :])
    q_tok = q_parts[0] if nb == 1 else jnp.concatenate(q_parts, axis=0)
    kv_tok = kv_parts[0] if nb == 1 else jnp.concatenate(kv_parts, axis=0)

    # ---- Encoder: q/k/v 1x1 projections (batch folded, bf16 MXU operands) ---
    xq = matrelu(q_tok, _OFF_WQ, 3, _D_MODEL, _OFF_BQ)      # (tb, 48) f32
    xk = matrelu(kv_tok, _OFF_WK, 3, _D_MODEL, _OFF_BK)
    xv = matrelu(kv_tok, _OFF_WV, 3, _D_MODEL, _OFF_BV)

    # ---- 5 x T_block: per-batch scaled-dot-product attention + residual -----
    # TODO(synk): T_block() is undefined in the provided source; stand-in is a
    # parameter-free scaled-dot-product attention with a residual connection.
    new_q = []
    for b in range(nb):
        r0 = b * _N_TOK
        q_b = xq[r0:r0 + _N_TOK, :]                         # (64, 48) f32
        k_b = xk[r0:r0 + _N_TOK, :].astype(bf16)            # resident across layers
        v_b = xv[r0:r0 + _N_TOK, :].astype(bf16)
        for _ in range(n_layers):
            s = jax.lax.dot_general(q_b.astype(bf16), k_b,
                                    (((1,), (1,)), ((), ())),
                                    preferred_element_type=f32) * scale
            mx = jnp.max(s, axis=-1, keepdims=True)
            p = jnp.exp(s - mx)
            l = jnp.sum(p, axis=-1, keepdims=True)
            pv = jnp.dot(p.astype(bf16), v_b, preferred_element_type=f32)
            q_b = pv * pl.reciprocal(l, approx=True) + q_b
        new_q.append(q_b)
    xq = new_q[0] if nb == 1 else jnp.concatenate(new_q, axis=0)   # (tb, 48)

    # ---- Decoder 1x1 convs at 8x8 (commuted past nearest upsample), folded --
    y = matrelu(xq, _OFF_W1, 48, 48, _OFF_B1)               # (tb, 48)
    y = matrelu(y, _OFF_W2, 48, 32, _OFF_B2)                # (tb, 32)
    y = matrelu(y, _OFF_W3, 32, 16, _OFF_B3)                # (tb, 16)
    w4 = pk_ref[_OFF_W4:_OFF_W4 + 16, 0:1].astype(bf16)
    y4 = jnp.maximum(
        jnp.dot(y.astype(bf16), w4, preferred_element_type=f32) + scal_ref[0],
        0.0)                                                # (tb, 1) flat 8x8 map

    # ---- AdaptiveMaxPool2d((100,100)) of the folded 16x upsample ------------
    # Expand the flat map into (tb, 8) columns via an iota mask, then select
    # rows / columns with tiny one-hot matmuls and take the running max.
    rid = jax.lax.broadcasted_iota(jnp.int32, (tb, _LOW), 0)
    cid = jax.lax.broadcasted_iota(jnp.int32, (tb, _LOW), 1)
    y8 = (y4 * (rid % _LOW == cid).astype(f32)).astype(bf16)        # (tb, 8)

    gstack = pk_ref[_OFF_G:_OFF_G + 2 * _G_HALF, 0:_N_TOK].astype(bf16)  # (224,64)
    csel0 = pk_ref[_OFF_C0:_OFF_C0 + _LOW, :].astype(bf16)               # (8,128)
    csel1 = pk_ref[_OFF_C1:_OFF_C1 + _LOW, :].astype(bf16)
    w5 = scal_ref[1]
    b5 = scal_ref[2]

    for b in range(nb):
        r0 = b * _N_TOK
        rc = jnp.dot(gstack, y8[r0:r0 + _N_TOK, :],
                     preferred_element_type=f32)                     # (224, 8)
        rm = jnp.maximum(rc[0:_G_HALF, :],
                         rc[_G_HALF:2 * _G_HALF, :]).astype(bf16)    # (112, 8)
        pooled = jnp.maximum(
            jnp.dot(rm, csel0, preferred_element_type=f32),
            jnp.dot(rm, csel1, preferred_element_type=f32))[0:_OUT, :]  # (100,128)
        # PyTorch order: pool -> cnv5 (1->1 conv == scalar affine) -> sigmoid.
        out_ref[b] = jax.nn.sigmoid(pooled * w5 + b5)


# -----------------------------------------------------------------------------
# Model glue (plain JAX, only tiny pre/post plumbing).
# -----------------------------------------------------------------------------
def _avg_pool_to_8(x_nchw):
    b, c, h, w = x_nchw.shape
    return x_nchw.reshape(b, c, 8, h // 8, 8, w // 8).mean(axis=(3, 5))


def _to_tokens(feat_nchw):
    b, c, h, w = feat_nchw.shape
    return jnp.transpose(feat_nchw, (0, 2, 3, 1)).reshape(b, h * w, c)


def _pick_n_blocks(batch):
    """grid=(2,) 'parallel' splits the batch across the two TensorCores on
    multi-TC parts (v4/v5p megacore, v7x); single-TC v5e/v6e fold the whole
    batch into ONE grid step (no per-step overhead, full MXU row fill)."""
    if batch >= 2 and batch % 2 == 0:
        try:
            kind = jax.devices()[0].device_kind.lower()
        except Exception:
            kind = ""
        if any(tag in kind for tag in ("v4", "v5p", "v7", "7x")):
            return 2
    return 1


@functools.partial(jax.jit, static_argnames=("n_blocks",))
def _forward_impl(wpack, scalars, image, patch, n_blocks):
    # TODO(synk): Backbone(name, pretrained) is undefined in the provided
    # source; deterministic stand-in = 8x8 average pool (the 3->48 projection
    # happens inside the kernel via wq/wk/wv).
    q_tok = _to_tokens(_avg_pool_to_8(image))            # (B, 64, 3)
    kv_tok = _to_tokens(_avg_pool_to_8(patch))           # (B, 64, 3)
    tokens = jnp.concatenate([q_tok, kv_tok], axis=1)    # (B, 128, 3) one stream

    batch = tokens.shape[0]
    nb = batch // n_blocks                               # batch elems per grid step

    kernel = functools.partial(_tracknet_kernel, nb=nb, n_layers=_N_LAYERS,
                               scale=1.0 / float(np.sqrt(_D_MODEL)))
    out = pl.pallas_call(
        kernel,
        out_shape=jax.ShapeDtypeStruct((batch, _OUT, _LANES), jnp.float32),
        grid=(n_blocks,),
        in_specs=[
            pl.BlockSpec((nb, 2 * _N_TOK, 3), lambda i: (i, 0, 0)),
            pl.BlockSpec((_PK_ROWS, _LANES), lambda i: (0, 0)),
            pl.BlockSpec(memory_space=pltpu.MemorySpace.SMEM),
        ],
        out_specs=pl.BlockSpec((nb, _OUT, _LANES), lambda i: (i, 0, 0)),
        compiler_params=pltpu.CompilerParams(
            dimension_semantics=("parallel",)),
    )(tokens, wpack, scalars)

    # lane-dense (B, 100, 128) -> NCHW (B, 1, 100, 100)
    return out[:, None, :, :_OUT]


def tracknet_forward(params, image, patch):
    return _forward_impl(params["wpack"], params["scalars"], image, patch,
                         n_blocks=_pick_n_blocks(image.shape[0]))


# -----------------------------------------------------------------------------
# Parameter init / packing (conv weights stored as (Cin, Cout), i.e. the
# PyTorch conv weight[:, :, 0, 0].T; biases as (1, Cout); b4/w5/b5 as scalars).
# -----------------------------------------------------------------------------
def init_params(key):
    def w_init(k, shape):
        return jax.random.normal(k, shape, jnp.float32) * 0.1

    k = jax.random.split(key, 13)
    return {
        # TODO(synk): synthetic 3->48 projections stand in for the undefined
        # Backbone(name, pretrained).
        "wq": w_init(k[0], (3, _D_MODEL)), "bq": jnp.zeros((1, _D_MODEL), jnp.float32),
        "wk": w_init(k[1], (3, _D_MODEL)), "bk": jnp.zeros((1, _D_MODEL), jnp.float32),
        "wv": w_init(k[2], (3, _D_MODEL)), "bv": jnp.zeros((1, _D_MODEL), jnp.float32),
        "w1": w_init(k[3], (48, 48)), "b1": w_init(k[4], (1, 48)),
        "w2": w_init(k[5], (48, 32)), "b2": w_init(k[6], (1, 32)),
        "w3": w_init(k[7], (32, 16)), "b3": w_init(k[8], (1, 16)),
        "w4": w_init(k[9], (16, 1)),  "b4": w_init(k[10], (1, 1))[0, 0],
        "w5": w_init(k[11], (1, 1))[0, 0], "b5": w_init(k[12], (1, 1))[0, 0],
    }


def pack_params(p):
    """Pack every weight / bias / pooling table into ONE (544, 128) f32 array
    (single DMA) plus a (3,) SMEM scalar vector [b4, w5, b5]."""
    pk = np.zeros((_PK_ROWS, _LANES), np.float32)

    def put(off, a):
        a = np.asarray(a, np.float32)
        pk[off:off + a.shape[0], :a.shape[1]] = a

    put(_OFF_WQ, p["wq"]); put(_OFF_BQ, p["bq"])
    put(_OFF_WK, p["wk"]); put(_OFF_BK, p["bk"])
    put(_OFF_WV, p["wv"]); put(_OFF_BV, p["bv"])
    put(_OFF_W1, p["w1"]); put(_OFF_B1, p["b1"])
    put(_OFF_W2, p["w2"]); put(_OFF_B2, p["b2"])
    put(_OFF_W3, p["w3"]); put(_OFF_B3, p["b3"])
    put(_OFF_W4, p["w4"])
    g0, g1, c0, c1 = _pool_tables()
    put(_OFF_G, g0); put(_OFF_G + _G_HALF, g1)
    put(_OFF_C0, c0); put(_OFF_C1, c1)
    scal = np.array([float(p["b4"]), float(p["w5"]), float(p["b5"])], np.float32)
    return {"wpack": jnp.asarray(pk), "scalars": jnp.asarray(scal)}


# -----------------------------------------------------------------------------
# Pure-JAX reference (same TODO(synk) stand-ins), used for a numeric check.
# -----------------------------------------------------------------------------
def _reference_forward(p, image, patch):
    relu = lambda v: jnp.maximum(v, 0.0)
    q_tok = _to_tokens(_avg_pool_to_8(image))
    kv_tok = _to_tokens(_avg_pool_to_8(patch))
    xq = relu(q_tok @ p["wq"] + p["bq"])
    xk = relu(kv_tok @ p["wk"] + p["bk"])
    xv = relu(kv_tok @ p["wv"] + p["bv"])
    scale = 1.0 / float(np.sqrt(_D_MODEL))
    for _ in range(_N_LAYERS):
        s = jnp.einsum("bqc,bkc->bqk", xq, xk) * scale
        xq = jnp.einsum("bqk,bkc->bqc", jax.nn.softmax(s, axis=-1), xv) + xq
    bsz = xq.shape[0]
    x = jnp.transpose(xq, (0, 2, 1)).reshape(bsz, _D_MODEL, _LOW, _LOW)
    up2 = lambda v: jnp.repeat(jnp.repeat(v, 2, axis=2), 2, axis=3)
    cnv = lambda v, w, b: (jnp.einsum("bchw,cd->bdhw", v, w)
                           + jnp.reshape(b, (1, -1, 1, 1)))
    x = relu(cnv(up2(x), p["w1"], p["b1"]))
    x = relu(cnv(up2(x), p["w2"], p["b2"]))
    x = relu(cnv(up2(x), p["w3"], p["b3"]))
    x = relu(cnv(up2(x), p["w4"], p["b4"]))              # (B, 1, 128, 128)
    hi = _LOW * _UP
    i = np.arange(_OUT)
    st = (i * hi) // _OUT
    en = -((-(i + 1) * hi) // _OUT)
    cand = np.stack([st, st + 1, en - 1], axis=1).reshape(-1)   # window size <= 3
    x = x[:, :, cand, :].reshape(bsz, 1, _OUT, 3, hi).max(axis=3)
    x = x[:, :, :, cand].reshape(bsz, 1, _OUT, _OUT, 3).max(axis=4)
    return jax.nn.sigmoid(x * p["w5"] + p["b5"])


if __name__ == "__main__":
    key = jax.random.PRNGKey(0)
    k_img, k_patch = jax.random.split(key)
    image = jax.random.normal(k_img, (2, 3, 32, 32), jnp.float32)
    patch = jax.random.normal(k_patch, (2, 3, 16, 16), jnp.float32)

    raw = init_params(jax.random.PRNGKey(42))
    params = pack_params(raw)

    out = tracknet_forward(params, image, patch)
    out = jax.block_until_ready(out)

    assert out.shape == (2, 1, 100, 100), out.shape
    assert bool(jnp.all(jnp.isfinite(out))), "non-finite output"
    assert bool(jnp.all((out >= 0.0) & (out <= 1.0))), "sigmoid range violated"

    # Numeric check vs a pure-JAX reference (loose tol: bf16 MXU operands and
    # the approximate softmax reciprocal).
    ref = _reference_forward(raw, image, patch)
    err = float(jnp.max(jnp.abs(out - ref)))
    assert err < 3e-2, f"mismatch vs pure-JAX reference: max|diff|={err}"

    print("KERNEL_OK")
</pallas_src>

<mosaic_0001>
module attributes {stable_mosaic.version = 11 : i64} {
  func.func @_tracknet_kernel(%arg0: i32, %arg1: memref<2x128x3xf32, #tpu.memory_space<vmem>>, %arg2: memref<544x128xf32, #tpu.memory_space<vmem>>, %arg3: memref<3xf32, #tpu.memory_space<smem>>, %arg4: memref<2x100x128xf32, #tpu.memory_space<vmem>>) attributes {dimension_semantics = [#tpu.dimension_semantics<parallel>], iteration_bounds = array<i64: 1>, scalar_prefetch = 0 : i64, scratch_operands = 0 : i64, tpu.core_type = #tpu.core_type<tc>, window_params = [{transform_indices = @transform_0, window_bounds = array<i64: 2, 128, 3>}, {pipeline_mode = #tpu.pipeline_mode<synchronous>, transform_indices = @transform_1, window_bounds = array<i64: 544, 128>}, {transform_indices = @transform_2, window_bounds = array<i64: 3>}, {transform_indices = @transform_3, window_bounds = array<i64: 2, 100, 128>}]} {
    %c0 = arith.constant 0 : index
    %c0_0 = arith.constant 0 : index
    %c0_1 = arith.constant 0 : index
    %0 = vector.load %arg1[%c0, %c0_0, %c0_1] : memref<2x128x3xf32, #tpu.memory_space<vmem>>, vector<1x128x3xf32>
    %1 = vector.shape_cast %0 : vector<1x128x3xf32> to vector<128x3xf32>
    %2 = vector.extract_strided_slice %1 {offsets = [0, 0], sizes = [64, 3], strides = [1, 1]} : vector<128x3xf32> to vector<64x3xf32>
    %3 = vector.extract_strided_slice %1 {offsets = [64, 0], sizes = [64, 3], strides = [1, 1]} : vector<128x3xf32> to vector<64x3xf32>
    %c1 = arith.constant 1 : index
    %c0_2 = arith.constant 0 : index
    %c0_3 = arith.constant 0 : index
    %4 = vector.load %arg1[%c1, %c0_2, %c0_3] : memref<2x128x3xf32, #tpu.memory_space<vmem>>, vector<1x128x3xf32>
    %5 = vector.shape_cast %4 : vector<1x128x3xf32> to vector<128x3xf32>
    %6 = vector.extract_strided_slice %5 {offsets = [0, 0], sizes = [64, 3], strides = [1, 1]} : vector<128x3xf32> to vector<64x3xf32>
    %7 = vector.extract_strided_slice %5 {offsets = [64, 0], sizes = [64, 3], strides = [1, 1]} : vector<128x3xf32> to vector<64x3xf32>
    %8 = tpu.concatenate %2, %6 in 0 : vector<64x3xf32>, vector<64x3xf32> -> vector<128x3xf32>
    %9 = tpu.concatenate %3, %7 in 0 : vector<64x3xf32>, vector<64x3xf32> -> vector<128x3xf32>
    %c0_4 = arith.constant 0 : index
    %c0_5 = arith.constant 0 : index
    %10 = vector.load %arg2[%c0_4, %c0_5] : memref<544x128xf32, #tpu.memory_space<vmem>>, vector<3x48xf32>
    %11 = arith.truncf %10 : vector<3x48xf32> to vector<3x48xbf16>
    %12 = arith.truncf %8 : vector<128x3xf32> to vector<128x3xbf16>
    %cst = arith.constant dense<0.000000e+00> : vector<128x48xf32>
    %13 = tpu.matmul %12, %11, %cst {dimension_numbers = #tpu.dot_dimension_numbers<[1], [0], [0], [1], [0, 0, 1, 1], [], []>} : vector<128x3xbf16>, vector<3x48xbf16>, vector<128x48xf32> -> vector<128x48xf32>
    %c48 = arith.constant 48 : index
    %c0_6 = arith.constant 0 : index
    %14 = vector.load %arg2[%c48, %c0_6] : memref<544x128xf32, #tpu.memory_space<vmem>>, vector<1x48xf32>
    %15 = vector.broadcast %14 : vector<1x48xf32> to vector<128x48xf32>
    %16 = arith.addf %13, %15 : vector<128x48xf32>
    %cst_7 = arith.constant 0.000000e+00 : f32
    %17 = vector.broadcast %cst_7 : f32 to vector<128x48xf32>
    %18 = arith.maximumf %16, %17 : vector<128x48xf32>
    %c16 = arith.constant 16 : index
    %c0_8 = arith.constant 0 : index
    %19 = vector.load %arg2[%c16, %c0_8] : memref<544x128xf32, #tpu.memory_space<vmem>>, vector<3x48xf32>
    %20 = arith.truncf %19 : vector<3x48xf32> to vector<3x48xbf16>
    %21 = arith.truncf %9 : vector<128x3xf32> to vector<128x3xbf16>
    %cst_9 = arith.constant dense<0.000000e+00> : vector<128x48xf32>
    %22 = tpu.matmul %21, %20, %cst_9 {dimension_numbers = #tpu.dot_dimension_numbers<[1], [0], [0], [1], [0, 0, 1, 1], [], []>} : vector<128x3xbf16>, vector<3x48xbf16>, vector<128x48xf32> -> vector<128x48xf32>
    %c64 = arith.constant 64 : index
    %c0_10 = arith.constant 0 : index
    %23 = vector.load %arg2[%c64, %c0_10] : memref<544x128xf32, #tpu.memory_space<vmem>>, vector<1x48xf32>
    %24 = vector.broadcast %23 : vector<1x48xf32> to vector<128x48xf32>
    %25 = arith.addf %22, %24 : vector<128x48xf32>
    %cst_11 = arith.constant 0.000000e+00 : f32
    %26 = vector.broadcast %cst_11 : f32 to vector<128x48xf32>
    %27 = arith.maximumf %25, %26 : vector<128x48xf32>
    %c32 = arith.constant 32 : index
    %c0_12 = arith.constant 0 : index
    %28 = vector.load %arg2[%c32, %c0_12] : memref<544x128xf32, #tpu.memory_space<vmem>>, vector<3x48xf32>
    %29 = arith.truncf %28 : vector<3x48xf32> to vector<3x48xbf16>
    %30 = arith.truncf %9 : vector<128x3xf32> to vector<128x3xbf16>
    %cst_13 = arith.constant dense<0.000000e+00> : vector<128x48xf32>
    %31 = tpu.matmul %30, %29, %cst_13 {dimension_numbers = #tpu.dot_dimension_numbers<[1], [0], [0], [1], [0, 0, 1, 1], [], []>} : vector<128x3xbf16>, vector<3x48xbf16>, vector<128x48xf32> -> vector<128x48xf32>
    %c80 = arith.constant 80 : index
    %c0_14 = arith.constant 0 : index
    %32 = vector.load %arg2[%c80, %c0_14] : memref<544x128xf32, #tpu.memory_space<vmem>>, vector<1x48xf32>
    %33 = vector.broadcast %32 : vector<1x48xf32> to vector<128x48xf32>
    %34 = arith.addf %31, %33 : vector<128x48xf32>
    %cst_15 = arith.constant 0.000000e+00 : f32
    %35 = vector.broadcast %cst_15 : f32 to vector<128x48xf32>
    %36 = arith.maximumf %34, %35 : vector<128x48xf32>
    %37 = vector.extract_strided_slice %18 {offsets = [0, 0], sizes = [64, 48], strides = [1, 1]} : vector<128x48xf32> to vector<64x48xf32>
    %38 = vector.extract_strided_slice %27 {offsets = [0, 0], sizes = [64, 48], strides = [1, 1]} : vector<128x48xf32> to vector<64x48xf32>
    %39 = arith.truncf %38 : vector<64x48xf32> to vector<64x48xbf16>
    %40 = vector.extract_strided_slice %36 {offsets = [0, 0], sizes = [64, 48], strides = [1, 1]} : vector<128x48xf32> to vector<64x48xf32>
    %41 = arith.truncf %40 : vector<64x48xf32> to vector<64x48xbf16>
    %42 = arith.truncf %37 : vector<64x48xf32> to vector<64x48xbf16>
    %cst_16 = arith.constant dense<0.000000e+00> : vector<64x64xf32>
    %43 = tpu.matmul %42, %39, %cst_16 {dimension_numbers = #tpu.dot_dimension_numbers<[1], [1], [0], [0], [0, 0, 1, 0], [], []>} : vector<64x48xbf16>, vector<64x48xbf16>, vector<64x64xf32> -> vector<64x64xf32>
    %cst_17 = arith.constant 0.144337565 : f32
    %44 = vector.broadcast %cst_17 : f32 to vector<64x64xf32>
    %45 = arith.mulf %43, %44 : vector<64x64xf32>
    %cst_18 = arith.constant dense<0xFF800000> : vector<64xf32>
    %46 = vector.multi_reduction <maximumf>, %45, %cst_18 [1] : vector<64x64xf32> to vector<64xf32>
    %47 = vector.shape_cast %46 : vector<64xf32> to vector<64x1xf32>
    %48 = vector.broadcast %47 : vector<64x1xf32> to vector<64x64xf32>
    %49 = arith.subf %45, %48 : vector<64x64xf32>
    %50 = math.exp %49 : vector<64x64xf32>
    %cst_19 = arith.constant dense<0.000000e+00> : vector<64xf32>
    %51 = vector.multi_reduction <add>, %50, %cst_19 [1] : vector<64x64xf32> to vector<64xf32>
    %52 = vector.shape_cast %51 : vector<64xf32> to vector<64x1xf32>
    %53 = arith.truncf %50 : vector<64x64xf32> to vector<64x64xbf16>
    %cst_20 = arith.constant dense<0.000000e+00> : vector<64x48xf32>
    %54 = tpu.matmul %53, %41, %cst_20 {dimension_numbers = #tpu.dot_dimension_numbers<[1], [0], [0], [1], [0, 0, 1, 1], [], []>} : vector<64x64xbf16>, vector<64x48xbf16>, vector<64x48xf32> -> vector<64x48xf32>
    %55 = tpu.reciprocal %52 {approx = true} : vector<64x1xf32> -> vector<64x1xf32>
    %56 = vector.broadcast %55 : vector<64x1xf32> to vector<64x48xf32>
    %57 = arith.mulf %54, %56 : vector<64x48xf32>
    %58 = arith.addf %57, %37 : vector<64x48xf32>
    %59 = arith.truncf %58 : vector<64x48xf32> to vector<64x48xbf16>
    %cst_21 = arith.constant dense<0.000000e+00> : vector<64x64xf32>
    %60 = tpu.matmul %59, %39, %cst_21 {dimension_numbers = #tpu.dot_dimension_numbers<[1], [1], [0], [0], [0, 0, 1, 0], [], []>} : vector<64x48xbf16>, vector<64x48xbf16>, vector<64x64xf32> -> vector<64x64xf32>
    %cst_22 = arith.constant 0.144337565 : f32
    %61 = vector.broadcast %cst_22 : f32 to vector<64x64xf32>
    %62 = arith.mulf %60, %61 : vector<64x64xf32>
    %cst_23 = arith.constant dense<0xFF800000> : vector<64xf32>
    %63 = vector.multi_reduction <maximumf>, %62, %cst_23 [1] : vector<64x64xf32> to vector<64xf32>
    %64 = vector.shape_cast %63 : vector<64xf32> to vector<64x1xf32>
    %65 = vector.broadcast %64 : vector<64x1xf32> to vector<64x64xf32>
    %66 = arith.subf %62, %65 : vector<64x64xf32>
    %67 = math.exp %66 : vector<64x64xf32>
    %cst_24 = arith.constant dense<0.000000e+00> : vector<64xf32>
    %68 = vector.multi_reduction <add>, %67, %cst_24 [1] : vector<64x64xf32> to vector<64xf32>
    %69 = vector.shape_cast %68 : vector<64xf32> to vector<64x1xf32>
    %70 = arith.truncf %67 : vector<64x64xf32> to vector<64x64xbf16>
    %cst_25 = arith.constant dense<0.000000e+00> : vector<64x48xf32>
    %71 = tpu.matmul %70, %41, %cst_25 {dimension_numbers = #tpu.dot_dimension_numbers<[1], [0], [0], [1], [0, 0, 1, 1], [], []>} : vector<64x64xbf16>, vector<64x48xbf16>, vector<64x48xf32> -> vector<64x48xf32>
    %72 = tpu.reciprocal %69 {approx = true} : vector<64x1xf32> -> vector<64x1xf32>
    %73 = vector.broadcast %72 : vector<64x1xf32> to vector<64x48xf32>
    %74 = arith.mulf %71, %73 : vector<64x48xf32>
    %75 = arith.addf %74, %58 : vector<64x48xf32>
    %76 = arith.truncf %75 : vector<64x48xf32> to vector<64x48xbf16>
    %cst_26 = arith.constant dense<0.000000e+00> : vector<64x64xf32>
    %77 = tpu.matmul %76, %39, %cst_26 {dimension_numbers = #tpu.dot_dimension_numbers<[1], [1], [0], [0], [0, 0, 1, 0], [], []>} : vector<64x48xbf16>, vector<64x48xbf16>, vector<64x64xf32> -> vector<64x64xf32>
    %cst_27 = arith.constant 0.144337565 : f32
    %78 = vector.broadcast %cst_27 : f32 to vector<64x64xf32>
    %79 = arith.mulf %77, %78 : vector<64x64xf32>
    %cst_28 = arith.constant dense<0xFF800000> : vector<64xf32>
    %80 = vector.multi_reduction <maximumf>, %79, %cst_28 [1] : vector<64x64xf32> to vector<64xf32>
    %81 = vector.shape_cast %80 : vector<64xf32> to vector<64x1xf32>
    %82 = vector.broadcast %81 : vector<64x1xf32> to vector<64x64xf32>
    %83 = arith.subf %79, %82 : vector<64x64xf32>
    %84 = math.exp %83 : vector<64x64xf32>
    %cst_29 = arith.constant dense<0.000000e+00> : vector<64xf32>
    %85 = vector.multi_reduction <add>, %84, %cst_29 [1] : vector<64x64xf32> to vector<64xf32>
    %86 = vector.shape_cast %85 : vector<64xf32> to vector<64x1xf32>
    %87 = arith.truncf %84 : vector<64x64xf32> to vector<64x64xbf16>
    %cst_30 = arith.constant dense<0.000000e+00> : vector<64x48xf32>
    %88 = tpu.matmul %87, %41, %cst_30 {dimension_numbers = #tpu.dot_dimension_numbers<[1], [0], [0], [1], [0, 0, 1, 1], [], []>} : vector<64x64xbf16>, vector<64x48xbf16>, vector<64x48xf32> -> vector<64x48xf32>
    %89 = tpu.reciprocal %86 {approx = true} : vector<64x1xf32> -> vector<64x1xf32>
    %90 = vector.broadcast %89 : vector<64x1xf32> to vector<64x48xf32>
    %91 = arith.mulf %88, %90 : vector<64x48xf32>
    %92 = arith.addf %91, %75 : vector<64x48xf32>
    %93 = arith.truncf %92 : vector<64x48xf32> to vector<64x48xbf16>
    %cst_31 = arith.constant dense<0.000000e+00> : vector<64x64xf32>
    %94 = tpu.matmul %93, %39, %cst_31 {dimension_numbers = #tpu.dot_dimension_numbers<[1], [1], [0], [0], [0, 0, 1, 0], [], []>} : vector<64x48xbf16>, vector<64x48xbf16>, vector<64x64xf32> -> vector<64x64xf32>
    %cst_32 = arith.constant 0.144337565 : f32
    %95 = vector.broadcast %cst_32 : f32 to vector<64x64xf32>
    %96 = arith.mulf %94, %95 : vector<64x64xf32>
    %cst_33 = arith.constant dense<0xFF800000> : vector<64xf32>
    %97 = vector.multi_reduction <maximumf>, %96, %cst_33 [1] : vector<64x64xf32> to vector<64xf32>
    %98 = vector.shape_cast %97 : vector<64xf32> to vector<64x1xf32>
    %99 = vector.broadcast %98 : vector<64x1xf32> to vector<64x64xf32>
    %100 = arith.subf %96, %99 : vector<64x64xf32>
    %101 = math.exp %100 : vector<64x64xf32>
    %cst_34 = arith.constant dense<0.000000e+00> : vector<64xf32>
    %102 = vector.multi_reduction <add>, %101, %cst_34 [1] : vector<64x64xf32> to vector<64xf32>
    %103 = vector.shape_cast %102 : vector<64xf32> to vector<64x1xf32>
    %104 = arith.truncf %101 : vector<64x64xf32> to vector<64x64xbf16>
    %cst_35 = arith.constant dense<0.000000e+00> : vector<64x48xf32>
    %105 = tpu.matmul %104, %41, %cst_35 {dimension_numbers = #tpu.dot_dimension_numbers<[1], [0], [0], [1], [0, 0, 1, 1], [], []>} : vector<64x64xbf16>, vector<64x48xbf16>, vector<64x48xf32> -> vector<64x48xf32>
    %106 = tpu.reciprocal %103 {approx = true} : vector<64x1xf32> -> vector<64x1xf32>
    %107 = vector.broadcast %106 : vector<64x1xf32> to vector<64x48xf32>
    %108 = arith.mulf %105, %107 : vector<64x48xf32>
    %109 = arith.addf %108, %92 : vector<64x48xf32>
    %110 = arith.truncf %109 : vector<64x48xf32> to vector<64x48xbf16>
    %cst_36 = arith.constant dense<0.000000e+00> : vector<64x64xf32>
    %111 = tpu.matmul %110, %39, %cst_36 {dimension_numbers = #tpu.dot_dimension_numbers<[1], [1], [0], [0], [0, 0, 1, 0], [], []>} : vector<64x48xbf16>, vector<64x48xbf16>, vector<64x64xf32> -> vector<64x64xf32>
    %cst_37 = arith.constant 0.144337565 : f32
    %112 = vector.broadcast %cst_37 : f32 to vector<64x64xf32>
    %113 = arith.mulf %111, %112 : vector<64x64xf32>
    %cst_38 = arith.constant dense<0xFF800000> : vector<64xf32>
    %114 = vector.multi_reduction <maximumf>, %113, %cst_38 [1] : vector<64x64xf32> to vector<64xf32>
    %115 = vector.shape_cast %114 : vector<64xf32> to vector<64x1xf32>
    %116 = vector.broadcast %115 : vector<64x1xf32> to vector<64x64xf32>
    %117 = arith.subf %113, %116 : vector<64x64xf32>
    %118 = math.exp %117 : vector<64x64xf32>
    %cst_39 = arith.constant dense<0.000000e+00> : vector<64xf32>
    %119 = vector.multi_reduction <add>, %118, %cst_39 [1] : vector<64x64xf32> to vector<64xf32>
    %120 = vector.shape_cast %119 : vector<64xf32> to vector<64x1xf32>
    %121 = arith.truncf %118 : vector<64x64xf32> to vector<64x64xbf16>
    %cst_40 = arith.constant dense<0.000000e+00> : vector<64x48xf32>
    %122 = tpu.matmul %121, %41, %cst_40 {dimension_numbers = #tpu.dot_dimension_numbers<[1], [0], [0], [1], [0, 0, 1, 1], [], []>} : vector<64x64xbf16>, vector<64x48xbf16>, vector<64x48xf32> -> vector<64x48xf32>
    %123 = tpu.reciprocal %120 {approx = true} : vector<64x1xf32> -> vector<64x1xf32>
    %124 = vector.broadcast %123 : vector<64x1xf32> to vector<64x48xf32>
    %125 = arith.mulf %122, %124 : vector<64x48xf32>
    %126 = arith.addf %125, %109 : vector<64x48xf32>
    %127 = vector.extract_strided_slice %18 {offsets = [64, 0], sizes = [64, 48], strides = [1, 1]} : vector<128x48xf32> to vector<64x48xf32>
    %128 = vector.extract_strided_slice %27 {offsets = [64, 0], sizes = [64, 48], strides = [1, 1]} : vector<128x48xf32> to vector<64x48xf32>
    %129 = arith.truncf %128 : vector<64x48xf32> to vector<64x48xbf16>
    %130 = vector.extract_strided_slice %36 {offsets = [64, 0], sizes = [64, 48], strides = [1, 1]} : vector<128x48xf32> to vector<64x48xf32>
    %131 = arith.truncf %130 : vector<64x48xf32> to vector<64x48xbf16>
    %132 = arith.truncf %127 : vector<64x48xf32> to vector<64x48xbf16>
    %cst_41 = arith.constant dense<0.000000e+00> : vector<64x64xf32>
    %133 = tpu.matmul %132, %129, %cst_41 {dimension_numbers = #tpu.dot_dimension_numbers<[1], [1], [0], [0], [0, 0, 1, 0], [], []>} : vector<64x48xbf16>, vector<64x48xbf16>, vector<64x64xf32> -> vector<64x64xf32>
    %cst_42 = arith.constant 0.144337565 : f32
    %134 = vector.broadcast %cst_42 : f32 to vector<64x64xf32>
    %135 = arith.mulf %133, %134 : vector<64x64xf32>
    %cst_43 = arith.constant dense<0xFF800000> : vector<64xf32>
    %136 = vector.multi_reduction <maximumf>, %135, %cst_43 [1] : vector<64x64xf32> to vector<64xf32>
    %137 = vector.shape_cast %136 : vector<64xf32> to vector<64x1xf32>
    %138 = vector.broadcast %137 : vector<64x1xf32> to vector<64x64xf32>
    %139 = arith.subf %135, %138 : vector<64x64xf32>
    %140 = math.exp %139 : vector<64x64xf32>
    %cst_44 = arith.constant dense<0.000000e+00> : vector<64xf32>
    %141 = vector.multi_reduction <add>, %140, %cst_44 [1] : vector<64x64xf32> to vector<64xf32>
    %142 = vector.shape_cast %141 : vector<64xf32> to vector<64x1xf32>
    %143 = arith.truncf %140 : vector<64x64xf32> to vector<64x64xbf16>
    %cst_45 = arith.constant dense<0.000000e+00> : vector<64x48xf32>
    %144 = tpu.matmul %143, %131, %cst_45 {dimension_numbers = #tpu.dot_dimension_numbers<[1], [0], [0], [1], [0, 0, 1, 1], [], []>} : vector<64x64xbf16>, vector<64x48xbf16>, vector<64x48xf32> -> vector<64x48xf32>
    %145 = tpu.reciprocal %142 {approx = true} : vector<64x1xf32> -> vector<64x1xf32>
    %146 = vector.broadcast %145 : vector<64x1xf32> to vector<64x48xf32>
    %147 = arith.mulf %144, %146 : vector<64x48xf32>
    %148 = arith.addf %147, %127 : vector<64x48xf32>
    %149 = arith.truncf %148 : vector<64x48xf32> to vector<64x48xbf16>
    %cst_46 = arith.constant dense<0.000000e+00> : vector<64x64xf32>
    %150 = tpu.matmul %149, %129, %cst_46 {dimension_numbers = #tpu.dot_dimension_numbers<[1], [1], [0], [0], [0, 0, 1, 0], [], []>} : vector<64x48xbf16>, vector<64x48xbf16>, vector<64x64xf32> -> vector<64x64xf32>
    %cst_47 = arith.constant 0.144337565 : f32
    %151 = vector.broadcast %cst_47 : f32 to vector<64x64xf32>
    %152 = arith.mulf %150, %151 : vector<64x64xf32>
    %cst_48 = arith.constant dense<0xFF800000> : vector<64xf32>
    %153 = vector.multi_reduction <maximumf>, %152, %cst_48 [1] : vector<64x64xf32> to vector<64xf32>
    %154 = vector.shape_cast %153 : vector<64xf32> to vector<64x1xf32>
    %155 = vector.broadcast %154 : vector<64x1xf32> to vector<64x64xf32>
    %156 = arith.subf %152, %155 : vector<64x64xf32>
    %157 = math.exp %156 : vector<64x64xf32>
    %cst_49 = arith.constant dense<0.000000e+00> : vector<64xf32>
    %158 = vector.multi_reduction <add>, %157, %cst_49 [1] : vector<64x64xf32> to vector<64xf32>
    %159 = vector.shape_cast %158 : vector<64xf32> to vector<64x1xf32>
    %160 = arith.truncf %157 : vector<64x64xf32> to vector<64x64xbf16>
    %cst_50 = arith.constant dense<0.000000e+00> : vector<64x48xf32>
    %161 = tpu.matmul %160, %131, %cst_50 {dimension_numbers = #tpu.dot_dimension_numbers<[1], [0], [0], [1], [0, 0, 1, 1], [], []>} : vector<64x64xbf16>, vector<64x48xbf16>, vector<64x48xf32> -> vector<64x48xf32>
    %162 = tpu.reciprocal %159 {approx = true} : vector<64x1xf32> -> vector<64x1xf32>
    %163 = vector.broadcast %162 : vector<64x1xf32> to vector<64x48xf32>
    %164 = arith.mulf %161, %163 : vector<64x48xf32>
    %165 = arith.addf %164, %148 : vector<64x48xf32>
    %166 = arith.truncf %165 : vector<64x48xf32> to vector<64x48xbf16>
    %cst_51 = arith.constant dense<0.000000e+00> : vector<64x64xf32>
    %167 = tpu.matmul %166, %129, %cst_51 {dimension_numbers = #tpu.dot_dimension_numbers<[1], [1], [0], [0], [0, 0, 1, 0], [], []>} : vector<64x48xbf16>, vector<64x48xbf16>, vector<64x64xf32> -> vector<64x64xf32>
    %cst_52 = arith.constant 0.144337565 : f32
    %168 = vector.broadcast %cst_52 : f32 to vector<64x64xf32>
    %169 = arith.mulf %167, %168 : vector<64x64xf32>
    %cst_53 = arith.constant dense<0xFF800000> : vector<64xf32>
    %170 = vector.multi_reduction <maximumf>, %169, %cst_53 [1] : vector<64x64xf32> to vector<64xf32>
    %171 = vector.shape_cast %170 : vector<64xf32> to vector<64x1xf32>
    %172 = vector.broadcast %171 : vector<64x1xf32> to vector<64x64xf32>
    %173 = arith.subf %169, %172 : vector<64x64xf32>
    %174 = math.exp %173 : vector<64x64xf32>
    %cst_54 = arith.constant dense<0.000000e+00> : vector<64xf32>
    %175 = vector.multi_reduction <add>, %174, %cst_54 [1] : vector<64x64xf32> to vector<64xf32>
    %176 = vector.shape_cast %175 : vector<64xf32> to vector<64x1xf32>
    %177 = arith.truncf %174 : vector<64x64xf32> to vector<64x64xbf16>
    %cst_55 = arith.constant dense<0.000000e+00> : vector<64x48xf32>
    %178 = tpu.matmul %177, %131, %cst_55 {dimension_numbers = #tpu.dot_dimension_numbers<[1], [0], [0], [1], [0, 0, 1, 1], [], []>} : vector<64x64xbf16>, vector<64x48xbf16>, vector<64x48xf32> -> vector<64x48xf32>
    %179 = tpu.reciprocal %176 {approx = true} : vector<64x1xf32> -> vector<64x1xf32>
    %180 = vector.broadcast %179 : vector<64x1xf32> to vector<64x48xf32>
    %181 = arith.mulf %178, %180 : vector<64x48xf32>
    %182 = arith.addf %181, %165 : vector<64x48xf32>
    %183 = arith.truncf %182 : vector<64x48xf32> to vector<64x48xbf16>
    %cst_56 = arith.constant dense<0.000000e+00> : vector<64x64xf32>
    %184 = tpu.matmul %183, %129, %cst_56 {dimension_numbers = #tpu.dot_dimension_numbers<[1], [1], [0], [0], [0, 0, 1, 0], [], []>} : vector<64x48xbf16>, vector<64x48xbf16>, vector<64x64xf32> -> vector<64x64xf32>
    %cst_57 = arith.constant 0.144337565 : f32
    %185 = vector.broadcast %cst_57 : f32 to vector<64x64xf32>
    %186 = arith.mulf %184, %185 : vector<64x64xf32>
    %cst_58 = arith.constant dense<0xFF800000> : vector<64xf32>
    %187 = vector.multi_reduction <maximumf>, %186, %cst_58 [1] : vector<64x64xf32> to vector<64xf32>
    %188 = vector.shape_cast %187 : vector<64xf32> to vector<64x1xf32>
    %189 = vector.broadcast %188 : vector<64x1xf32> to vector<64x64xf32>
    %190 = arith.subf %186, %189 : vector<64x64xf32>
    %191 = math.exp %190 : vector<64x64xf32>
    %cst_59 = arith.constant dense<0.000000e+00> : vector<64xf32>
    %192 = vector.multi_reduction <add>, %191, %cst_59 [1] : vector<64x64xf32> to vector<64xf32>
    %193 = vector.shape_cast %192 : vector<64xf32> to vector<64x1xf32>
    %194 = arith.truncf %191 : vector<64x64xf32> to vector<64x64xbf16>
    %cst_60 = arith.constant dense<0.000000e+00> : vector<64x48xf32>
    %195 = tpu.matmul %194, %131, %cst_60 {dimension_numbers = #tpu.dot_dimension_numbers<[1], [0], [0], [1], [0, 0, 1, 1], [], []>} : vector<64x64xbf16>, vector<64x48xbf16>, vector<64x48xf32> -> vector<64x48xf32>
    %196 = tpu.reciprocal %193 {approx = true} : vector<64x1xf32> -> vector<64x1xf32>
    %197 = vector.broadcast %196 : vector<64x1xf32> to vector<64x48xf32>
    %198 = arith.mulf %195, %197 : vector<64x48xf32>
    %199 = arith.addf %198, %182 : vector<64x48xf32>
    %200 = arith.truncf %199 : vector<64x48xf32> to vector<64x48xbf16>
    %cst_61 = arith.constant dense<0.000000e+00> : vector<64x64xf32>
    %201 = tpu.matmul %200, %129, %cst_61 {dimension_numbers = #tpu.dot_dimension_numbers<[1], [1], [0], [0], [0, 0, 1, 0], [], []>} : vector<64x48xbf16>, vector<64x48xbf16>, vector<64x64xf32> -> vector<64x64xf32>
    %cst_62 = arith.constant 0.144337565 : f32
    %202 = vector.broadcast %cst_62 : f32 to vector<64x64xf32>
    %203 = arith.mulf %201, %202 : vector<64x64xf32>
    %cst_63 = arith.constant dense<0xFF800000> : vector<64xf32>
    %204 = vector.multi_reduction <maximumf>, %203, %cst_63 [1] : vector<64x64xf32> to vector<64xf32>
    %205 = vector.shape_cast %204 : vector<64xf32> to vector<64x1xf32>
    %206 = vector.broadcast %205 : vector<64x1xf32> to vector<64x64xf32>
    %207 = arith.subf %203, %206 : vector<64x64xf32>
    %208 = math.exp %207 : vector<64x64xf32>
    %cst_64 = arith.constant dense<0.000000e+00> : vector<64xf32>
    %209 = vector.multi_reduction <add>, %208, %cst_64 [1] : vector<64x64xf32> to vector<64xf32>
    %210 = vector.shape_cast %209 : vector<64xf32> to vector<64x1xf32>
    %211 = arith.truncf %208 : vector<64x64xf32> to vector<64x64xbf16>
    %cst_65 = arith.constant dense<0.000000e+00> : vector<64x48xf32>
    %212 = tpu.matmul %211, %131, %cst_65 {dimension_numbers = #tpu.dot_dimension_numbers<[1], [0], [0], [1], [0, 0, 1, 1], [], []>} : vector<64x64xbf16>, vector<64x48xbf16>, vector<64x48xf32> -> vector<64x48xf32>
    %213 = tpu.reciprocal %210 {approx = true} : vector<64x1xf32> -> vector<64x1xf32>
    %214 = vector.broadcast %213 : vector<64x1xf32> to vector<64x48xf32>
    %215 = arith.mulf %212, %214 : vector<64x48xf32>
    %216 = arith.addf %215, %199 : vector<64x48xf32>
    %217 = tpu.concatenate %126, %216 in 0 : vector<64x48xf32>, vector<64x48xf32> -> vector<128x48xf32>
    %c96 = arith.constant 96 : index
    %c0_66 = arith.constant 0 : index
    %218 = vector.load %arg2[%c96, %c0_66] : memref<544x128xf32, #tpu.memory_space<vmem>>, vector<48x48xf32>
    %219 = arith.truncf %218 : vector<48x48xf32> to vector<48x48xbf16>
    %220 = arith.truncf %217 : vector<128x48xf32> to vector<128x48xbf16>
    %cst_67 = arith.constant dense<0.000000e+00> : vector<128x48xf32>
    %221 = tpu.matmul %220, %219, %cst_67 {dimension_numbers = #tpu.dot_dimension_numbers<[1], [0], [0], [1], [0, 0, 1, 1], [], []>} : vector<128x48xbf16>, vector<48x48xbf16>, vector<128x48xf32> -> vector<128x48xf32>
    %c144 = arith.constant 144 : index
    %c0_68 = arith.constant 0 : index
    %222 = vector.load %arg2[%c144, %c0_68] : memref<544x128xf32, #tpu.memory_space<vmem>>, vector<1x48xf32>
    %223 = vector.broadcast %222 : vector<1x48xf32> to vector<128x48xf32>
    %224 = arith.addf %221, %223 : vector<128x48xf32>
    %cst_69 = arith.constant 0.000000e+00 : f32
    %225 = vector.broadcast %cst_69 : f32 to vector<128x48xf32>
    %226 = arith.maximumf %224, %225 : vector<128x48xf32>
    %c160 = arith.constant 160 : index
    %c0_70 = arith.constant 0 : index
    %227 = vector.load %arg2[%c160, %c0_70] : memref<544x128xf32, #tpu.memory_space<vmem>>, vector<48x32xf32>
    %228 = arith.truncf %227 : vector<48x32xf32> to vector<48x32xbf16>
    %229 = arith.truncf %226 : vector<128x48xf32> to vector<128x48xbf16>
    %cst_71 = arith.constant dense<0.000000e+00> : vector<128x32xf32>
    %230 = tpu.matmul %229, %228, %cst_71 {dimension_numbers = #tpu.dot_dimension_numbers<[1], [0], [0], [1], [0, 0, 1, 1], [], []>} : vector<128x48xbf16>, vector<48x32xbf16>, vector<128x32xf32> -> vector<128x32xf32>
    %c208 = arith.constant 208 : index
    %c0_72 = arith.constant 0 : index
    %231 = vector.load %arg2[%c208, %c0_72] : memref<544x128xf32, #tpu.memory_space<vmem>>, vector<1x32xf32>
    %232 = vector.broadcast %231 : vector<1x32xf32> to vector<128x32xf32>
    %233 = arith.addf %230, %232 : vector<128x32xf32>
    %cst_73 = arith.constant 0.000000e+00 : f32
    %234 = vector.broadcast %cst_73 : f32 to vector<128x32xf32>
    %235 = arith.maximumf %233, %234 : vector<128x32xf32>
    %c224 = arith.constant 224 : index
    %c0_74 = arith.constant 0 : index
    %236 = vector.load %arg2[%c224, %c0_74] : memref<544x128xf32, #tpu.memory_space<vmem>>, vector<32x16xf32>
    %237 = arith.truncf %236 : vector<32x16xf32> to vector<32x16xbf16>
    %238 = arith.truncf %235 : vector<128x32xf32> to vector<128x32xbf16>
    %cst_75 = arith.constant dense<0.000000e+00> : vector<128x16xf32>
    %239 = tpu.matmul %238, %237, %cst_75 {dimension_numbers = #tpu.dot_dimension_numbers<[1], [0], [0], [1], [0, 0, 1, 1], [], []>} : vector<128x32xbf16>, vector<32x16xbf16>, vector<128x16xf32> -> vector<128x16xf32>
    %c256 = arith.constant 256 : index
    %c0_76 = arith.constant 0 : index
    %240 = vector.load %arg2[%c256, %c0_76] : memref<544x128xf32, #tpu.memory_space<vmem>>, vector<1x16xf32>
    %241 = vector.broadcast %240 : vector<1x16xf32> to vector<128x16xf32>
    %242 = arith.addf %239, %241 : vector<128x16xf32>
    %cst_77 = arith.constant 0.000000e+00 : f32
    %243 = vector.broadcast %cst_77 : f32 to vector<128x16xf32>
    %244 = arith.maximumf %242, %243 : vector<128x16xf32>
    %c272 = arith.constant 272 : index
    %c0_78 = arith.constant 0 : index
    %245 = vector.load %arg2[%c272, %c0_78] : memref<544x128xf32, #tpu.memory_space<vmem>>, vector<16x1xf32>
    %246 = arith.truncf %245 : vector<16x1xf32> to vector<16x1xbf16>
    %247 = arith.truncf %244 : vector<128x16xf32> to vector<128x16xbf16>
    %cst_79 = arith.constant dense<0.000000e+00> : vector<128x1xf32>
    %248 = tpu.matmul %247, %246, %cst_79 {dimension_numbers = #tpu.dot_dimension_numbers<[1], [0], [0], [1], [0, 0, 1, 1], [], []>} : vector<128x16xbf16>, vector<16x1xbf16>, vector<128x1xf32> -> vector<128x1xf32>
    %c0_80 = arith.constant 0 : index
    %249 = memref.load %arg3[%c0_80] : memref<3xf32, #tpu.memory_space<smem>>
    %250 = vector.broadcast %249 : f32 to vector<128x1xf32>
    %251 = arith.addf %248, %250 : vector<128x1xf32>
    %cst_81 = arith.constant 0.000000e+00 : f32
    %252 = vector.broadcast %cst_81 : f32 to vector<128x1xf32>
    %253 = arith.maximumf %251, %252 : vector<128x1xf32>
    %254 = tpu.iota {dimensions = array<i32: 0>} : vector<128x8xi32>
    %255 = tpu.iota {dimensions = array<i32: 1>} : vector<128x8xi32>
    %c8_i32 = arith.constant 8 : i32
    %c0_i32 = arith.constant 0 : i32
    %256 = arith.cmpi eq, %c8_i32, %c0_i32 : i32
    %c1_i32 = arith.constant 1 : i32
    %257 = arith.select %256, %c1_i32, %c8_i32 : i32
    %258 = vector.broadcast %257 : i32 to vector<128x8xi32>
    %259 = arith.remsi %254, %258 : vector<128x8xi32>
    %c0_i32_82 = arith.constant 0 : i32
    %260 = vector.broadcast %c0_i32_82 : i32 to vector<128x8xi32>
    %261 = arith.cmpi ne, %259, %260 : vector<128x8xi32>
    %c0_i32_83 = arith.constant 0 : i32
    %262 = vector.broadcast %c0_i32_83 : i32 to vector<128x8xi32>
    %263 = arith.cmpi slt, %259, %262 : vector<128x8xi32>
    %c0_i32_84 = arith.constant 0 : i32
    %264 = arith.cmpi slt, %257, %c0_i32_84 : i32
    %265 = vector.broadcast %264 : i1 to vector<128x8xi1>
    %266 = vector.broadcast %265 : vector<128x8xi1> to vector<128x8xi1>
    %267 = arith.xori %263, %266 : vector<128x8xi1>
    %268 = arith.andi %267, %261 : vector<128x8xi1>
    %269 = vector.broadcast %257 : i32 to vector<128x8xi32>
    %270 = arith.addi %259, %269 : vector<128x8xi32>
    %271 = arith.select %268, %270, %259 : vector<128x8xi1>, vector<128x8xi32>
    %272 = arith.cmpi eq, %271, %255 : vector<128x8xi32>
    %273 = arith.extui %272 : vector<128x8xi1> to vector<128x8xi32>
    %274 = arith.sitofp %273 : vector<128x8xi32> to vector<128x8xf32>
    %275 = vector.broadcast %253 : vector<128x1xf32> to vector<128x8xf32>
    %276 = arith.mulf %275, %274 : vector<128x8xf32>
    %277 = arith.truncf %276 : vector<128x8xf32> to vector<128x8xbf16>
    %c288 = arith.constant 288 : index
    %c0_85 = arith.constant 0 : index
    %278 = vector.load %arg2[%c288, %c0_85] : memref<544x128xf32, #tpu.memory_space<vmem>>, vector<224x64xf32>
    %279 = arith.truncf %278 : vector<224x64xf32> to vector<224x64xbf16>
    %c512 = arith.constant 512 : index
    %c0_86 = arith.constant 0 : index
    %280 = vector.load %arg2[%c512, %c0_86] : memref<544x128xf32, #tpu.memory_space<vmem>>, vector<8x128xf32>
    %281 = arith.truncf %280 : vector<8x128xf32> to vector<8x128xbf16>
    %c528 = arith.constant 528 : index
    %c0_87 = arith.constant 0 : index
    %282 = vector.load %arg2[%c528, %c0_87] : memref<544x128xf32, #tpu.memory_space<vmem>>, vector<8x128xf32>
    %283 = arith.truncf %282 : vector<8x128xf32> to vector<8x128xbf16>
    %c1_88 = arith.constant 1 : index
    %284 = memref.load %arg3[%c1_88] : memref<3xf32, #tpu.memory_space<smem>>
    %c2 = arith.constant 2 : index
    %285 = memref.load %arg3[%c2] : memref<3xf32, #tpu.memory_space<smem>>
    %286 = vector.extract_strided_slice %277 {offsets = [0, 0], sizes = [64, 8], strides = [1, 1]} : vector<128x8xbf16> to vector<64x8xbf16>
    %cst_89 = arith.constant dense<0.000000e+00> : vector<224x8xf32>
    %287 = tpu.matmul %279, %286, %cst_89 {dimension_numbers = #tpu.dot_dimension_numbers<[1], [0], [0], [1], [0, 0, 1, 1], [], []>} : vector<224x64xbf16>, vector<64x8xbf16>, vector<224x8xf32> -> vector<224x8xf32>
    %288 = vector.extract_strided_slice %287 {offsets = [0, 0], sizes = [112, 8], strides = [1, 1]} : vector<224x8xf32> to vector<112x8xf32>
    %289 = vector.extract_strided_slice %287 {offsets = [112, 0], sizes = [112, 8], strides = [1, 1]} : vector<224x8xf32> to vector<112x8xf32>
    %290 = arith.maximumf %288, %289 : vector<112x8xf32>
    %291 = arith.truncf %290 : vector<112x8xf32> to vector<112x8xbf16>
    %cst_90 = arith.constant dense<0.000000e+00> : vector<112x128xf32>
    %292 = tpu.matmul %291, %281, %cst_90 {dimension_numbers = #tpu.dot_dimension_numbers<[1], [0], [0], [1], [0, 0, 1, 1], [], []>} : vector<112x8xbf16>, vector<8x128xbf16>, vector<112x128xf32> -> vector<112x128xf32>
    %cst_91 = arith.constant dense<0.000000e+00> : vector<112x128xf32>
    %293 = tpu.matmul %291, %283, %cst_91 {dimension_numbers = #tpu.dot_dimension_numbers<[1], [0], [0], [1], [0, 0, 1, 1], [], []>} : vector<112x8xbf16>, vector<8x128xbf16>, vector<112x128xf32> -> vector<112x128xf32>
    %294 = arith.maximumf %292, %293 : vector<112x128xf32>
    %295 = vector.extract_strided_slice %294 {offsets = [0, 0], sizes = [100, 128], strides = [1, 1]} : vector<112x128xf32> to vector<100x128xf32>
    %296 = vector.broadcast %284 : f32 to vector<100x128xf32>
    %297 = arith.mulf %295, %296 : vector<100x128xf32>
    %298 = vector.broadcast %285 : f32 to vector<100x128xf32>
    %299 = arith.addf %297, %298 : vector<100x128xf32>
    %300 = arith.negf %299 : vector<100x128xf32>
    %301 = math.exp %300 : vector<100x128xf32>
    %cst_92 = arith.constant 1.000000e+00 : f32
    %302 = vector.broadcast %cst_92 : f32 to vector<100x128xf32>
    %303 = arith.addf %302, %301 : vector<100x128xf32>
    %304 = arith.divf %302, %303 : vector<100x128xf32>
    %c0_93 = arith.constant 0 : index
    %c0_94 = arith.constant 0 : index
    %c0_95 = arith.constant 0 : index
    %305 = vector.load %arg4[%c0_93, %c0_94, %c0_95] : memref<2x100x128xf32, #tpu.memory_space<vmem>>, vector<1x100x128xf32>
    %306 = vector.shape_cast %305 : vector<1x100x128xf32> to vector<100x128xf32>
    %307 = vector.shape_cast %304 : vector<100x128xf32> to vector<1x100x128xf32>
    tpu.vector_store %arg4[%c0_93, %c0_94, %c0_95], %307 {strides = array<i32>} : memref<2x100x128xf32, #tpu.memory_space<vmem>>, vector<1x100x128xf32>,
    %308 = vector.extract_strided_slice %277 {offsets = [64, 0], sizes = [64, 8], strides = [1, 1]} : vector<128x8xbf16> to vector<64x8xbf16>
    %cst_96 = arith.constant dense<0.000000e+00> : vector<224x8xf32>
    %309 = tpu.matmul %279, %308, %cst_96 {dimension_numbers = #tpu.dot_dimension_numbers<[1], [0], [0], [1], [0, 0, 1, 1], [], []>} : vector<224x64xbf16>, vector<64x8xbf16>, vector<224x8xf32> -> vector<224x8xf32>
    %310 = vector.extract_strided_slice %309 {offsets = [0, 0], sizes = [112, 8], strides = [1, 1]} : vector<224x8xf32> to vector<112x8xf32>
    %311 = vector.extract_strided_slice %309 {offsets = [112, 0], sizes = [112, 8], strides = [1, 1]} : vector<224x8xf32> to vector<112x8xf32>
    %312 = arith.maximumf %310, %311 : vector<112x8xf32>
    %313 = arith.truncf %312 : vector<112x8xf32> to vector<112x8xbf16>
    %cst_97 = arith.constant dense<0.000000e+00> : vector<112x128xf32>
    %314 = tpu.matmul %313, %281, %cst_97 {dimension_numbers = #tpu.dot_dimension_numbers<[1], [0], [0], [1], [0, 0, 1, 1], [], []>} : vector<112x8xbf16>, vector<8x128xbf16>, vector<112x128xf32> -> vector<112x128xf32>
    %cst_98 = arith.constant dense<0.000000e+00> : vector<112x128xf32>
    %315 = tpu.matmul %313, %283, %cst_98 {dimension_numbers = #tpu.dot_dimension_numbers<[1], [0], [0], [1], [0, 0, 1, 1], [], []>} : vector<112x8xbf16>, vector<8x128xbf16>, vector<112x128xf32> -> vector<112x128xf32>
    %316 = arith.maximumf %314, %315 : vector<112x128xf32>
    %317 = vector.extract_strided_slice %316 {offsets = [0, 0], sizes = [100, 128], strides = [1, 1]} : vector<112x128xf32> to vector<100x128xf32>
    %318 = vector.broadcast %284 : f32 to vector<100x128xf32>
    %319 = arith.mulf %317, %318 : vector<100x128xf32>
    %320 = vector.broadcast %285 : f32 to vector<100x128xf32>
    %321 = arith.addf %319, %320 : vector<100x128xf32>
    %322 = arith.negf %321 : vector<100x128xf32>
    %323 = math.exp %322 : vector<100x128xf32>
    %cst_99 = arith.constant 1.000000e+00 : f32
    %324 = vector.broadcast %cst_99 : f32 to vector<100x128xf32>
    %325 = arith.addf %324, %323 : vector<100x128xf32>
    %326 = arith.divf %324, %325 : vector<100x128xf32>
    %c1_100 = arith.constant 1 : index
    %c0_101 = arith.constant 0 : index
    %c0_102 = arith.constant 0 : index
    %327 = vector.load %arg4[%c1_100, %c0_101, %c0_102] : memref<2x100x128xf32, #tpu.memory_space<vmem>>, vector<1x100x128xf32>
    %328 = vector.shape_cast %327 : vector<1x100x128xf32> to vector<100x128xf32>
    %329 = vector.shape_cast %326 : vector<100x128xf32> to vector<1x100x128xf32>
    tpu.vector_store %arg4[%c1_100, %c0_101, %c0_102], %329 {strides = array<i32>} : memref<2x100x128xf32, #tpu.memory_space<vmem>>, vector<1x100x128xf32>,
    return
  }
  func.func @transform_0(%arg0: i32) -> (i32, i32, i32) {
    %c0_i32 = arith.constant 0 : i32
    %c0_i32_0 = arith.constant 0 : i32
    %c0_i32_1 = arith.constant 0 : i32
    return %arg0, %c0_i32, %c0_i32_0 : i32, i32, i32
  }
  func.func @transform_1(%arg0: i32) -> (i32, i32) {
    %c0_i32 = arith.constant 0 : i32
    %c0_i32_0 = arith.constant 0 : i32
    %c0_i32_1 = arith.constant 0 : i32
    return %c0_i32, %c0_i32_0 : i32, i32
  }
  func.func @transform_2(%arg0: i32) -> i32 {
    %c0_i32 = arith.constant 0 : i32
    %c0_i32_0 = arith.constant 0 : i32
    return %c0_i32 : i32
  }
  func.func @transform_3(%arg0: i32) -> (i32, i32, i32) {
    %c0_i32 = arith.constant 0 : i32
    %c0_i32_0 = arith.constant 0 : i32
    %c0_i32_1 = arith.constant 0 : i32
    return %arg0, %c0_i32, %c0_i32_0 : i32, i32, i32
  }
}

</mosaic_0001>

<bundles_post_ra>
// kernel: _forward_impl.1
= control target key start
LH: loop header
LB: loop body
LE: loop exit
PB: predicated region body
PF: predicated region fallthrough
CT: control target
= control target key end

     0   :  { %8 = vsyncpa [#allocation3], 0  ;;  %s8815_s0 = inlined_call_operand.vmem [shape: f32[2,128,3], index: 0, kind: input, shape index: {}]   ;;  %s8816_s1 = inlined_call_operand.vmem [shape: f32[544,128], index: 1, kind: input, shape index: {}]   ;;  %s8817_s2 = inlined_call_operand.vmem [shape: f32[3], index: 2, kind: input, shape index: {}]   ;;  %s8818_s3 = inlined_call_operand.vmem [shape: f32[2,100,128], index: 3, kind: output, shape index: {}]  }
   0x1   :  { %s19_s14 = sshll.u32 %s8817_s2, 4  ;;  %s20_s14 = int_to_ptr.vmem [resolvable:$true] %s19_s14 }
   0x2   :  { %s6969_s15 = scalar_lea.vmem %s20_s14, 16  ;;  %p6974_p1 = scmp.lt.s32.totalorder %s20_s14, %s20_s14 }
   0x3   :  { %p6970_p0 = scmp.ne.s32.totalorder %s20_s14, %s6969_s15  ;;  %p6975_p2 = scmp.lt.s32.totalorder %s6969_s15, %s6969_s15 }
   0x5   :  { %p6976_p3 = por %p6975_p2, %p6974_p1 }
   0x7   :  { %p6977_p4 = pnand %p6976_p3, %p6970_p0 }
   0x9   :  { %6980 = shalt.err (!%p6977_p4)
}
   0xa   :  { %s6983_s16 = smov [#allocation2]  }
   0xb   :  { %22 = dma.vmem_to_smem %s20_s14, 16, %s6983_s16, [#allocation3]  }
   0xc   :  { %6981 = dma.done.wait [#allocation3], 16  }
   0xd   :  { %6982 = vsyncadd [#allocation3], 4294967280 }
   0xe   :  { %26 = sfence }
   0xf   :  { %vm101_vm0 = vcmask 1040384   ;;  %vm102_vm1 = vcmask 1041408   ;;  %v221_v0 = vld [vmem:[%s8816_s1 + $0x10] sm:$0x7]  ;;  %v36_v1 = vld [vmem:[%s8815_s0 + $0x40] sm:$0xff]  ;;  %v6984_v2 = vmov 65535  }
  0x10   :  { %v103_v3 = vsel %vm101_vm0, 4294967295, %v6984_v2  ;;  %v222_v4 = vpack.c.bf16 %v221_v0, %v221_v0  ;;  %v37_v5 = vld [vmem:[%s8815_s0 + $0x48] sm:$0xff]  ;;  %vm76_vm2 = vcmask 23552   ;;  %v38_v8 = vld [vmem:[%s8815_s0 + $0x50] sm:$0xff]  ;;  %v39_v9 = vld [vmem:[%s8815_s0 + $0x58] sm:$0xff]  ;;  %vm511_vm3 = vcmask 392192  }
  0x11   :  { %v104_v6 = vsel %vm102_vm1, %v103_v3, 0  ;;  %v223_v7 = vpack.c.bf16 %v37_v5, %v36_v1  ;;  %v40_v10 = vld [vmem:[%s8815_s0 + $0x60] sm:$0xff]  ;;  %v41_v12 = vld [vmem:[%s8815_s0 + $0x68] sm:$0xff]  ;;  %v224_v17 = vpack.c.bf16 %v39_v9, %v38_v8  ;;  %v30_v19 = vld [vmem:[%s8815_s0 + $0x10] sm:$0xff]  ;;  %vm609_vm4 = vcmask 523264   ;;  %s3687_s22 = sld [smem:[#allocation2]] }
  0x12   :  { %v261_v11 = vand.u32 %v222_v4, %v104_v6  ;;  %v61_v13 = vld [vmem:[%s8816_s1] sm:$0x7]  ;;  %v29_v16 = vld [vmem:[%s8815_s0 + $0x8] sm:$0xff]  ;;  %v31_v20 = vld [vmem:[%s8815_s0 + $0x18] sm:$0xff]  ;;  %v225_v21 = vpack.c.bf16 %v41_v12, %v40_v10  ;;  %vm3538_vm5 = vcmask 261120   ;;  %vm3689_vm6 = vcmask 130048  }
  0x13   :  { %v28_v14 = vld [vmem:[%s8815_s0] sm:$0xff]  ;;  %5869 = vmatprep.mubr.msk.bf16.mxu1 %vm76_vm2, %v223_v7  ;;  %v62_v15 = vpack.c.bf16 %v61_v13, %v61_v13  ;;  %v33_v24 = vld [vmem:[%s8815_s0 + $0x28] sm:$0xff]  ;;  %v64_v25 = vpack.c.bf16 %v31_v20, %v30_v19  ;;  %v42_v27 = vld [vmem:[%s8815_s0 + $0x70] sm:$0xff]  ;;  %vm4468_vm15 = vcmask 1043456   ;;  %vm6987_vm0 = vmmov 0   ;;  %s5457_s25 = sld [smem:[#allocation2 + $0x2]] }
  0x14   :  { %5867 = vmatprep.subr.bf16.mxu1 %v261_v11  ;;  %v63_v18 = vpack.c.bf16 %v29_v16, %v28_v14  ;;  %v32_v23 = vld [vmem:[%s8815_s0 + $0x20] sm:$0xff]  ;;  %v43_v28 = vld [vmem:[%s8815_s0 + $0x78] sm:$0xff]  ;;  %v34_v30 = vld [vmem:[%s8815_s0 + $0x30] sm:$0xff] }
  0x15   :  { %5868 = vmatpush3.bf16.msra.mxu1 %v261_v11  ;;  %v106_v22 = vand.u32 %v104_v6, %v62_v15  ;;  %v65_v26 = vpack.c.bf16 %v33_v24, %v32_v23  ;;  %v226_v29 = vpack.c.bf16 %v43_v28, %v42_v27  ;;  %v35_v31 = vld [vmem:[%s8815_s0 + $0x38] sm:$0xff]  ;;  %v5282_v32 = vld [vmem:[%s8815_s0 + $0x80] sm:$0xff]  ;;  %v5283_v33 = vld [vmem:[%s8815_s0 + $0x88] sm:$0xff] }
  0x16   :  { %5851 = vmatprep.mubr.msk.bf16.mxu0 %vm76_vm2, %v63_v18  ;;  %v66_v34 = vpack.c.bf16 %v35_v31, %v34_v30  ;;  %v67_v35 = vpack.c.bf16 %v5283_v33, %v5282_v32  ;;  %v5284_v36 = vld [vmem:[%s8815_s0 + $0x90] sm:$0xff]  ;;  %v5285_v37 = vld [vmem:[%s8815_s0 + $0x98] sm:$0xff]  ;;  %v376_v39 = vld [vmem:[%s8816_s1 + $0x20] sm:$0x7] }
  0x17   :  { %5849 = vmatprep.subr.bf16.mxu0 %v106_v22  ;;  %v68_v38 = vpack.c.bf16 %v5285_v37, %v5284_v36  ;;  %v377_v40 = vpack.c.bf16 %v376_v39, %v376_v39  ;;  %v5286_v42 = vld [vmem:[%s8815_s0 + $0xa0] sm:$0xff]  ;;  %v5287_v43 = vld [vmem:[%s8815_s0 + $0xa8] sm:$0xff]  ;;  %v5288_v45 = vld [vmem:[%s8815_s0 + $0xb0] sm:$0xff] }
  0x18   :  { %5870 = vmatmul.mubr.msk.bf16.vlgmr.msra.gmra.mrb[0].mxu1 %vm76_vm2, %v224_v17  ;;  %5850 = vmatpush3.bf16.msra.mxu0 %v106_v22  ;;  %v69_v44 = vpack.c.bf16 %v5287_v43, %v5286_v42  ;;  %v5289_v46 = vld [vmem:[%s8815_s0 + $0xb8] sm:$0xff]  ;;  %v5290_v48 = vld [vmem:[%s8815_s0 + $0xc0] sm:$0xff]  ;;  %v5291_v49 = vld [vmem:[%s8815_s0 + $0xc8] sm:$0xff] }
  0x19   :  { %5873 = vmatprep.mubr.msk.bf16.mxu1 %vm76_vm2, %v225_v21  ;;  %v384_v41 = vand.u32 %v377_v40, %v104_v6  ;;  %v70_v47 = vpack.c.bf16 %v5289_v46, %v5288_v45  ;;  %v5292_v50 = vld [vmem:[%s8815_s0 + $0xd0] sm:$0xff]  ;;  %v227_v51 = vpack.c.bf16 %v5291_v49, %v5290_v48  ;;  %v5293_v52 = vld [vmem:[%s8815_s0 + $0xd8] sm:$0xff]  ;;  %v5294_v54 = vld [vmem:[%s8815_s0 + $0xe0] sm:$0xff] }
  0x1a   :  { %v228_v53 = vpack.c.bf16 %v5293_v52, %v5292_v50  ;;  %v5295_v55 = vld [vmem:[%s8815_s0 + $0xe8] sm:$0xff]  ;;  %v5296_v57 = vld [vmem:[%s8815_s0 + $0xf0] sm:$0xff]  ;;  %v5297_v58 = vld [vmem:[%s8815_s0 + $0xf8] sm:$0xff] }
  0x1b   :  { %5852 = vmatmul.mubr.msk.bf16.vlgmr.msra.gmra.mrb[0].mxu0 %vm76_vm2, %v64_v25  ;;  %5885 = vmatprep.subr.bf16.mxu0 %v384_v41  ;;  %v229_v56 = vpack.c.bf16 %v5295_v55, %v5294_v54  ;;  %v230_v59 = vpack.c.bf16 %v5297_v58, %v5296_v57  ;;  %v7143_v60 = vld [vmem:[%s8816_s1 + $0x40] ss:$0 sm:$0xff]  ;;  %v7150_v2 = vld [vmem:[%s8816_s1 + $0x30] ss:$0 sm:$0xff] }
  0x1c   :  { %5855 = vmatprep.mubr.msk.bf16.mxu0 %vm76_vm2, %v65_v26  ;;  %5886 = vmatpush3.bf16.msra.mxu0 %v384_v41 }
  0x20   :  { %5874 = vmatmul.mubr.msk.bf16.gmra.mrb[4].mxu1 %vm76_vm2, %v226_v29 }
  0x21   :  { %5877 = vmatprep.mubr.msk.bf16.mxu1 %vm76_vm2, %v227_v51 }
  0x23   :  { %5856 = vmatmul.mubr.msk.bf16.gmra.mrb[4].mxu0 %vm76_vm2, %v66_v34 }
  0x24   :  { %5859 = vmatprep.mubr.msk.bf16.mxu0 %vm76_vm2, %v67_v35 }
  0x28   :  { %5878 = vmatmul.mubr.msk.bf16.gmra.mrb[8].mxu1 %vm76_vm2, %v228_v53 }
  0x29   :  { %5881 = vmatprep.mubr.msk.bf16.mxu1 %vm76_vm2, %v229_v56 }
  0x2b   :  { %5860 = vmatmul.mubr.msk.bf16.gmra.mrb[8].mxu0 %vm76_vm2, %v68_v38 }
  0x2c   :  { %5863 = vmatprep.mubr.msk.bf16.mxu0 %vm76_vm2, %v69_v44 }
  0x30   :  { %5882 = vmatmul.mubr.msk.bf16.gmra.mrb[12].mxu1 %vm76_vm2, %v230_v59 }
  0x33   :  { %5864 = vmatmul.mubr.msk.bf16.gmra.mrb[12].mxu0 %vm76_vm2, %v70_v47 }
  0x34   :  { %5887 = vmatprep.mubr.msk.bf16.mxu0 %vm76_vm2, %v223_v7 }
  0x3b   :  { %5888 = vmatmul.mubr.msk.bf16.vlgmr.msra.gmra.mrb[16].mxu0 %vm76_vm2, %v224_v17 }
  0x3c   :  { %5891 = vmatprep.mubr.msk.bf16.mxu0 %vm76_vm2, %v225_v21 }
  0x43   :  { %5892 = vmatmul.mubr.msk.bf16.gmra.mrb[20].mxu0 %vm76_vm2, %v226_v29 }
  0x44   :  { %5895 = vmatprep.mubr.msk.bf16.mxu0 %vm76_vm2, %v227_v51 }
  0x4b   :  { %5896 = vmatmul.mubr.msk.bf16.gmra.mrb[24].mxu0 %vm76_vm2, %v228_v53 }
  0x4c   :  { %5899 = vmatprep.mubr.msk.bf16.mxu0 %vm76_vm2, %v229_v56 }
  0x53   :  { %5900 = vmatmul.mubr.msk.bf16.gmra.mrb[28].mxu0 %vm76_vm2, %v230_v59 }
  0xeb   :  { %v5871_v61 = vpop.f32.mrb[0].mxu1 }
  0xec   :  { %v306_v62 = vadd.f32 %v5871_v61, %v7143_v60  ;;  %v297_v63 = vpop.f32.mrb[1].mxu1 }
  0xed   :  { %v298_v0 = vadd.f32 %v7143_v60, %v297_v63  ;;  %v5872_v1 = vpop.f32.mrb[2].mxu1 }
  0xee   :  { %v309_v3 = vadd.f32 %v5872_v1, %v7143_v60  ;;  %v300_v4 = vpop.f32.mrb[3].mxu1  ;;  %v5853_v5 = vpop.f32.mrb[0].mxu0  ;;  %v362_v8 = vmax.f32 %v306_v62, 0.0 }
  0xef   :  { %v301_v6 = vadd.f32 %v7143_v60, %v300_v4  ;;  %v142_v7 = vpop.f32.mrb[1].mxu0  ;;  %v360_v12 = vmax.f32 %v298_v0, 0.0  ;;  %v7220_v44 = vadd.f32 %v5853_v5, %v7150_v2 }
  0xf0   :  { %v363_v9 = vmax.f32 %v309_v3, 0.0  ;;  %v7155_v10 = vadd.f32 %v7150_v2, %v142_v7  ;;  %v5854_v11 = vpop.f32.mrb[2].mxu0 }
  0xf1   :  { %v361_v13 = vmax.f32 %v301_v6, 0.0  ;;  %v145_v14 = vpop.f32.mrb[3].mxu0  ;;  %v7223_v45 = vadd.f32 %v5854_v11, %v7150_v2  ;;  %v207_v49 = vmax.f32 %v7220_v44, 0.0 }
  0xf2   :  { %v7157_v15 = vpack.c.bf16 %v363_v9, %v362_v8  ;;  %v205_v16 = vmax.f32 %v7155_v10, 0.0  ;;  %v7161_v17 = vadd.f32 %v7150_v2, %v145_v14 }
  0xf3   :  { %v7163_v18 = vpack.c.bf16 %v361_v13, %v360_v12  ;;  %v5875_v19 = vpop.f32.mrb[4].mxu1  ;;  %v208_v50 = vmax.f32 %v7223_v45, 0.0 }
  0xf4   :  { %v322_v20 = vadd.f32 %v5875_v19, %v7143_v60  ;;  %v313_v21 = vpop.f32.mrb[5].mxu1  ;;  %v206_v22 = vmax.f32 %v7161_v17, 0.0  ;;  %v7195_v40 = vsel %vm511_vm3, %v7157_v15, 0 }
  0xf5   :  { %6497 = vmatprep.subr.msk.bf16.mxu1 %vm511_vm3, %v7163_v18  ;;  %6501 = vmatprep.subr.msk.bf16.mxu0 %vm511_vm3, %v7163_v18  ;;  %v7173_v23 = vsel %vm511_vm3, %v7163_v18, 0  ;;  %v314_v24 = vadd.f32 %v7143_v60, %v313_v21  ;;  %v5876_v25 = vpop.f32.mrb[6].mxu1  ;;  %v508_v54 = vpack.c.bf16 %v208_v50, %v207_v49 }
  0xf6   :  { %5904 = vmatpush3.bf16.xpose.msra.mxu1 %v7173_v23  ;;  %5936 = vmatpush3.bf16.xpose.msra.mxu0 %v7173_v23  ;;  %v366_v26 = vmax.f32 %v322_v20, 0.0  ;;  %v325_v27 = vadd.f32 %v5876_v25, %v7143_v60  ;;  %v316_v28 = vpop.f32.mrb[7].mxu1  ;;  %v507_v29 = vpack.c.bf16 %v206_v22, %v205_v16  ;;  %v5857_v30 = vpop.f32.mrb[4].mxu0 }
  0xf7   :  { %6498 = vmatprep.subr.msk.bf16.mxu1 %vm511_vm3, %v7157_v15  ;;  %6502 = vmatprep.subr.msk.bf16.mxu0 %vm511_vm3, %v7157_v15  ;;  %v364_v31 = vmax.f32 %v314_v24, 0.0  ;;  %v317_v32 = vadd.f32 %v7143_v60, %v316_v28  ;;  %v158_v33 = vpop.f32.mrb[5].mxu0  ;;  %v7238_v51 = vadd.f32 %v5857_v30, %v7150_v2 }
  0xf8   :  { %v367_v34 = vmax.f32 %v325_v27, 0.0  ;;  %5911 = vmatprep.mubr.msk.bf16.mxu1 %vm511_vm3, %v507_v29  ;;  %v5858_v35 = vpop.f32.mrb[6].mxu0  ;;  %v7214_v42 = vadd.f32 %v7150_v2, %v158_v33 }
  0xf9   :  { %v365_v36 = vmax.f32 %v317_v32, 0.0  ;;  %v161_v37 = vpop.f32.mrb[7].mxu0  ;;  %v7241_v52 = vadd.f32 %v5858_v35, %v7150_v2  ;;  %v8819_v55 = vmax.f32 %v7238_v51, 0.0 }
  0xfa   :  { %v7189_v38 = vpack.c.bf16 %v367_v34, %v366_v26  ;;  %v7217_v43 = vadd.f32 %v7150_v2, %v161_v37  ;;  %v209_v47 = vmax.f32 %v7214_v42, 0.0  ;;  %v7295_v37 = vld [vmem:[%s8816_s1 + $0x50] ss:$0 sm:$0xff] }
  0xfb   :  { %v7191_v39 = vpack.c.bf16 %v365_v36, %v364_v31  ;;  %v212_v56 = vmax.f32 %v7241_v52, 0.0  ;;  %v5879_v58 = vpop.f32.mrb[8].mxu1 }
  0xfc   :  { %v7227_v46 = vsel %vm511_vm3, %v7189_v38, 0  ;;  %v8820_v48 = vmax.f32 %v7217_v43, 0.0  ;;  %v338_v59 = vadd.f32 %v5879_v58, %v7143_v60  ;;  %v329_v61 = vpop.f32.mrb[9].mxu1 }
  0xfd   :  { %v7205_v41 = vsel %vm511_vm3, %v7191_v39, 0  ;;  %v510_v57 = vpack.c.bf16 %v212_v56, %v8819_v55  ;;  %v330_v62 = vadd.f32 %v7143_v60, %v329_v61  ;;  %v5880_v63 = vpop.f32.mrb[10].mxu1 }
  0xfe   :  { %5906 = vmatpush3.bf16.xpose.msra.mxu1 %v7195_v40  ;;  %5938 = vmatpush3.bf16.xpose.msra.mxu0 %v7195_v40  ;;  %v509_v53 = vpack.c.bf16 %v8820_v48, %v209_v47  ;;  %v370_v0 = vmax.f32 %v338_v59, 0.0  ;;  %v341_v1 = vadd.f32 %v5880_v63, %v7143_v60  ;;  %v332_v2 = vpop.f32.mrb[11].mxu1  ;;  %v7276_v30 = vpop.f32.mrb[8].mxu0 }
  0xff   :  { %6499 = vmatprep.subr.msk.bf16.mxu1 %vm511_vm3, %v7191_v39  ;;  %6503 = vmatprep.subr.msk.bf16.mxu0 %vm511_vm3, %v7191_v39  ;;  %v368_v3 = vmax.f32 %v330_v62, 0.0  ;;  %v333_v4 = vadd.f32 %v7143_v60, %v332_v2  ;;  %v7278_v31 = vpop.f32.mrb[9].mxu0 }
 0x100   :  { %v371_v5 = vmax.f32 %v341_v1, 0.0  ;;  %v7280_v32 = vpop.f32.mrb[10].mxu0 }
 0x101   :  { %v369_v6 = vmax.f32 %v333_v4, 0.0  ;;  %v7282_v33 = vpop.f32.mrb[11].mxu0 }
 0x102   :  { %v7264_v7 = vpack.c.bf16 %v371_v5, %v370_v0 }
 0x103   :  { %v7266_v8 = vpack.c.bf16 %v369_v6, %v368_v3  ;;  %v5883_v9 = vpop.f32.mrb[12].mxu1 }
 0x104   :  { %v354_v11 = vadd.f32 %v5883_v9, %v7143_v60  ;;  %v345_v12 = vpop.f32.mrb[13].mxu1 }
 0x105   :  { %v346_v13 = vadd.f32 %v7143_v60, %v345_v12  ;;  %v5884_v14 = vpop.f32.mrb[14].mxu1 }
 0x106   :  { %5908 = vmatpush3.bf16.xpose.msra.mxu1 %v7205_v41  ;;  %5940 = vmatpush3.bf16.xpose.msra.mxu0 %v7205_v41  ;;  %v374_v19 = vmax.f32 %v354_v11, 0.0  ;;  %v357_v20 = vadd.f32 %v5884_v14, %v7143_v60  ;;  %v348_v21 = vpop.f32.mrb[15].mxu1  ;;  %v7284_v34 = vpop.f32.mrb[12].mxu0 }
 0x107   :  { %6500 = vmatprep.subr.msk.bf16.mxu1 %vm511_vm3, %v7189_v38  ;;  %6504 = vmatprep.subr.msk.bf16.mxu0 %vm511_vm3, %v7189_v38  ;;  %v372_v24 = vmax.f32 %v346_v13, 0.0  ;;  %v349_v25 = vadd.f32 %v7143_v60, %v348_v21  ;;  %v7286_v35 = vpop.f32.mrb[13].mxu0 }
 0x108   :  { %v375_v26 = vmax.f32 %v357_v20, 0.0  ;;  %v7288_v36 = vpop.f32.mrb[14].mxu0 }
 0x109   :  { %v373_v27 = vmax.f32 %v349_v25, 0.0  ;;  %v7290_v60 = vpop.f32.mrb[15].mxu0 }
 0x10a   :  { %v7272_v28 = vpack.c.bf16 %v375_v26, %v374_v19 }
 0x10b   :  { %v7274_v29 = vpack.c.bf16 %v373_v27, %v372_v24 }
 0x10e   :  { %5910 = vmatpush3.bf16.xpose.msra.mxu1 %v7227_v46  ;;  %5942 = vmatpush3.bf16.xpose.msra.mxu0 %v7227_v46 }
 0x10f   :  { %6505 = vmatprep.subr.msk.bf16.mxu0 %vm511_vm3, %v7163_v18 }
 0x115   :  { %5912 = vmatmul.mubr.msk.bf16.vlgmr.msra.gmra.mrb[16].mxu1 %vm511_vm3, %v508_v54 }
 0x116   :  { %5915 = vmatprep.mubr.msk.bf16.mxu1 %vm511_vm3, %v509_v53  ;;  %v5889_v53 = vpop.f32.mrb[16].mxu0 }
 0x117   :  { %v429_v54 = vadd.f32 %v5889_v53, %v7295_v37 }
 0x119   :  { %v485_v61 = vmax.f32 %v429_v54, 0.0 }
 0x11d   :  { %5916 = vmatmul.mubr.msk.bf16.gmra.mrb[20].mxu1 %vm511_vm3, %v510_v57  ;;  %v420_v57 = vpop.f32.mrb[17].mxu0 }
 0x11e   :  { %v421_v58 = vadd.f32 %v7295_v37, %v420_v57  ;;  %v5890_v59 = vpop.f32.mrb[18].mxu0 }
 0x11f   :  { %v432_v62 = vadd.f32 %v5890_v59, %v7295_v37  ;;  %v423_v63 = vpop.f32.mrb[19].mxu0 }
 0x120   :  { %v483_v0 = vmax.f32 %v421_v58, 0.0  ;;  %v424_v1 = vadd.f32 %v7295_v37, %v423_v63  ;;  %v5893_v2 = vpop.f32.mrb[20].mxu0 }
 0x121   :  { %v486_v3 = vmax.f32 %v432_v62, 0.0  ;;  %v445_v4 = vadd.f32 %v5893_v2, %v7295_v37  ;;  %v436_v5 = vpop.f32.mrb[21].mxu0 }
 0x122   :  { %v484_v6 = vmax.f32 %v424_v1, 0.0  ;;  %v437_v9 = vadd.f32 %v7295_v37, %v436_v5  ;;  %v5894_v11 = vpop.f32.mrb[22].mxu0 }
 0x123   :  { %v7303_v12 = vpack.c.bf16 %v486_v3, %v485_v61  ;;  %v489_v13 = vmax.f32 %v445_v4, 0.0  ;;  %v448_v14 = vadd.f32 %v5894_v11, %v7295_v37  ;;  %v439_v19 = vpop.f32.mrb[23].mxu0 }
 0x124   :  { %v7306_v20 = vpack.c.bf16 %v484_v6, %v483_v0  ;;  %v487_v21 = vmax.f32 %v437_v9, 0.0  ;;  %v440_v24 = vadd.f32 %v7295_v37, %v439_v19 }
 0x125   :  { %v490_v25 = vmax.f32 %v448_v14, 0.0 }
 0x126   :  { %5919 = vmatprep.subr.bf16.mxu1 %v7306_v20  ;;  %v488_v26 = vmax.f32 %v440_v24, 0.0 }
 0x127   :  { %v7310_v27 = vpack.c.bf16 %v490_v25, %v489_v13  ;;  %5920 = vmatpush3.bf16.msra.mxu1 %v7306_v20 }
 0x128   :  { %v7313_v53 = vpack.c.bf16 %v488_v26, %v487_v21  ;;  %5921 = vmatprep.subr.bf16.mxu1 %v7303_v12 }
 0x12b   :  { %5922 = vmatpush3.bf16.msra.mxu1 %v7303_v12 }
 0x12c   :  { %5923 = vmatprep.subr.bf16.mxu1 %v7313_v53 }
 0x12f   :  { %5924 = vmatpush3.bf16.msra.mxu1 %v7313_v53 }
 0x130   :  { %5925 = vmatprep.subr.bf16.mxu1 %v7310_v27 }
 0x133   :  { %5926 = vmatpush3.bf16.msra.mxu1 %v7310_v27 }
 0x134   :  { %5951 = vmatprep.subr.bf16.mxu1 %v7306_v20 }
 0x1e8   :  { %v5913_v54 = vpop.f32.mrb[16].mxu1 }
 0x1e9   :  { %v603_v57 = vmul.f32 0.14433756, %v5913_v54  ;;  %v570_v58 = vpop.f32.mrb[17].mxu1 }
 0x1ea   :  { %v601_v59 = vmul.f32 0.14433756, %v570_v58  ;;  %v5914_v61 = vpop.f32.mrb[18].mxu1 }
 0x1eb   :  { %v604_v62 = vmul.f32 0.14433756, %v5914_v61  ;;  %v573_v63 = vpop.f32.mrb[19].mxu1  ;;  %v616_v0 = vsel %vm609_vm4, %v603_v57, -inf }
 0x1ec   :  { %v602_v1 = vmul.f32 0.14433756, %v573_v63  ;;  %617 = vmax.xlane.f32.xlu1 %v616_v0  ;;  %v610_v2 = vsel %vm609_vm4, %v601_v59, -inf }
 0x1ed   :  { %611 = vmax.xlane.f32.xlu0 %v610_v2  ;;  %v619_v3 = vsel %vm609_vm4, %v604_v62, -inf }
 0x1ee   :  { %v613_v5 = vsel %vm609_vm4, %v602_v1, -inf }
 0x1f0   :  { %620 = vmax.xlane.f32.xlu1 %v619_v3  ;;  %v5917_v4 = vpop.f32.mrb[20].mxu1 }
 0x1f1   :  { %614 = vmax.xlane.f32.xlu0 %v613_v5  ;;  %v586_v6 = vpop.f32.mrb[21].mxu1  ;;  %v607_v9 = vmul.f32 0.14433756, %v5917_v4 }
 0x1f2   :  { %v605_v11 = vmul.f32 0.14433756, %v586_v6  ;;  %v5918_v13 = vpop.f32.mrb[22].mxu1 }
 0x1f3   :  { %v589_v14 = vpop.f32.mrb[23].mxu1  ;;  %v608_v19 = vmul.f32 0.14433756, %v5918_v13  ;;  %v628_v26 = vsel %vm609_vm4, %v607_v9, -inf }
 0x1f4   :  { %v606_v21 = vmul.f32 0.14433756, %v589_v14  ;;  %v622_v24 = vsel %vm609_vm4, %v605_v11, -inf }
 0x1f5   :  { %623 = vmax.xlane.f32.xlu0 %v622_v24  ;;  %v631_v54 = vsel %vm609_vm4, %v608_v19, -inf }
 0x1f6   :  { %v625_v25 = vsel %vm609_vm4, %v606_v21, -inf }
 0x1f7   :  { %626 = vmax.xlane.f32.xlu1 %v625_v25 }
 0x1f9   :  { %629 = vmax.xlane.f32.xlu0 %v628_v26 }
 0x1fb   :  { %632 = vmax.xlane.f32.xlu1 %v631_v54 }
 0x279   :  { %v618_v58 = vpop.xlane.xlu1 %617 }
 0x27a   :  { %v636_v61 = vsub.f32 %v603_v57, %v618_v58  ;;  %v612_v63 = vpop.xlane.xlu0 %611 }
 0x27b   :  { %v634_v0 = vsub.f32 %v601_v59, %v612_v63 }
 0x27c   :  { %v646_v2 = vmul.f32 1.442695, %v636_v61 }
 0x27d   :  { %v642_v3 = vmul.f32 1.442695, %v634_v0  ;;  %v621_v4 = vpop.xlane.xlu1 %620 }
 0x27e   :  { %v637_v5 = vsub.f32 %v604_v62, %v621_v4  ;;  %v615_v6 = vpop.xlane.xlu0 %614 }
 0x27f   :  { %6544 = vpow2.f32 %v642_v3  ;;  %v635_v13 = vsub.f32 %v602_v1, %v615_v6 }
 0x280   :  { %v648_v14 = vmul.f32 1.442695, %v637_v5  ;;  %6546 = vpow2.f32 %v646_v2 }
 0x281   :  { %v644_v24 = vmul.f32 1.442695, %v635_v13 }
 0x282   :  { %6548 = vpow2.f32 %v648_v14  ;;  %v624_v25 = vpop.xlane.xlu0 %623 }
 0x283   :  { %6550 = vpow2.f32 %v644_v24  ;;  %v638_v55 = vsub.f32 %v605_v11, %v624_v25 }
 0x284   :  { %v627_v26 = vpop.xlane.xlu1 %626 }
 0x285   :  { %v650_v54 = vmul.f32 1.442695, %v638_v55  ;;  %v639_v48 = vsub.f32 %v606_v21, %v627_v26 }
 0x286   :  { %v630_v57 = vpop.xlane.xlu0 %629 }
 0x287   :  { %6552 = vpow2.f32 %v650_v54  ;;  %v652_v59 = vmul.f32 1.442695, %v639_v48  ;;  %v640_v58 = vsub.f32 %v607_v9, %v630_v57 }
 0x288   :  { %v633_v61 = vpop.xlane.xlu1 %632 }
 0x289   :  { %v6545_v63 = vpop.eup %6544  ;;  %6554 = vpow2.f32 %v652_v59  ;;  %v654_v62 = vmul.f32 1.442695, %v640_v58  ;;  %v641_v0 = vsub.f32 %v608_v19, %v633_v61  ;;  %v5897_v58 = vpop.f32.mrb[24].mxu0 }
 0x28a   :  { %v658_v1 = vsel %vm609_vm4, %v6545_v63, 0.0  ;;  %v6547_v2 = vpop.eup %6546  ;;  %v461_v61 = vadd.f32 %v5897_v58, %v7295_v37 }
 0x28b   :  { %6556 = vpow2.f32 %v654_v62  ;;  %v656_v3 = vmul.f32 1.442695, %v641_v0  ;;  %659 = vadd.xlane.f32.xlu0 %v658_v1  ;;  %v664_v55 = vsel %vm609_vm4, %v6547_v2, 0.0 }
 0x28c   :  { %v6549_v4 = vpop.eup %6548  ;;  %v493_v1 = vmax.f32 %v461_v61, 0.0 }
 0x28d   :  { %v6551_v11 = vpop.eup %6550  ;;  %6558 = vpow2.f32 %v656_v3  ;;  %v683_v9 = vpack.c.bf16 %v6549_v4, %v6547_v2  ;;  %v667_v13 = vsel %vm609_vm4, %v6549_v4, 0.0 }
 0x28e   :  { %v661_v21 = vsel %vm609_vm4, %v6551_v11, 0.0  ;;  %v682_v48 = vpack.c.bf16 %v6551_v11, %v6545_v63  ;;  %v452_v63 = vpop.f32.mrb[25].mxu0 }
 0x28f   :  { %665 = vadd.xlane.f32.xlu0 %v664_v55  ;;  %662 = vadd.xlane.f32.xlu1 %v661_v21  ;;  %v453_v62 = vadd.f32 %v7295_v37, %v452_v63  ;;  %v5898_v0 = vpop.f32.mrb[26].mxu0 }
 0x290   :  { %5927 = vmatprep.mubr.msk.bf16.mxu1 %vm609_vm4, %v682_v48  ;;  %v464_v2 = vadd.f32 %v5898_v0, %v7295_v37  ;;  %v455_v3 = vpop.f32.mrb[27].mxu0 }
 0x291   :  { %v6553_v19 = vpop.eup %6552  ;;  %5928 = vmatmul.mubr.msk.bf16.vlgmr.msra.gmra.mrb[24].mxu1 %vm609_vm4, %v683_v9  ;;  %v491_v4 = vmax.f32 %v453_v62, 0.0  ;;  %v456_v11 = vadd.f32 %v7295_v37, %v455_v3  ;;  %v5901_v55 = vpop.f32.mrb[28].mxu0 }
 0x292   :  { %5952 = vmatpush3.bf16.msra.mxu1 %v7306_v20  ;;  %v670_v5 = vsel %vm609_vm4, %v6553_v19, 0.0  ;;  %v494_v21 = vmax.f32 %v464_v2, 0.0  ;;  %v477_v48 = vadd.f32 %v5901_v55, %v7295_v37  ;;  %v468_v9 = vpop.f32.mrb[29].mxu0 }
 0x293   :  { %v6555_v6 = vpop.eup %6554  ;;  %5953 = vmatprep.subr.bf16.mxu1 %v7303_v12  ;;  %671 = vadd.xlane.f32.xlu0 %v670_v5  ;;  %v469_v5 = vadd.f32 %v7295_v37, %v468_v9 }
 0x294   :  { %668 = vadd.xlane.f32.xlu1 %v667_v13  ;;  %v684_v14 = vpack.c.bf16 %v6555_v6, %v6553_v19  ;;  %v673_v54 = vsel %vm609_vm4, %v6555_v6, 0.0  ;;  %v492_v19 = vmax.f32 %v456_v11, 0.0  ;;  %v5902_v6 = vpop.f32.mrb[30].mxu0  ;;  %v7356_v13 = vpack.c.bf16 %v494_v21, %v493_v1 }
 0x295   :  { %v6557_v24 = vpop.eup %6556 }
 0x296   :  { %5954 = vmatpush3.bf16.msra.mxu1 %v7303_v12  ;;  %5931 = vmatprep.mubr.msk.bf16.mxu1 %vm609_vm4, %v684_v14  ;;  %v676_v25 = vsel %vm609_vm4, %v6557_v24, 0.0  ;;  %v497_v14 = vmax.f32 %v477_v48, 0.0 }
 0x297   :  { %v6559_v26 = vpop.eup %6558  ;;  %5955 = vmatprep.subr.bf16.mxu1 %v7313_v53  ;;  %677 = vadd.xlane.f32.xlu0 %v676_v25  ;;  %v471_v25 = vpop.f32.mrb[31].mxu0 }
 0x298   :  { %674 = vadd.xlane.f32.xlu1 %v673_v54  ;;  %v685_v57 = vpack.c.bf16 %v6559_v26, %v6557_v24  ;;  %v679_v59 = vsel %vm609_vm4, %v6559_v26, 0.0  ;;  %v480_v24 = vadd.f32 %v5902_v6, %v7295_v37  ;;  %v7359_v26 = vpack.c.bf16 %v492_v19, %v491_v4 }
 0x299   :  { %v495_v54 = vmax.f32 %v469_v5, 0.0 }
 0x29a   :  { %5956 = vmatpush3.bf16.msra.mxu1 %v7313_v53 }
 0x29b   :  { %5932 = vmatmul.mubr.msk.bf16.gmra.mrb[28].mxu1 %vm609_vm4, %v685_v57  ;;  %5957 = vmatprep.subr.bf16.mxu1 %v7310_v27  ;;  %v472_v57 = vadd.f32 %v7295_v37, %v471_v25 }
 0x29c   :  { %680 = vadd.xlane.f32.xlu1 %v679_v59  ;;  %v498_v59 = vmax.f32 %v480_v24, 0.0 }
 0x29d   :  { %v496_v58 = vmax.f32 %v472_v57, 0.0 }
 0x29e   :  { %5958 = vmatpush3.bf16.msra.mxu1 %v7310_v27  ;;  %v7362_v61 = vpack.c.bf16 %v498_v59, %v497_v14 }
 0x29f   :  { %5983 = vmatprep.subr.bf16.mxu1 %v7306_v20  ;;  %v7364_v63 = vpack.c.bf16 %v496_v58, %v495_v54 }
 0x318   :  { %v660_v62 = vpop.xlane.xlu0 %659 }
 0x319   :  { %6560 = vrcp.f32 %v660_v62 }
 0x31c   :  { %v663_v0 = vpop.xlane.xlu1 %662  ;;  %v666_v2 = vpop.xlane.xlu0 %665 }
 0x31d   :  { %6562 = vrcp.f32 %v666_v2 }
 0x320   :  { %v672_v3 = vpop.xlane.xlu0 %671 }
 0x321   :  { %v669_v1 = vpop.xlane.xlu1 %668 }
 0x322   :  { %6564 = vrcp.f32 %v669_v1 }
 0x323   :  { %6566 = vrcp.f32 %v663_v0  ;;  %v6561_v21 = vpop.eup %6560 }
 0x324   :  { %v678_v11 = vpop.xlane.xlu0 %677  ;;  %6568 = vrcp.f32 %v672_v3 }
 0x325   :  { %v675_v4 = vpop.xlane.xlu1 %674  ;;  %6570 = vrcp.f32 %v678_v11 }
 0x327   :  { %v6563_v48 = vpop.eup %6562 }
 0x329   :  { %v681_v55 = vpop.xlane.xlu1 %680 }
 0x32a   :  { %6572 = vrcp.f32 %v681_v55 }
 0x32b   :  { %6574 = vrcp.f32 %v675_v4 }
 0x32c   :  { %v6565_v19 = vpop.eup %6564 }
 0x32d   :  { %v6567_v14 = vpop.eup %6566 }
 0x364   :  { %v5929_v37 = vpop.f32.mrb[24].mxu1 }
 0x365   :  { %v732_v9 = vpop.f32.mrb[25].mxu1  ;;  %v773_v24 = vmul.f32 %v6563_v48, %v5929_v37  ;;  %v8832_v48 = vmax.f32 %v7217_v43, 0.0 }
 0x366   :  { %v771_v5 = vmul.f32 %v6561_v21, %v732_v9  ;;  %v5930_v6 = vpop.f32.mrb[26].mxu1 }
 0x367   :  { %v774_v25 = vmul.f32 %v6565_v19, %v5930_v6  ;;  %v735_v54 = vpop.f32.mrb[27].mxu1  ;;  %v7380_v0 = vadd.f32 %v773_v24, %v207_v49  ;;  %v8833_v19 = vmax.f32 %v7238_v51, 0.0 }
 0x368   :  { %v772_v57 = vmul.f32 %v6567_v14, %v735_v54  ;;  %v7372_v58 = vadd.f32 %v771_v5, %v205_v16 }
 0x369   :  { %v7368_v59 = vadd.f32 %v774_v25, %v208_v50  ;;  %v6569_v50 = vpop.eup %6568 }
 0x36a   :  { %v7376_v62 = vadd.f32 %v772_v57, %v206_v22  ;;  %v6571_v10 = vpop.eup %6570 }
 0x36b   :  { %v788_v45 = vpack.c.bf16 %v7368_v59, %v7380_v0  ;;  %v6573_v17 = vpop.eup %6572 }
 0x36c   :  { %v787_v2 = vpack.c.bf16 %v7376_v62, %v7372_v58  ;;  %v6575_v44 = vpop.eup %6574 }
 0x36e   :  { %v5933_v1 = vpop.f32.mrb[28].mxu1  ;;  %5943 = vmatprep.mubr.msk.bf16.mxu0 %vm511_vm3, %v787_v2 }
 0x36f   :  { %v748_v16 = vpop.f32.mrb[29].mxu1  ;;  %5944 = vmatmul.mubr.msk.bf16.vlgmr.msra.gmra.mrb[32].mxu0 %vm511_vm3, %v788_v45  ;;  %v777_v49 = vmul.f32 %v6571_v10, %v5933_v1 }
 0x370   :  { %v775_v22 = vmul.f32 %v6569_v50, %v748_v16  ;;  %v5934_v3 = vpop.f32.mrb[30].mxu1  ;;  %5968 = vmatpush3.bf16.xpose.msra.mxu0 %v7173_v23 }
 0x371   :  { %v778_v4 = vmul.f32 %v6573_v17, %v5934_v3  ;;  %v751_v11 = vpop.f32.mrb[31].mxu1  ;;  %6506 = vmatprep.subr.msk.bf16.mxu0 %vm511_vm3, %v7157_v15  ;;  %v7405_v5 = vadd.f32 %v777_v49, %v8833_v19 }
 0x372   :  { %v776_v55 = vmul.f32 %v6575_v44, %v751_v11  ;;  %v7397_v37 = vadd.f32 %v775_v22, %v209_v47 }
 0x373   :  { %v7393_v21 = vadd.f32 %v778_v4, %v212_v56 }
 0x374   :  { %v7401_v9 = vadd.f32 %v776_v55, %v8832_v48 }
 0x375   :  { %v790_v52 = vpack.c.bf16 %v7393_v21, %v7405_v5 }
 0x376   :  { %v789_v6 = vpack.c.bf16 %v7401_v9, %v7397_v37 }
 0x378   :  { %5947 = vmatprep.mubr.msk.bf16.mxu0 %vm511_vm3, %v789_v6  ;;  %5970 = vmatpush3.bf16.xpose.msra.mxu0 %v7195_v40 }
 0x379   :  { %5948 = vmatmul.mubr.msk.bf16.gmra.mrb[36].mxu0 %vm511_vm3, %v790_v52  ;;  %6507 = vmatprep.subr.msk.bf16.mxu0 %vm511_vm3, %v7191_v39 }
 0x380   :  { %5972 = vmatpush3.bf16.xpose.msra.mxu0 %v7205_v41 }
 0x381   :  { %6508 = vmatprep.subr.msk.bf16.mxu0 %vm511_vm3, %v7189_v38 }
 0x388   :  { %5974 = vmatpush3.bf16.xpose.msra.mxu0 %v7227_v46 }
 0x389   :  { %6015 = vmatprep.subr.bf16.mxu0 %v7306_v20 }
 0x442   :  { %v5945_v42 = vpop.f32.mrb[32].mxu0 }
 0x443   :  { %v837_v43 = vpop.f32.mrb[33].mxu0  ;;  %v870_v14 = vmul.f32 0.14433756, %v5945_v42 }
 0x444   :  { %v868_v47 = vmul.f32 0.14433756, %v837_v43  ;;  %v5946_v51 = vpop.f32.mrb[34].mxu0 }
 0x445   :  { %v840_v56 = vpop.f32.mrb[35].mxu0  ;;  %v871_v54 = vmul.f32 0.14433756, %v5946_v51  ;;  %v882_v2 = vsel %vm609_vm4, %v870_v14, -inf }
 0x446   :  { %v869_v24 = vmul.f32 0.14433756, %v840_v56  ;;  %v876_v25 = vsel %vm609_vm4, %v868_v47, -inf }
 0x447   :  { %877 = vmax.xlane.f32.xlu0 %v876_v25  ;;  %v885_v50 = vsel %vm609_vm4, %v871_v54, -inf }
 0x448   :  { %v879_v57 = vsel %vm609_vm4, %v869_v24, -inf }
 0x449   :  { %880 = vmax.xlane.f32.xlu1 %v879_v57 }
 0x44b   :  { %883 = vmax.xlane.f32.xlu0 %v882_v2 }
 0x44c   :  { %v5949_v45 = vpop.f32.mrb[36].mxu0 }
 0x44d   :  { %v853_v1 = vpop.f32.mrb[37].mxu0  ;;  %886 = vmax.xlane.f32.xlu1 %v885_v50  ;;  %v874_v22 = vmul.f32 0.14433756, %v5949_v45 }
 0x44e   :  { %v872_v10 = vmul.f32 0.14433756, %v853_v1  ;;  %v5950_v16 = vpop.f32.mrb[38].mxu0 }
 0x44f   :  { %v856_v17 = vpop.f32.mrb[39].mxu0  ;;  %v875_v49 = vmul.f32 0.14433756, %v5950_v16  ;;  %v894_v11 = vsel %vm609_vm4, %v874_v22, -inf }
 0x450   :  { %v873_v3 = vmul.f32 0.14433756, %v856_v17  ;;  %v888_v44 = vsel %vm609_vm4, %v872_v10, -inf }
 0x451   :  { %889 = vmax.xlane.f32.xlu0 %v888_v44  ;;  %v897_v55 = vsel %vm609_vm4, %v875_v49, -inf }
 0x452   :  { %v891_v4 = vsel %vm609_vm4, %v873_v3, -inf }
 0x453   :  { %892 = vmax.xlane.f32.xlu1 %v891_v4 }
 0x455   :  { %895 = vmax.xlane.f32.xlu0 %v894_v11 }
 0x457   :  { %898 = vmax.xlane.f32.xlu1 %v897_v55 }
 0x4d4   :  { %v878_v48 = vpop.xlane.xlu0 %877 }
 0x4d5   :  { %v900_v19 = vsub.f32 %v868_v47, %v878_v48 }
 0x4d6   :  { %v881_v6 = vpop.xlane.xlu1 %880 }
 0x4d7   :  { %v908_v52 = vmul.f32 1.442695, %v900_v19  ;;  %v901_v42 = vsub.f32 %v869_v24, %v881_v6 }
 0x4d8   :  { %v884_v43 = vpop.xlane.xlu0 %883 }
 0x4d9   :  { %6576 = vpow2.f32 %v908_v52  ;;  %v910_v51 = vmul.f32 1.442695, %v901_v42  ;;  %v902_v56 = vsub.f32 %v870_v14, %v884_v43 }
 0x4da   :  { %v887_v25 = vpop.xlane.xlu1 %886 }
 0x4db   :  { %6578 = vpow2.f32 %v910_v51  ;;  %v912_v57 = vmul.f32 1.442695, %v902_v56  ;;  %v903_v2 = vsub.f32 %v871_v54, %v887_v25 }
 0x4dd   :  { %6580 = vpow2.f32 %v912_v57  ;;  %v914_v45 = vmul.f32 1.442695, %v903_v2 }
 0x4de   :  { %v890_v50 = vpop.xlane.xlu0 %889 }
 0x4df   :  { %6582 = vpow2.f32 %v914_v45  ;;  %v904_v1 = vsub.f32 %v872_v10, %v890_v50 }
 0x4e0   :  { %v893_v16 = vpop.xlane.xlu1 %892 }
 0x4e1   :  { %v916_v17 = vmul.f32 1.442695, %v904_v1  ;;  %v905_v44 = vsub.f32 %v873_v3, %v893_v16 }
 0x4e2   :  { %v896_v47 = vpop.xlane.xlu0 %895 }
 0x4e3   :  { %v6577_v4 = vpop.eup %6576  ;;  %6584 = vpow2.f32 %v916_v17  ;;  %v918_v24 = vmul.f32 1.442695, %v905_v44  ;;  %v906_v11 = vsub.f32 %v874_v22, %v896_v47 }
 0x4e4   :  { %v899_v55 = vpop.xlane.xlu1 %898  ;;  %v924_v14 = vsel %vm609_vm4, %v6577_v4, 0.0 }
 0x4e5   :  { %v6579_v48 = vpop.eup %6578  ;;  %6586 = vpow2.f32 %v918_v24  ;;  %v920_v19 = vmul.f32 1.442695, %v906_v11  ;;  %v907_v54 = vsub.f32 %v875_v49, %v899_v55  ;;  %925 = vadd.xlane.f32.xlu0 %v924_v14 }
 0x4e6   :  { %v927_v6 = vsel %vm609_vm4, %v6579_v48, 0.0  ;;  %v948_v52 = vpack.c.bf16 %v6579_v48, %v6577_v4 }
 0x4e7   :  { %v6581_v10 = vpop.eup %6580  ;;  %6588 = vpow2.f32 %v920_v19  ;;  %v922_v42 = vmul.f32 1.442695, %v907_v54  ;;  %928 = vadd.xlane.f32.xlu1 %v927_v6 }
 0x4e8   :  { %5959 = vmatprep.mubr.msk.bf16.mxu1 %vm609_vm4, %v948_v52  ;;  %v930_v3 = vsel %vm609_vm4, %v6581_v10, 0.0 }
 0x4e9   :  { %v6583_v22 = vpop.eup %6582  ;;  %6590 = vpow2.f32 %v922_v42  ;;  %931 = vadd.xlane.f32.xlu0 %v930_v3 }
 0x4ea   :  { %v949_v43 = vpack.c.bf16 %v6583_v22, %v6581_v10  ;;  %v933_v51 = vsel %vm609_vm4, %v6583_v22, 0.0 }
 0x4eb   :  { %934 = vadd.xlane.f32.xlu1 %v933_v51 }
 0x4ec   :  { %5960 = vmatmul.mubr.msk.bf16.vlgmr.msra.gmra.mrb[32].mxu1 %vm609_vm4, %v949_v43 }
 0x4ed   :  { %v6585_v49 = vpop.eup %6584  ;;  %5984 = vmatpush3.bf16.msra.mxu1 %v7306_v20 }
 0x4ee   :  { %5985 = vmatprep.subr.bf16.mxu1 %v7303_v12  ;;  %v936_v56 = vsel %vm609_vm4, %v6585_v49, 0.0 }
 0x4ef   :  { %v6587_v25 = vpop.eup %6586  ;;  %937 = vadd.xlane.f32.xlu0 %v936_v56 }
 0x4f0   :  { %v939_v57 = vsel %vm609_vm4, %v6587_v25, 0.0  ;;  %v950_v2 = vpack.c.bf16 %v6587_v25, %v6585_v49 }
 0x4f1   :  { %v6589_v45 = vpop.eup %6588  ;;  %5986 = vmatpush3.bf16.msra.mxu1 %v7303_v12  ;;  %940 = vadd.xlane.f32.xlu1 %v939_v57 }
 0x4f2   :  { %5963 = vmatprep.mubr.msk.bf16.mxu1 %vm609_vm4, %v950_v2  ;;  %5987 = vmatprep.subr.bf16.mxu1 %v7313_v53  ;;  %v942_v50 = vsel %vm609_vm4, %v6589_v45, 0.0 }
 0x4f3   :  { %v6591_v1 = vpop.eup %6590  ;;  %943 = vadd.xlane.f32.xlu0 %v942_v50 }
 0x4f4   :  { %v945_v16 = vsel %vm609_vm4, %v6591_v1, 0.0  ;;  %v951_v17 = vpack.c.bf16 %v6591_v1, %v6589_v45 }
 0x4f5   :  { %5988 = vmatpush3.bf16.msra.mxu1 %v7313_v53  ;;  %946 = vadd.xlane.f32.xlu1 %v945_v16 }
 0x4f6   :  { %5964 = vmatmul.mubr.msk.bf16.gmra.mrb[36].mxu1 %vm609_vm4, %v951_v17  ;;  %5989 = vmatprep.subr.bf16.mxu1 %v7310_v27 }
 0x4f9   :  { %5990 = vmatpush3.bf16.msra.mxu1 %v7310_v27 }
 0x4fa   :  { %6509 = vmatprep.subr.msk.bf16.mxu1 %vm511_vm3, %v7163_v18 }
 0x572   :  { %v926_v44 = vpop.xlane.xlu0 %925 }
 0x573   :  { %6592 = vrcp.f32 %v926_v44 }
 0x574   :  { %v929_v47 = vpop.xlane.xlu1 %928 }
 0x576   :  { %v932_v4 = vpop.xlane.xlu0 %931 }
 0x577   :  { %6594 = vrcp.f32 %v932_v4 }
 0x578   :  { %v935_v24 = vpop.xlane.xlu1 %934 }
 0x579   :  { %6596 = vrcp.f32 %v935_v24 }
 0x57a   :  { %6598 = vrcp.f32 %v929_v47 }
 0x57c   :  { %v938_v11 = vpop.xlane.xlu0 %937 }
 0x57d   :  { %v6593_v19 = vpop.eup %6592  ;;  %6600 = vrcp.f32 %v938_v11 }
 0x57e   :  { %v941_v55 = vpop.xlane.xlu1 %940 }
 0x580   :  { %v944_v14 = vpop.xlane.xlu0 %943 }
 0x581   :  { %v6595_v6 = vpop.eup %6594  ;;  %6602 = vrcp.f32 %v944_v14 }
 0x582   :  { %v947_v48 = vpop.xlane.xlu1 %946 }
 0x583   :  { %v6597_v10 = vpop.eup %6596  ;;  %6604 = vrcp.f32 %v947_v48 }
 0x584   :  { %v6599_v22 = vpop.eup %6598  ;;  %6606 = vrcp.f32 %v941_v55 }
 0x587   :  { %v6601_v16 = vpop.eup %6600 }
 0x5bf   :  { %v5961_v54 = vpop.f32.mrb[32].mxu1 }
 0x5c0   :  { %v998_v52 = vpop.f32.mrb[33].mxu1  ;;  %v1039_v43 = vmul.f32 %v6595_v6, %v5961_v54 }
 0x5c1   :  { %v1037_v42 = vmul.f32 %v6593_v19, %v998_v52  ;;  %v5962_v3 = vpop.f32.mrb[34].mxu1 }
 0x5c2   :  { %v1040_v51 = vmul.f32 %v6597_v10, %v5962_v3  ;;  %v1001_v49 = vpop.f32.mrb[35].mxu1  ;;  %v7460_v45 = vadd.f32 %v1039_v43, %v7380_v0 }
 0x5c3   :  { %v1038_v56 = vmul.f32 %v6599_v22, %v1001_v49  ;;  %v7454_v57 = vadd.f32 %v1037_v42, %v7372_v58 }
 0x5c4   :  { %v7451_v25 = vadd.f32 %v1040_v51, %v7368_v59  ;;  %v6603_v59 = vpop.eup %6602 }
 0x5c5   :  { %v7457_v2 = vadd.f32 %v1038_v56, %v7376_v62  ;;  %v6605_v58 = vpop.eup %6604 }
 0x5c6   :  { %v1054_v1 = vpack.c.bf16 %v7451_v25, %v7460_v45  ;;  %v6607_v0 = vpop.eup %6606 }
 0x5c7   :  { %v1053_v50 = vpack.c.bf16 %v7457_v2, %v7454_v57 }
 0x5c9   :  { %v5965_v17 = vpop.f32.mrb[36].mxu1  ;;  %5975 = vmatprep.mubr.msk.bf16.mxu0 %vm511_vm3, %v1053_v50 }
 0x5ca   :  { %v1014_v44 = vpop.f32.mrb[37].mxu1  ;;  %5976 = vmatmul.mubr.msk.bf16.vlgmr.msra.gmra.mrb[40].mxu0 %vm511_vm3, %v1054_v1  ;;  %v1043_v4 = vmul.f32 %v6603_v59, %v5965_v17 }
 0x5cb   :  { %v1041_v62 = vmul.f32 %v6601_v16, %v1014_v44  ;;  %v5966_v47 = vpop.f32.mrb[38].mxu1  ;;  %6016 = vmatpush3.bf16.msra.mxu0 %v7306_v20 }
 0x5cc   :  { %v1044_v24 = vmul.f32 %v6605_v58, %v5966_v47  ;;  %v1017_v11 = vpop.f32.mrb[39].mxu1  ;;  %6017 = vmatprep.subr.bf16.mxu0 %v7303_v12  ;;  %v7481_v54 = vadd.f32 %v1043_v4, %v7405_v5 }
 0x5cd   :  { %v1042_v55 = vmul.f32 %v6607_v0, %v1017_v11  ;;  %v7474_v48 = vadd.f32 %v1041_v62, %v7397_v37 }
 0x5ce   :  { %v7471_v14 = vadd.f32 %v1044_v24, %v7393_v21 }
 0x5cf   :  { %v7477_v19 = vadd.f32 %v1042_v55, %v7401_v9  ;;  %6018 = vmatpush3.bf16.msra.mxu0 %v7303_v12 }
 0x5d0   :  { %6019 = vmatprep.subr.bf16.mxu0 %v7313_v53  ;;  %v1056_v21 = vpack.c.bf16 %v7471_v14, %v7481_v54 }
 0x5d1   :  { %v1055_v6 = vpack.c.bf16 %v7477_v19, %v7474_v48 }
 0x5d3   :  { %5979 = vmatprep.mubr.msk.bf16.mxu0 %vm511_vm3, %v1055_v6  ;;  %6020 = vmatpush3.bf16.msra.mxu0 %v7313_v53 }
 0x5d4   :  { %5980 = vmatmul.mubr.msk.bf16.gmra.mrb[44].mxu0 %vm511_vm3, %v1056_v21  ;;  %6021 = vmatprep.subr.bf16.mxu0 %v7310_v27 }
 0x5d7   :  { %6022 = vmatpush3.bf16.msra.mxu0 %v7310_v27 }
 0x5d8   :  { %6513 = vmatprep.subr.msk.bf16.mxu0 %vm511_vm3, %v7163_v18 }
 0x69d   :  { %v5977_v37 = vpop.f32.mrb[40].mxu0 }
 0x69e   :  { %v1103_v9 = vpop.f32.mrb[41].mxu0  ;;  %v1136_v42 = vmul.f32 0.14433756, %v5977_v37 }
 0x69f   :  { %v1134_v5 = vmul.f32 0.14433756, %v1103_v9  ;;  %v5978_v52 = vpop.f32.mrb[42].mxu0 }
 0x6a0   :  { %v1106_v10 = vpop.f32.mrb[43].mxu0  ;;  %v1137_v43 = vmul.f32 0.14433756, %v5978_v52  ;;  %v1148_v49 = vsel %vm609_vm4, %v1136_v42, -inf }
 0x6a1   :  { %v1135_v3 = vmul.f32 0.14433756, %v1106_v10  ;;  %v1142_v22 = vsel %vm609_vm4, %v1134_v5, -inf }
 0x6a2   :  { %1143 = vmax.xlane.f32.xlu0 %v1142_v22  ;;  %v1151_v18 = vsel %vm609_vm4, %v1137_v43, -inf }
 0x6a3   :  { %v1145_v51 = vsel %vm609_vm4, %v1135_v3, -inf }
 0x6a4   :  { %1146 = vmax.xlane.f32.xlu1 %v1145_v51 }
 0x6a6   :  { %1149 = vmax.xlane.f32.xlu0 %v1148_v49 }
 0x6a7   :  { %v5981_v56 = vpop.f32.mrb[44].mxu0 }
 0x6a8   :  { %v1119_v50 = vpop.f32.mrb[45].mxu0  ;;  %1152 = vmax.xlane.f32.xlu1 %v1151_v18  ;;  %v1140_v59 = vmul.f32 0.14433756, %v5981_v56 }
 0x6a9   :  { %v1138_v1 = vmul.f32 0.14433756, %v1119_v50  ;;  %v5982_v16 = vpop.f32.mrb[46].mxu0 }
 0x6aa   :  { %v1122_v17 = vpop.f32.mrb[47].mxu0  ;;  %v1141_v62 = vmul.f32 0.14433756, %v5982_v16  ;;  %v1160_v0 = vsel %vm609_vm4, %v1140_v59, -inf }
 0x6ab   :  { %v1139_v44 = vmul.f32 0.14433756, %v1122_v17  ;;  %v1154_v58 = vsel %vm609_vm4, %v1138_v1, -inf }
 0x6ac   :  { %1155 = vmax.xlane.f32.xlu0 %v1154_v58  ;;  %v1163_v4 = vsel %vm609_vm4, %v1141_v62, -inf }
 0x6ad   :  { %v1157_v47 = vsel %vm609_vm4, %v1139_v44, -inf }
 0x6ae   :  { %1158 = vmax.xlane.f32.xlu1 %v1157_v47 }
 0x6b0   :  { %1161 = vmax.xlane.f32.xlu0 %v1160_v0 }
 0x6b2   :  { %1164 = vmax.xlane.f32.xlu1 %v1163_v4 }
 0x72f   :  { %v1144_v24 = vpop.xlane.xlu0 %1143 }
 0x730   :  { %v1166_v11 = vsub.f32 %v1134_v5, %v1144_v24 }
 0x731   :  { %v1147_v55 = vpop.xlane.xlu1 %1146 }
 0x732   :  { %v1174_v6 = vmul.f32 1.442695, %v1166_v11  ;;  %v1167_v21 = vsub.f32 %v1135_v3, %v1147_v55 }
 0x733   :  { %v1150_v37 = vpop.xlane.xlu0 %1149 }
 0x734   :  { %6608 = vpow2.f32 %v1174_v6  ;;  %v1176_v9 = vmul.f32 1.442695, %v1167_v21  ;;  %v1168_v52 = vsub.f32 %v1136_v42, %v1150_v37 }
 0x735   :  { %v1153_v10 = vpop.xlane.xlu1 %1152 }
 0x736   :  { %6610 = vpow2.f32 %v1176_v9  ;;  %v1178_v22 = vmul.f32 1.442695, %v1168_v52  ;;  %v1169_v51 = vsub.f32 %v1137_v43, %v1153_v10 }
 0x738   :  { %6612 = vpow2.f32 %v1178_v22  ;;  %v1180_v49 = vmul.f32 1.442695, %v1169_v51 }
 0x739   :  { %v1156_v56 = vpop.xlane.xlu0 %1155 }
 0x73a   :  { %6614 = vpow2.f32 %v1180_v49  ;;  %v1170_v18 = vsub.f32 %v1138_v1, %v1156_v56 }
 0x73b   :  { %v1159_v50 = vpop.xlane.xlu1 %1158 }
 0x73c   :  { %v1182_v16 = vmul.f32 1.442695, %v1170_v18  ;;  %v1171_v17 = vsub.f32 %v1139_v44, %v1159_v50 }
 0x73d   :  { %v1162_v5 = vpop.xlane.xlu0 %1161 }
 0x73e   :  { %v6609_v58 = vpop.eup %6608  ;;  %6616 = vpow2.f32 %v1182_v16  ;;  %v1184_v3 = vmul.f32 1.442695, %v1171_v17  ;;  %v1172_v47 = vsub.f32 %v1140_v59, %v1162_v5 }
 0x73f   :  { %v1165_v0 = vpop.xlane.xlu1 %1164  ;;  %v1190_v42 = vsel %vm609_vm4, %v6609_v58, 0.0 }
 0x740   :  { %v6611_v4 = vpop.eup %6610  ;;  %6618 = vpow2.f32 %v1184_v3  ;;  %v1186_v24 = vmul.f32 1.442695, %v1172_v47  ;;  %v1173_v43 = vsub.f32 %v1141_v62, %v1165_v0  ;;  %1191 = vadd.xlane.f32.xlu0 %v1190_v42 }
 0x741   :  { %v1193_v11 = vsel %vm609_vm4, %v6611_v4, 0.0  ;;  %v1214_v55 = vpack.c.bf16 %v6611_v4, %v6609_v58 }
 0x742   :  { %v6613_v1 = vpop.eup %6612  ;;  %6620 = vpow2.f32 %v1186_v24  ;;  %v1188_v6 = vmul.f32 1.442695, %v1173_v43  ;;  %1194 = vadd.xlane.f32.xlu1 %v1193_v11 }
 0x743   :  { %5991 = vmatprep.mubr.msk.bf16.mxu1 %vm609_vm4, %v1214_v55  ;;  %v1196_v44 = vsel %vm609_vm4, %v6613_v1, 0.0 }
 0x744   :  { %v6615_v59 = vpop.eup %6614  ;;  %6622 = vpow2.f32 %v1188_v6  ;;  %1197 = vadd.xlane.f32.xlu0 %v1196_v44 }
 0x745   :  { %v1215_v21 = vpack.c.bf16 %v6615_v59, %v6613_v1  ;;  %v1199_v37 = vsel %vm609_vm4, %v6615_v59, 0.0 }
 0x746   :  { %1200 = vadd.xlane.f32.xlu1 %v1199_v37 }
 0x747   :  { %5992 = vmatmul.mubr.msk.bf16.vlgmr.msra.gmra.mrb[40].mxu1 %vm609_vm4, %v1215_v21 }
 0x748   :  { %v6617_v62 = vpop.eup %6616  ;;  %6000 = vmatpush3.bf16.xpose.msra.mxu1 %v7173_v23 }
 0x749   :  { %6510 = vmatprep.subr.msk.bf16.mxu1 %vm511_vm3, %v7157_v15  ;;  %v1202_v9 = vsel %vm609_vm4, %v6617_v62, 0.0 }
 0x74a   :  { %v6619_v52 = vpop.eup %6618  ;;  %1203 = vadd.xlane.f32.xlu0 %v1202_v9 }
 0x74b   :  { %v1205_v10 = vsel %vm609_vm4, %v6619_v52, 0.0  ;;  %v1216_v22 = vpack.c.bf16 %v6619_v52, %v6617_v62 }
 0x74c   :  { %v6621_v51 = vpop.eup %6620  ;;  %1206 = vadd.xlane.f32.xlu1 %v1205_v10 }
 0x74d   :  { %5995 = vmatprep.mubr.msk.bf16.mxu1 %vm609_vm4, %v1216_v22  ;;  %v1208_v49 = vsel %vm609_vm4, %v6621_v51, 0.0 }
 0x74e   :  { %v6623_v56 = vpop.eup %6622  ;;  %1209 = vadd.xlane.f32.xlu0 %v1208_v49 }
 0x74f   :  { %v1211_v18 = vsel %vm609_vm4, %v6623_v56, 0.0  ;;  %v1217_v50 = vpack.c.bf16 %v6623_v56, %v6621_v51 }
 0x750   :  { %6002 = vmatpush3.bf16.xpose.msra.mxu1 %v7195_v40  ;;  %1212 = vadd.xlane.f32.xlu1 %v1211_v18 }
 0x751   :  { %5996 = vmatmul.mubr.msk.bf16.gmra.mrb[44].mxu1 %vm609_vm4, %v1217_v50  ;;  %6511 = vmatprep.subr.msk.bf16.mxu1 %vm511_vm3, %v7191_v39 }
 0x758   :  { %6004 = vmatpush3.bf16.xpose.msra.mxu1 %v7205_v41 }
 0x759   :  { %6512 = vmatprep.subr.msk.bf16.mxu1 %vm511_vm3, %v7189_v38 }
 0x760   :  { %6006 = vmatpush3.bf16.xpose.msra.mxu1 %v7227_v46 }
 0x761   :  { %6047 = vmatprep.subr.bf16.mxu1 %v7306_v20 }
 0x7cd   :  { %v1192_v16 = vpop.xlane.xlu0 %1191 }
 0x7ce   :  { %6624 = vrcp.f32 %v1192_v16 }
 0x7cf   :  { %v1195_v17 = vpop.xlane.xlu1 %1194 }
 0x7d1   :  { %v1198_v5 = vpop.xlane.xlu0 %1197 }
 0x7d2   :  { %6626 = vrcp.f32 %v1198_v5 }
 0x7d3   :  { %v1201_v58 = vpop.xlane.xlu1 %1200 }
 0x7d4   :  { %6628 = vrcp.f32 %v1201_v58 }
 0x7d5   :  { %6630 = vrcp.f32 %v1195_v17 }
 0x7d7   :  { %v1204_v3 = vpop.xlane.xlu0 %1203 }
 0x7d8   :  { %v6625_v4 = vpop.eup %6624  ;;  %6632 = vrcp.f32 %v1204_v3 }
 0x7d9   :  { %v1207_v47 = vpop.xlane.xlu1 %1206 }
 0x7db   :  { %v1210_v0 = vpop.xlane.xlu0 %1209 }
 0x7dc   :  { %v6627_v43 = vpop.eup %6626  ;;  %6634 = vrcp.f32 %v1210_v0 }
 0x7dd   :  { %v1213_v42 = vpop.xlane.xlu1 %1212 }
 0x7de   :  { %v6629_v55 = vpop.eup %6628  ;;  %6636 = vrcp.f32 %v1213_v42 }
 0x7df   :  { %v6631_v44 = vpop.eup %6630  ;;  %6638 = vrcp.f32 %v1207_v47 }
 0x7e2   :  { %v6633_v56 = vpop.eup %6632 }
 0x81a   :  { %v5993_v24 = vpop.f32.mrb[40].mxu1 }
 0x81b   :  { %v1264_v11 = vpop.f32.mrb[41].mxu1  ;;  %v1305_v59 = vmul.f32 %v6627_v43, %v5993_v24 }
 0x81c   :  { %v1303_v1 = vmul.f32 %v6625_v4, %v1264_v11  ;;  %v5994_v6 = vpop.f32.mrb[42].mxu1 }
 0x81d   :  { %v1306_v21 = vmul.f32 %v6629_v55, %v5994_v6  ;;  %v1267_v37 = vpop.f32.mrb[43].mxu1  ;;  %v7536_v22 = vadd.f32 %v1305_v59, %v7460_v45 }
 0x81e   :  { %v1304_v62 = vmul.f32 %v6631_v44, %v1267_v37  ;;  %v7530_v52 = vadd.f32 %v1303_v1, %v7454_v57 }
 0x81f   :  { %v7527_v9 = vadd.f32 %v1306_v21, %v7451_v25  ;;  %v6635_v25 = vpop.eup %6634 }
 0x820   :  { %v7533_v10 = vadd.f32 %v1304_v62, %v7457_v2  ;;  %v6637_v57 = vpop.eup %6636 }
 0x821   :  { %v1320_v49 = vpack.c.bf16 %v7527_v9, %v7536_v22  ;;  %v6639_v45 = vpop.eup %6638 }
 0x822   :  { %v1319_v51 = vpack.c.bf16 %v7533_v10, %v7530_v52 }
 0x824   :  { %v5997_v18 = vpop.f32.mrb[44].mxu1  ;;  %6007 = vmatprep.mubr.msk.bf16.mxu1 %vm511_vm3, %v1319_v51 }
 0x825   :  { %v1280_v50 = vpop.f32.mrb[45].mxu1  ;;  %6008 = vmatmul.mubr.msk.bf16.vlgmr.msra.gmra.mrb[48].mxu1 %vm511_vm3, %v1320_v49  ;;  %v1309_v17 = vmul.f32 %v6635_v25, %v5997_v18 }
 0x826   :  { %v1307_v2 = vmul.f32 %v6633_v56, %v1280_v50  ;;  %v5998_v16 = vpop.f32.mrb[46].mxu1  ;;  %6048 = vmatpush3.bf16.msra.mxu1 %v7306_v20 }
 0x827   :  { %v1310_v5 = vmul.f32 %v6637_v57, %v5998_v16  ;;  %v1283_v58 = vpop.f32.mrb[47].mxu1  ;;  %6049 = vmatprep.subr.bf16.mxu1 %v7303_v12  ;;  %v7557_v20 = vadd.f32 %v1309_v17, %v7481_v54 }
 0x828   :  { %v1308_v3 = vmul.f32 %v6639_v45, %v1283_v58  ;;  %v7550_v0 = vadd.f32 %v1307_v2, %v7474_v48 }
 0x829   :  { %v7547_v47 = vadd.f32 %v1310_v5, %v7471_v14 }
 0x82a   :  { %v7553_v42 = vadd.f32 %v1308_v3, %v7477_v19  ;;  %6050 = vmatpush3.bf16.msra.mxu1 %v7303_v12 }
 0x82b   :  { %6051 = vmatprep.subr.bf16.mxu1 %v7313_v53  ;;  %v1322_v14 = vpack.c.bf16 %v7547_v47, %v7557_v20 }
 0x82c   :  { %v1321_v4 = vpack.c.bf16 %v7553_v42, %v7550_v0 }
 0x82e   :  { %6011 = vmatprep.mubr.msk.bf16.mxu1 %vm511_vm3, %v1321_v4  ;;  %6052 = vmatpush3.bf16.msra.mxu1 %v7313_v53 }
 0x82f   :  { %6012 = vmatmul.mubr.msk.bf16.gmra.mrb[52].mxu1 %vm511_vm3, %v1322_v14  ;;  %6053 = vmatprep.subr.bf16.mxu1 %v7310_v27 }
 0x832   :  { %6054 = vmatpush3.bf16.msra.mxu1 %v7310_v27 }
 0x833   :  { %6517 = vmatprep.subr.msk.bf16.mxu1 %vm511_vm3, %v7266_v8 }
 0x8f8   :  { %v6009_v12 = vpop.f32.mrb[48].mxu1 }
 0x8f9   :  { %v1369_v48 = vpop.f32.mrb[49].mxu1  ;;  %v1402_v43 = vmul.f32 0.14433756, %v6009_v12 }
 0x8fa   :  { %v1400_v19 = vmul.f32 0.14433756, %v1369_v48  ;;  %v6010_v54 = vpop.f32.mrb[50].mxu1 }
 0x8fb   :  { %v1372_v24 = vpop.f32.mrb[51].mxu1  ;;  %v1403_v53 = vmul.f32 0.14433756, %v6010_v54  ;;  %v1414_v6 = vsel %vm609_vm4, %v1402_v43, -inf }
 0x8fc   :  { %v1401_v11 = vmul.f32 0.14433756, %v1372_v24  ;;  %v1408_v55 = vsel %vm609_vm4, %v1400_v19, -inf }
 0x8fd   :  { %1409 = vmax.xlane.f32.xlu0 %v1408_v55  ;;  %v1417_v44 = vsel %vm609_vm4, %v1403_v53, -inf }
 0x8fe   :  { %v1411_v1 = vsel %vm609_vm4, %v1401_v11, -inf }
 0x8ff   :  { %1412 = vmax.xlane.f32.xlu1 %v1411_v1 }
 0x901   :  { %1415 = vmax.xlane.f32.xlu0 %v1414_v6 }
 0x902   :  { %v6013_v27 = vpop.f32.mrb[52].mxu1 }
 0x903   :  { %v1385_v59 = vpop.f32.mrb[53].mxu1  ;;  %1418 = vmax.xlane.f32.xlu1 %v1417_v44  ;;  %v1406_v51 = vmul.f32 0.14433756, %v6013_v27 }
 0x904   :  { %v1404_v21 = vmul.f32 0.14433756, %v1385_v59  ;;  %v6014_v37 = vpop.f32.mrb[54].mxu1 }
 0x905   :  { %v1388_v62 = vpop.f32.mrb[55].mxu1  ;;  %v1407_v18 = vmul.f32 0.14433756, %v6014_v37  ;;  %v1426_v50 = vsel %vm609_vm4, %v1406_v51, -inf }
 0x906   :  { %v1405_v49 = vmul.f32 0.14433756, %v1388_v62  ;;  %v1420_v56 = vsel %vm609_vm4, %v1404_v21, -inf }
 0x907   :  { %1421 = vmax.xlane.f32.xlu0 %v1420_v56  ;;  %v1429_v57 = vsel %vm609_vm4, %v1407_v18, -inf }
 0x908   :  { %v1423_v25 = vsel %vm609_vm4, %v1405_v49, -inf }
 0x909   :  { %1424 = vmax.xlane.f32.xlu1 %v1423_v25 }
 0x90b   :  { %1427 = vmax.xlane.f32.xlu0 %v1426_v50 }
 0x90d   :  { %1430 = vmax.xlane.f32.xlu1 %v1429_v57 }
 0x98a   :  { %v1410_v2 = vpop.xlane.xlu0 %1409 }
 0x98b   :  { %v1432_v16 = vsub.f32 %v1400_v19, %v1410_v2 }
 0x98c   :  { %v1413_v45 = vpop.xlane.xlu1 %1412 }
 0x98d   :  { %v1440_v17 = vmul.f32 1.442695, %v1432_v16  ;;  %v1433_v5 = vsub.f32 %v1401_v11, %v1413_v45 }
 0x98e   :  { %v1416_v58 = vpop.xlane.xlu0 %1415 }
 0x98f   :  { %6640 = vpow2.f32 %v1440_v17  ;;  %v1442_v3 = vmul.f32 1.442695, %v1433_v5  ;;  %v1434_v4 = vsub.f32 %v1402_v43, %v1416_v58 }
 0x990   :  { %v1419_v14 = vpop.xlane.xlu1 %1418 }
 0x991   :  { %6642 = vpow2.f32 %v1442_v3  ;;  %v1444_v12 = vmul.f32 1.442695, %v1434_v4  ;;  %v1435_v48 = vsub.f32 %v1403_v53, %v1419_v14 }
 0x993   :  { %6644 = vpow2.f32 %v1444_v12  ;;  %v1446_v54 = vmul.f32 1.442695, %v1435_v48 }
 0x994   :  { %v1422_v24 = vpop.xlane.xlu0 %1421 }
 0x995   :  { %6646 = vpow2.f32 %v1446_v54  ;;  %v1436_v55 = vsub.f32 %v1404_v21, %v1422_v24 }
 0x996   :  { %v1425_v1 = vpop.xlane.xlu1 %1424 }
 0x997   :  { %v1448_v6 = vmul.f32 1.442695, %v1436_v55  ;;  %v1437_v27 = vsub.f32 %v1405_v49, %v1425_v1 }
 0x998   :  { %v1428_v19 = vpop.xlane.xlu0 %1427 }
 0x999   :  { %v6641_v44 = vpop.eup %6640  ;;  %6648 = vpow2.f32 %v1448_v6  ;;  %v1450_v11 = vmul.f32 1.442695, %v1437_v27  ;;  %v1438_v59 = vsub.f32 %v1406_v51, %v1428_v19 }
 0x99a   :  { %v1431_v37 = vpop.xlane.xlu1 %1430  ;;  %v1456_v43 = vsel %vm609_vm4, %v6641_v44, 0.0 }
 0x99b   :  { %v6643_v62 = vpop.eup %6642  ;;  %6650 = vpow2.f32 %v1450_v11  ;;  %v1452_v56 = vmul.f32 1.442695, %v1438_v59  ;;  %v1439_v53 = vsub.f32 %v1407_v18, %v1431_v37  ;;  %1457 = vadd.xlane.f32.xlu0 %v1456_v43 }
 0x99c   :  { %v1459_v25 = vsel %vm609_vm4, %v6643_v62, 0.0  ;;  %v1480_v50 = vpack.c.bf16 %v6643_v62, %v6641_v44 }
 0x99d   :  { %v6645_v21 = vpop.eup %6644  ;;  %6652 = vpow2.f32 %v1452_v56  ;;  %v1454_v57 = vmul.f32 1.442695, %v1439_v53  ;;  %1460 = vadd.xlane.f32.xlu1 %v1459_v25 }
 0x99e   :  { %6023 = vmatprep.mubr.msk.bf16.mxu0 %vm609_vm4, %v1480_v50  ;;  %v1462_v49 = vsel %vm609_vm4, %v6645_v21, 0.0 }
 0x99f   :  { %v6647_v51 = vpop.eup %6646  ;;  %6654 = vpow2.f32 %v1454_v57  ;;  %1463 = vadd.xlane.f32.xlu0 %v1462_v49 }
 0x9a0   :  { %v1481_v2 = vpack.c.bf16 %v6647_v51, %v6645_v21  ;;  %v1465_v16 = vsel %vm609_vm4, %v6647_v51, 0.0 }
 0x9a1   :  { %1466 = vadd.xlane.f32.xlu1 %v1465_v16 }
 0x9a2   :  { %6024 = vmatmul.mubr.msk.bf16.vlgmr.msra.gmra.mrb[48].mxu0 %vm609_vm4, %v1481_v2 }
 0x9a3   :  { %v6649_v18 = vpop.eup %6648  ;;  %6032 = vmatpush3.bf16.xpose.msra.mxu0 %v7173_v23 }
 0x9a4   :  { %6514 = vmatprep.subr.msk.bf16.mxu0 %vm511_vm3, %v7157_v15  ;;  %v1468_v45 = vsel %vm609_vm4, %v6649_v18, 0.0 }
 0x9a5   :  { %v6651_v17 = vpop.eup %6650  ;;  %1469 = vadd.xlane.f32.xlu0 %v1468_v45 }
 0x9a6   :  { %v1471_v5 = vsel %vm609_vm4, %v6651_v17, 0.0  ;;  %v1482_v58 = vpack.c.bf16 %v6651_v17, %v6649_v18 }
 0x9a7   :  { %v6653_v3 = vpop.eup %6652  ;;  %1472 = vadd.xlane.f32.xlu1 %v1471_v5 }
 0x9a8   :  { %6027 = vmatprep.mubr.msk.bf16.mxu0 %vm609_vm4, %v1482_v58  ;;  %v1474_v4 = vsel %vm609_vm4, %v6653_v3, 0.0 }
 0x9a9   :  { %v6655_v14 = vpop.eup %6654  ;;  %1475 = vadd.xlane.f32.xlu0 %v1474_v4 }
 0x9aa   :  { %v1477_v23 = vsel %vm609_vm4, %v6655_v14, 0.0  ;;  %v1483_v12 = vpack.c.bf16 %v6655_v14, %v6653_v3 }
 0x9ab   :  { %6034 = vmatpush3.bf16.xpose.msra.mxu0 %v7195_v40  ;;  %1478 = vadd.xlane.f32.xlu1 %v1477_v23 }
 0x9ac   :  { %6028 = vmatmul.mubr.msk.bf16.gmra.mrb[52].mxu0 %vm609_vm4, %v1483_v12  ;;  %6515 = vmatprep.subr.msk.bf16.mxu0 %vm511_vm3, %v7191_v39 }
 0x9b3   :  { %6036 = vmatpush3.bf16.xpose.msra.mxu0 %v7205_v41 }
 0x9b4   :  { %6516 = vmatprep.subr.msk.bf16.mxu0 %vm511_vm3, %v7189_v38 }
 0x9bb   :  { %6038 = vmatpush3.bf16.xpose.msra.mxu0 %v7227_v46 }
 0x9bc   :  { %6079 = vmatprep.subr.bf16.mxu0 %v7359_v26 }
 0xa28   :  { %v1458_v15 = vpop.xlane.xlu0 %1457 }
 0xa29   :  { %6656 = vrcp.f32 %v1458_v15 }
 0xa2a   :  { %v1461_v48 = vpop.xlane.xlu1 %1460 }
 0xa2c   :  { %v1464_v54 = vpop.xlane.xlu0 %1463 }
 0xa2d   :  { %6658 = vrcp.f32 %v1464_v54 }
 0xa2e   :  { %v1467_v24 = vpop.xlane.xlu1 %1466 }
 0xa2f   :  { %6660 = vrcp.f32 %v1467_v24 }
 0xa30   :  { %6662 = vrcp.f32 %v1461_v48 }
 0xa32   :  { %v1470_v40 = vpop.xlane.xlu0 %1469 }
 0xa33   :  { %v6657_v41 = vpop.eup %6656  ;;  %6664 = vrcp.f32 %v1470_v40 }
 0xa34   :  { %v1473_v55 = vpop.xlane.xlu1 %1472 }
 0xa36   :  { %v1476_v39 = vpop.xlane.xlu0 %1475 }
 0xa37   :  { %v6659_v38 = vpop.eup %6658  ;;  %6666 = vrcp.f32 %v1476_v39 }
 0xa38   :  { %v1479_v1 = vpop.xlane.xlu1 %1478 }
 0xa39   :  { %v6661_v27 = vpop.eup %6660  ;;  %6668 = vrcp.f32 %v1479_v1 }
 0xa3a   :  { %v6663_v11 = vpop.eup %6662  ;;  %6670 = vrcp.f32 %v1473_v55 }
 0xa3d   :  { %v6665_v49 = vpop.eup %6664 }
 0xa75   :  { %v6025_v6 = vpop.f32.mrb[48].mxu0 }
 0xa76   :  { %v1530_v46 = vpop.f32.mrb[49].mxu0  ;;  %v1571_v59 = vmul.f32 %v6659_v38, %v6025_v6 }
 0xa77   :  { %v1569_v19 = vmul.f32 %v6657_v41, %v1530_v46  ;;  %v6026_v44 = vpop.f32.mrb[50].mxu0 }
 0xa78   :  { %v1572_v37 = vmul.f32 %v6661_v27, %v6026_v44  ;;  %v1533_v43 = vpop.f32.mrb[51].mxu0  ;;  %v7612_v50 = vadd.f32 %v1571_v59, %v7536_v22 }
 0xa79   :  { %v1570_v62 = vmul.f32 %v6663_v11, %v1533_v43  ;;  %v7606_v53 = vadd.f32 %v1569_v19, %v7530_v52 }
 0xa7a   :  { %v7603_v56 = vadd.f32 %v1572_v37, %v7527_v9  ;;  %v6667_v9 = vpop.eup %6666 }
 0xa7b   :  { %v7609_v25 = vadd.f32 %v1570_v62, %v7533_v10  ;;  %v6669_v52 = vpop.eup %6668 }
 0xa7c   :  { %v1586_v57 = vpack.c.bf16 %v7603_v56, %v7612_v50  ;;  %v6671_v22 = vpop.eup %6670 }
 0xa7d   :  { %v1585_v21 = vpack.c.bf16 %v7609_v25, %v7606_v53 }
 0xa7f   :  { %v6029_v51 = vpop.f32.mrb[52].mxu0  ;;  %6039 = vmatprep.mubr.msk.bf16.mxu0 %vm511_vm3, %v1585_v21 }
 0xa80   :  { %v1546_v2 = vpop.f32.mrb[53].mxu0  ;;  %6040 = vmatmul.mubr.msk.bf16.vlgmr.msra.gmra.mrb[56].mxu0 %vm511_vm3, %v1586_v57  ;;  %v1575_v18 = vmul.f32 %v6667_v9, %v6029_v51 }
 0xa81   :  { %v1573_v10 = vmul.f32 %v6665_v49, %v1546_v2  ;;  %v6030_v16 = vpop.f32.mrb[54].mxu0  ;;  %6080 = vmatpush3.bf16.msra.mxu0 %v7359_v26 }
 0xa82   :  { %v1576_v45 = vmul.f32 %v6669_v52, %v6030_v16  ;;  %v1549_v17 = vpop.f32.mrb[55].mxu0  ;;  %6081 = vmatprep.subr.bf16.mxu0 %v7356_v13  ;;  %v7633_v14 = vadd.f32 %v1575_v18, %v7557_v20 }
 0xa83   :  { %v1574_v5 = vmul.f32 %v6671_v22, %v1549_v17  ;;  %v7626_v3 = vadd.f32 %v1573_v10, %v7550_v0 }
 0xa84   :  { %v7623_v58 = vadd.f32 %v1576_v45, %v7547_v47  ;;  %8836 = vst [vmem:[#allocation7_spill] sm:$0xff] %v7633_v14 }
 0xa85   :  { %v7629_v4 = vadd.f32 %v1574_v5, %v7553_v42  ;;  %6082 = vmatpush3.bf16.msra.mxu0 %v7356_v13 }
 0xa86   :  { %8834 = vst [vmem:[#allocation5_spill] sm:$0xff] %v7623_v58  ;;  %6083 = vmatprep.subr.bf16.mxu0 %v7364_v63  ;;  %v1588_v47 = vpack.c.bf16 %v7623_v58, %v7633_v14 }
 0xa87   :  { %8835 = vst [vmem:[#allocation6_spill] sm:$0xff] %v7629_v4  ;;  %v1587_v23 = vpack.c.bf16 %v7629_v4, %v7626_v3 }
 0xa89   :  { %6043 = vmatprep.mubr.msk.bf16.mxu0 %vm511_vm3, %v1587_v23  ;;  %6084 = vmatpush3.bf16.msra.mxu0 %v7364_v63 }
 0xa8a   :  { %6044 = vmatmul.mubr.msk.bf16.gmra.mrb[60].mxu0 %vm511_vm3, %v1588_v47  ;;  %6085 = vmatprep.subr.bf16.mxu0 %v7362_v61 }
 0xa8d   :  { %6086 = vmatpush3.bf16.msra.mxu0 %v7362_v61 }
 0xa8e   :  { %6521 = vmatprep.subr.msk.bf16.mxu0 %vm511_vm3, %v7266_v8 }
 0xb53   :  { %v6041_v0 = vpop.f32.mrb[56].mxu0 }
 0xb54   :  { %v1635_v42 = vpop.f32.mrb[57].mxu0  ;;  %v1668_v48 = vmul.f32 0.14433756, %v6041_v0 }
 0xb55   :  { %v1666_v20 = vmul.f32 0.14433756, %v1635_v42  ;;  %v6042_v12 = vpop.f32.mrb[58].mxu0 }
 0xb56   :  { %v1638_v15 = vpop.f32.mrb[59].mxu0  ;;  %v1669_v40 = vmul.f32 0.14433756, %v6042_v12  ;;  %v1680_v39 = vsel %vm609_vm4, %v1668_v48, -inf }
 0xb57   :  { %v1667_v54 = vmul.f32 0.14433756, %v1638_v15  ;;  %v1674_v24 = vsel %vm609_vm4, %v1666_v20, -inf }
 0xb58   :  { %1675 = vmax.xlane.f32.xlu0 %v1674_v24  ;;  %v1683_v41 = vsel %vm609_vm4, %v1669_v40, -inf }
 0xb59   :  { %v1677_v55 = vsel %vm609_vm4, %v1667_v54, -inf }
 0xb5a   :  { %1678 = vmax.xlane.f32.xlu1 %v1677_v55 }
 0xb5c   :  { %1681 = vmax.xlane.f32.xlu0 %v1680_v39 }
 0xb5d   :  { %v6045_v1 = vpop.f32.mrb[60].mxu0 }
 0xb5e   :  { %v1651_v6 = vpop.f32.mrb[61].mxu0  ;;  %1684 = vmax.xlane.f32.xlu1 %v1683_v41  ;;  %v1672_v19 = vmul.f32 0.14433756, %v6045_v1 }
 0xb5f   :  { %v1670_v38 = vmul.f32 0.14433756, %v1651_v6  ;;  %v6046_v46 = vpop.f32.mrb[62].mxu0 }
 0xb60   :  { %v1654_v27 = vpop.f32.mrb[63].mxu0  ;;  %v1673_v59 = vmul.f32 0.14433756, %v6046_v46  ;;  %v1692_v43 = vsel %vm609_vm4, %v1672_v19, -inf  ;;  %v6968_v46 = vld [vmem:[%s8816_s1 + $0x30] ss:$0 sm:$0xff] }
 0xb61   :  { %v1671_v44 = vmul.f32 0.14433756, %v1654_v27  ;;  %v1686_v11 = vsel %vm609_vm4, %v1670_v38, -inf  ;;  %v7677_v27 = vadd.f32 %v6968_v46, %v7278_v31 }
 0xb62   :  { %1687 = vmax.xlane.f32.xlu0 %v1686_v11  ;;  %v1695_v62 = vsel %vm609_vm4, %v1673_v59, -inf }
 0xb63   :  { %v1689_v37 = vsel %vm609_vm4, %v1671_v44, -inf }
 0xb64   :  { %1690 = vmax.xlane.f32.xlu1 %v1689_v37  ;;  %v8827_v37 = vmax.f32 %v7677_v27, 0.0 }
 0xb66   :  { %1693 = vmax.xlane.f32.xlu0 %v1692_v43 }
 0xb68   :  { %1696 = vmax.xlane.f32.xlu1 %v1695_v62  ;;  %v7700_v62 = vsel %vm511_vm3, %v7264_v7, 0 }
 0xbe5   :  { %v1676_v21 = vpop.xlane.xlu0 %1675 }
 0xbe6   :  { %v1698_v57 = vsub.f32 %v1666_v20, %v1676_v21 }
 0xbe7   :  { %v1679_v49 = vpop.xlane.xlu1 %1678 }
 0xbe8   :  { %v1706_v51 = vmul.f32 1.442695, %v1698_v57  ;;  %v1699_v9 = vsub.f32 %v1667_v54, %v1679_v49  ;;  %v7715_v49 = vsel %vm511_vm3, %v7274_v29, 0 }
 0xbe9   :  { %v1682_v2 = vpop.xlane.xlu0 %1681 }
 0xbea   :  { %v1708_v52 = vmul.f32 1.442695, %v1699_v9  ;;  %v1700_v10 = vsub.f32 %v1668_v48, %v1682_v2  ;;  %6672 = vpow2.f32 %v1706_v51  ;;  %v7721_v51 = vadd.f32 %v6968_v46, %v7276_v30 }
 0xbeb   :  { %v1685_v16 = vpop.xlane.xlu1 %1684  ;;  %v7724_v9 = vadd.f32 %v6968_v46, %v7280_v32  ;;  %v7727_v2 = vadd.f32 %v6968_v46, %v7286_v35 }
 0xbec   :  { %6674 = vpow2.f32 %v1708_v52  ;;  %v1710_v22 = vmul.f32 1.442695, %v1700_v10  ;;  %v1701_v18 = vsub.f32 %v1669_v40, %v1685_v16  ;;  %v7730_v52 = vadd.f32 %v6968_v46, %v7290_v60 }
 0xbed   :  { %v7734_v10 = vsel %vm511_vm3, %v7272_v28, 0  ;;  %v8825_v16 = vmax.f32 %v7721_v51, 0.0  ;;  %v8828_v30 = vmax.f32 %v7724_v9, 0.0  ;;  %v8823_v32 = vmax.f32 %v7727_v2, 0.0 }
 0xbee   :  { %v1712_v45 = vmul.f32 1.442695, %v1701_v18  ;;  %6676 = vpow2.f32 %v1710_v22  ;;  %v8822_v35 = vmax.f32 %v7730_v52, 0.0  ;;  %v7747_v22 = vadd.f32 %v6968_v46, %v7284_v34 }
 0xbef   :  { %v1688_v17 = vpop.xlane.xlu0 %1687  ;;  %v1860_v60 = vpack.c.bf16 %v8828_v30, %v8825_v16  ;;  %v7750_v18 = vadd.f32 %v6968_v46, %v7288_v36 }
 0xbf0   :  { %6678 = vpow2.f32 %v1712_v45  ;;  %v1702_v5 = vsub.f32 %v1670_v38, %v1688_v17  ;;  %v7671_v38 = vsel %vm511_vm3, %v7266_v8, 0  ;;  %v1861_v45 = vpack.c.bf16 %v8822_v35, %v8823_v32 }
 0xbf1   :  { %v1691_v23 = vpop.xlane.xlu1 %1690  ;;  %v8821_v17 = vmax.f32 %v7747_v22, 0.0 }
 0xbf2   :  { %v1714_v47 = vmul.f32 1.442695, %v1702_v5  ;;  %v1703_v0 = vsub.f32 %v1671_v44, %v1691_v23  ;;  %v8824_v5 = vmax.f32 %v7750_v18, 0.0 }
 0xbf3   :  { %v1694_v42 = vpop.xlane.xlu0 %1693 }
 0xbf4   :  { %v1716_v20 = vmul.f32 1.442695, %v1703_v0  ;;  %v1704_v12 = vsub.f32 %v1672_v19, %v1694_v42  ;;  %v7655_v15 = vpop.eup %6672  ;;  %6680 = vpow2.f32 %v1714_v47  ;;  %v7680_v19 = vadd.f32 %v6968_v46, %v7282_v33 }
 0xbf5   :  { %v1697_v48 = vpop.xlane.xlu1 %1696  ;;  %v1862_v34 = vpack.c.bf16 %v8824_v5, %v8821_v17 }
 0xbf6   :  { %v7657_v54 = vpop.eup %6674  ;;  %6682 = vpow2.f32 %v1716_v20  ;;  %v1718_v24 = vmul.f32 1.442695, %v1704_v12  ;;  %v1705_v40 = vsub.f32 %v1673_v59, %v1697_v48  ;;  %v8826_v31 = vmax.f32 %v7680_v19, 0.0 }
 0xbf7   :  { %v1746_v55 = vpack.c.bf16 %v7657_v54, %v7655_v15 }
 0xbf8   :  { %v1720_v39 = vmul.f32 1.442695, %v1705_v40  ;;  %v7661_v1 = vpop.eup %6676  ;;  %6684 = vpow2.f32 %v1718_v24  ;;  %v1859_v57 = vpack.c.bf16 %v8826_v31, %v8827_v37 }
 0xbf9   :  { %6055 = vmatprep.mubr.msk.bf16.mxu1 %vm609_vm4, %v1746_v55 }
 0xbfa   :  { %v7664_v41 = vpop.eup %6678  ;;  %6686 = vpow2.f32 %v1720_v39 }
 0xbfb   :  { %v1747_v6 = vpack.c.bf16 %v7664_v41, %v7661_v1 }
 0xbfd   :  { %6056 = vmatmul.mubr.msk.bf16.vlgmr.msra.gmra.mrb[56].mxu1 %vm609_vm4, %v1747_v6 }
 0xbfe   :  { %6064 = vmatpush3.bf16.xpose.msra.mxu1 %v7671_v38  ;;  %v7683_v44 = vpop.eup %6680 }
 0xbff   :  { %6518 = vmatprep.subr.msk.bf16.mxu1 %vm511_vm3, %v7264_v7 }
 0xc00   :  { %v7687_v11 = vpop.eup %6682 }
 0xc01   :  { %v1748_v59 = vpack.c.bf16 %v7687_v11, %v7683_v44 }
 0xc02   :  { %v7693_v43 = vpop.eup %6684 }
 0xc03   :  { %6059 = vmatprep.mubr.msk.bf16.mxu1 %vm609_vm4, %v1748_v59 }
 0xc04   :  { %v7696_v33 = vpop.eup %6686 }
 0xc05   :  { %v1749_v21 = vpack.c.bf16 %v7696_v33, %v7693_v43 }
 0xc06   :  { %6066 = vmatpush3.bf16.xpose.msra.mxu1 %v7700_v62 }
 0xc07   :  { %6060 = vmatmul.mubr.msk.bf16.gmra.mrb[60].mxu1 %vm609_vm4, %v1749_v21  ;;  %6519 = vmatprep.subr.msk.bf16.mxu1 %vm511_vm3, %v7274_v29 }
 0xc08   :  { %6071 = vmatprep.mubr.msk.bf16.mxu1 %vm511_vm3, %v1859_v57 }
 0xc0e   :  { %6068 = vmatpush3.bf16.xpose.msra.mxu1 %v7715_v49 }
 0xc0f   :  { %6520 = vmatprep.subr.msk.bf16.mxu1 %vm511_vm3, %v7272_v28 }
 0xc16   :  { %6070 = vmatpush3.bf16.xpose.msra.mxu1 %v7734_v10 }
 0xc17   :  { %6111 = vmatprep.subr.bf16.mxu1 %v7359_v26 }
 0xc1d   :  { %6072 = vmatmul.mubr.msk.bf16.vlgmr.msra.gmra.mrb[64].mxu1 %vm511_vm3, %v1860_v60 }
 0xc1e   :  { %6075 = vmatprep.mubr.msk.bf16.mxu1 %vm511_vm3, %v1861_v45  ;;  %6112 = vmatpush3.bf16.msra.mxu1 %v7359_v26 }
 0xc1f   :  { %6113 = vmatprep.subr.bf16.mxu1 %v7356_v13 }
 0xc22   :  { %6114 = vmatpush3.bf16.msra.mxu1 %v7356_v13 }
 0xc23   :  { %6115 = vmatprep.subr.bf16.mxu1 %v7364_v63 }
 0xc25   :  { %6076 = vmatmul.mubr.msk.bf16.gmra.mrb[68].mxu1 %vm511_vm3, %v1862_v34 }
 0xc26   :  { %6116 = vmatpush3.bf16.msra.mxu1 %v7364_v63 }
 0xc27   :  { %6117 = vmatprep.subr.bf16.mxu1 %v7362_v61 }
 0xc2a   :  { %6118 = vmatpush3.bf16.msra.mxu1 %v7362_v61 }
 0xc2b   :  { %6525 = vmatprep.subr.msk.bf16.mxu1 %vm511_vm3, %v7266_v8 }
 0xcd0   :  { %v7774_v36 = vpop.f32.mrb[56].mxu1 }
 0xcd1   :  { %v7776_v23 = vpop.f32.mrb[57].mxu1 }
 0xcd2   :  { %v7778_v47 = vpop.f32.mrb[58].mxu1 }
 0xcd3   :  { %v7780_v0 = vpop.f32.mrb[59].mxu1 }
 0xcda   :  { %v7782_v42 = vpop.f32.mrb[60].mxu1 }
 0xcdb   :  { %8837 = vst [vmem:[#allocation8_spill] sm:$0xff] %v7782_v42  ;;  %v7784_v20 = vpop.f32.mrb[61].mxu1 }
 0xcdc   :  { %v7786_v12 = vpop.f32.mrb[62].mxu1 }
 0xcdd   :  { %8838 = vst [vmem:[#allocation9_spill] sm:$0xff] %v7786_v12  ;;  %v7788_v48 = vpop.f32.mrb[63].mxu1 }
 0xcf0   :  { %v6073_v24 = vpop.f32.mrb[64].mxu1 }
 0xcf1   :  { %v1921_v40 = vpop.f32.mrb[65].mxu1  ;;  %v1954_v46 = vmul.f32 0.14433756, %v6073_v24 }
 0xcf2   :  { %v1952_v55 = vmul.f32 0.14433756, %v1921_v40  ;;  %v6074_v39 = vpop.f32.mrb[66].mxu1 }
 0xcf3   :  { %v1924_v6 = vpop.f32.mrb[67].mxu1  ;;  %v1955_v57 = vmul.f32 0.14433756, %v6074_v39  ;;  %v1966_v34 = vsel %vm609_vm4, %v1954_v46, -inf }
 0xcf4   :  { %v1953_v59 = vmul.f32 0.14433756, %v1924_v6  ;;  %v1960_v21 = vsel %vm609_vm4, %v1952_v55, -inf }
 0xcf5   :  { %1961 = vmax.xlane.f32.xlu0 %v1960_v21  ;;  %v1969_v40 = vsel %vm609_vm4, %v1955_v57, -inf }
 0xcf6   :  { %v1963_v60 = vsel %vm609_vm4, %v1953_v59, -inf }
 0xcf7   :  { %1964 = vmax.xlane.f32.xlu1 %v1963_v60 }
 0xcf8   :  { %v6077_v45 = vpop.f32.mrb[68].mxu1 }
 0xcf9   :  { %1967 = vmax.xlane.f32.xlu0 %v1966_v34  ;;  %v1937_v17 = vpop.f32.mrb[69].mxu1  ;;  %v1958_v24 = vmul.f32 0.14433756, %v6077_v45 }
 0xcfa   :  { %v1956_v35 = vmul.f32 0.14433756, %v1937_v17  ;;  %v6078_v32 = vpop.f32.mrb[70].mxu1 }
 0xcfb   :  { %1970 = vmax.xlane.f32.xlu1 %v1969_v40  ;;  %v1940_v5 = vpop.f32.mrb[71].mxu1  ;;  %v1959_v39 = vmul.f32 0.14433756, %v6078_v32  ;;  %v1978_v60 = vsel %vm609_vm4, %v1958_v24, -inf }
 0xcfc   :  { %v1957_v6 = vmul.f32 0.14433756, %v1940_v5  ;;  %v1972_v16 = vsel %vm609_vm4, %v1956_v35, -inf }
 0xcfd   :  { %1973 = vmax.xlane.f32.xlu0 %v1972_v16  ;;  %v1981_v34 = vsel %vm609_vm4, %v1959_v39, -inf }
 0xcfe   :  { %v1975_v21 = vsel %vm609_vm4, %v1957_v6, -inf }
 0xcff   :  { %1976 = vmax.xlane.f32.xlu1 %v1975_v21 }
 0xd01   :  { %1979 = vmax.xlane.f32.xlu0 %v1978_v60 }
 0xd03   :  { %1982 = vmax.xlane.f32.xlu1 %v1981_v34 }
 0xd82   :  { %v1962_v17 = vpop.xlane.xlu0 %1961 }
 0xd83   :  { %v1984_v31 = vsub.f32 %v1952_v55, %v1962_v17 }
 0xd84   :  { %v1965_v37 = vpop.xlane.xlu1 %1964 }
 0xd85   :  { %v1992_v40 = vmul.f32 1.442695, %v1984_v31  ;;  %v1985_v30 = vsub.f32 %v1953_v59, %v1965_v37 }
 0xd86   :  { %v1968_v45 = vpop.xlane.xlu0 %1967 }
 0xd87   :  { %6688 = vpow2.f32 %v1992_v40  ;;  %v1994_v5 = vmul.f32 1.442695, %v1985_v30  ;;  %v1986_v58 = vsub.f32 %v1954_v46, %v1968_v45 }
 0xd88   :  { %v1971_v16 = vpop.xlane.xlu1 %1970 }
 0xd89   :  { %6690 = vpow2.f32 %v1994_v5  ;;  %v1996_v32 = vmul.f32 1.442695, %v1986_v58  ;;  %v1987_v14 = vsub.f32 %v1955_v57, %v1971_v16 }
 0xd8a   :  { %v1974_v21 = vpop.xlane.xlu0 %1973 }
 0xd8b   :  { %6692 = vpow2.f32 %v1996_v32  ;;  %v1998_v12 = vmul.f32 1.442695, %v1987_v14  ;;  %v1988_v60 = vsub.f32 %v1956_v35, %v1974_v21 }
 0xd8c   :  { %v1977_v42 = vpop.xlane.xlu1 %1976 }
 0xd8d   :  { %6694 = vpow2.f32 %v1998_v12  ;;  %v2000_v34 = vmul.f32 1.442695, %v1988_v60  ;;  %v1989_v4 = vsub.f32 %v1957_v6, %v1977_v42 }
 0xd8e   :  { %v1980_v55 = vpop.xlane.xlu0 %1979 }
 0xd8f   :  { %6696 = vpow2.f32 %v2000_v34  ;;  %v2002_v31 = vmul.f32 1.442695, %v1989_v4  ;;  %v1990_v37 = vsub.f32 %v1958_v24, %v1980_v55 }
 0xd90   :  { %v1983_v59 = vpop.xlane.xlu1 %1982 }
 0xd91   :  { %v6689_v17 = vpop.eup %6688  ;;  %6698 = vpow2.f32 %v2002_v31  ;;  %v2004_v30 = vmul.f32 1.442695, %v1990_v37  ;;  %v1991_v46 = vsub.f32 %v1959_v39, %v1983_v59 }
 0xd92   :  { %v2008_v58 = vsel %vm609_vm4, %v6689_v17, 0.0 }
 0xd93   :  { %v6691_v57 = vpop.eup %6690  ;;  %6700 = vpow2.f32 %v2004_v30  ;;  %v2006_v40 = vmul.f32 1.442695, %v1991_v46  ;;  %2009 = vadd.xlane.f32.xlu0 %v2008_v58 }
 0xd94   :  { %v2011_v14 = vsel %vm609_vm4, %v6691_v57, 0.0  ;;  %v2032_v35 = vpack.c.bf16 %v6691_v57, %v6689_v17 }
 0xd95   :  { %v6693_v12 = vpop.eup %6692  ;;  %6702 = vpow2.f32 %v2006_v40  ;;  %2012 = vadd.xlane.f32.xlu1 %v2011_v14 }
 0xd96   :  { %6087 = vmatprep.mubr.msk.bf16.mxu0 %vm609_vm4, %v2032_v35  ;;  %v2014_v4 = vsel %vm609_vm4, %v6693_v12, 0.0 }
 0xd97   :  { %v6695_v42 = vpop.eup %6694  ;;  %2015 = vadd.xlane.f32.xlu0 %v2014_v4 }
 0xd98   :  { %v2033_v24 = vpack.c.bf16 %v6695_v42, %v6693_v12  ;;  %v2017_v6 = vsel %vm609_vm4, %v6695_v42, 0.0 }
 0xd99   :  { %v6697_v39 = vpop.eup %6696  ;;  %2018 = vadd.xlane.f32.xlu1 %v2017_v6 }
 0xd9a   :  { %6088 = vmatmul.mubr.msk.bf16.vlgmr.msra.gmra.mrb[64].mxu0 %vm609_vm4, %v2033_v24  ;;  %v2020_v45 = vsel %vm609_vm4, %v6697_v39, 0.0 }
 0xd9b   :  { %v6699_v5 = vpop.eup %6698  ;;  %6096 = vmatpush3.bf16.xpose.msra.mxu0 %v7671_v38  ;;  %2021 = vadd.xlane.f32.xlu0 %v2020_v45 }
 0xd9c   :  { %6522 = vmatprep.subr.msk.bf16.mxu0 %vm511_vm3, %v7264_v7  ;;  %v2023_v16 = vsel %vm609_vm4, %v6699_v5, 0.0  ;;  %v2034_v32 = vpack.c.bf16 %v6699_v5, %v6697_v39 }
 0xd9d   :  { %v6701_v21 = vpop.eup %6700  ;;  %2024 = vadd.xlane.f32.xlu1 %v2023_v16 }
 0xd9e   :  { %6091 = vmatprep.mubr.msk.bf16.mxu0 %vm609_vm4, %v2034_v32  ;;  %v2026_v60 = vsel %vm609_vm4, %v6701_v21, 0.0 }
 0xd9f   :  { %v6703_v34 = vpop.eup %6702  ;;  %2027 = vadd.xlane.f32.xlu0 %v2026_v60 }
 0xda0   :  { %v2029_v55 = vsel %vm609_vm4, %v6703_v34, 0.0  ;;  %v2035_v31 = vpack.c.bf16 %v6703_v34, %v6701_v21  ;;  %v8839_v21 = vmax.f32 %v7724_v9, 0.0  ;;  %v8840_v34 = vmax.f32 %v7677_v27, 0.0 }
 0xda1   :  { %2030 = vadd.xlane.f32.xlu1 %v2029_v55 }
 0xda2   :  { %6092 = vmatmul.mubr.msk.bf16.gmra.mrb[68].mxu0 %vm609_vm4, %v2035_v31  ;;  %v8841_v31 = vmax.f32 %v7680_v19, 0.0 }
 0xda3   :  { %6098 = vmatpush3.bf16.xpose.msra.mxu0 %v7700_v62 }
 0xda4   :  { %6523 = vmatprep.subr.msk.bf16.mxu0 %vm511_vm3, %v7274_v29 }
 0xdab   :  { %6100 = vmatpush3.bf16.xpose.msra.mxu0 %v7715_v49 }
 0xdac   :  { %6524 = vmatprep.subr.msk.bf16.mxu0 %vm511_vm3, %v7272_v28 }
 0xdb3   :  { %6102 = vmatpush3.bf16.xpose.msra.mxu0 %v7734_v10 }
 0xdb4   :  { %6143 = vmatprep.subr.bf16.mxu0 %v7359_v26 }
 0xe20   :  { %v2010_v37 = vpop.xlane.xlu0 %2009 }
 0xe21   :  { %6704 = vrcp.f32 %v2010_v37 }
 0xe22   :  { %v2013_v59 = vpop.xlane.xlu1 %2012 }
 0xe24   :  { %v2016_v17 = vpop.xlane.xlu0 %2015 }
 0xe25   :  { %6706 = vrcp.f32 %v2016_v17 }
 0xe26   :  { %v2019_v30 = vpop.xlane.xlu1 %2018 }
 0xe27   :  { %6708 = vrcp.f32 %v2019_v30 }
 0xe28   :  { %v2022_v46 = vpop.xlane.xlu0 %2021  ;;  %6710 = vrcp.f32 %v2013_v59  ;;  %v8842_v59 = vmax.f32 %v7721_v51, 0.0 }
 0xe29   :  { %6712 = vrcp.f32 %v2022_v46 }
 0xe2a   :  { %v2025_v58 = vpop.xlane.xlu1 %2024 }
 0xe2b   :  { %v6705_v14 = vpop.eup %6704 }
 0xe2c   :  { %v2028_v57 = vpop.xlane.xlu0 %2027 }
 0xe2d   :  { %6714 = vrcp.f32 %v2028_v57 }
 0xe2e   :  { %v2031_v40 = vpop.xlane.xlu1 %2030 }
 0xe2f   :  { %6716 = vrcp.f32 %v2031_v40  ;;  %v6707_v12 = vpop.eup %6706 }
 0xe30   :  { %6718 = vrcp.f32 %v2025_v58 }
 0xe31   :  { %v6709_v42 = vpop.eup %6708 }
 0xe32   :  { %v6711_v39 = vpop.eup %6710 }
 0xe33   :  { %v6713_v30 = vpop.eup %6712 }
 0xe37   :  { %v6715_v9 = vpop.eup %6714 }
 0xe39   :  { %v6717_v40 = vpop.eup %6716 }
 0xe3a   :  { %v6719_v19 = vpop.eup %6718 }
 0xe6d   :  { %v6089_v35 = vpop.f32.mrb[64].mxu0 }
 0xe6e   :  { %v2082_v4 = vpop.f32.mrb[65].mxu0  ;;  %v2123_v45 = vmul.f32 %v6707_v12, %v6089_v35 }
 0xe6f   :  { %v2121_v24 = vmul.f32 %v6705_v14, %v2082_v4  ;;  %v6090_v6 = vpop.f32.mrb[66].mxu0 }
 0xe70   :  { %v2124_v5 = vmul.f32 %v6709_v42, %v6090_v6  ;;  %v2085_v16 = vpop.f32.mrb[67].mxu0  ;;  %v7835_v17 = vadd.f32 %v2123_v45, %v8842_v59 }
 0xe71   :  { %v2122_v32 = vmul.f32 %v6711_v39, %v2085_v16  ;;  %v7827_v55 = vadd.f32 %v2121_v24, %v8840_v34  ;;  %v8843_v24 = vmax.f32 %v7750_v18, 0.0  ;;  %v8844_v39 = vmax.f32 %v7727_v2, 0.0 }
 0xe72   :  { %v7823_v60 = vadd.f32 %v2124_v5, %v8839_v21  ;;  %v8845_v5 = vmax.f32 %v7730_v52, 0.0 }
 0xe73   :  { %v7831_v37 = vadd.f32 %v2122_v32, %v8841_v31  ;;  %v8846_v32 = vmax.f32 %v7747_v22, 0.0 }
 0xe74   :  { %v2138_v57 = vpack.c.bf16 %v7823_v60, %v7835_v17 }
 0xe75   :  { %v2137_v46 = vpack.c.bf16 %v7831_v37, %v7827_v55  ;;  %v6093_v58 = vpop.f32.mrb[68].mxu0 }
 0xe76   :  { %v2098_v27 = vpop.f32.mrb[69].mxu0  ;;  %v2127_v12 = vmul.f32 %v6715_v9, %v6093_v58 }
 0xe77   :  { %v2125_v14 = vmul.f32 %v6713_v30, %v2098_v27  ;;  %v6094_v35 = vpop.f32.mrb[70].mxu0  ;;  %6103 = vmatprep.mubr.msk.bf16.mxu0 %vm511_vm3, %v2137_v46 }
 0xe78   :  { %v2128_v51 = vmul.f32 %v6717_v40, %v6094_v35  ;;  %v2101_v4 = vpop.f32.mrb[71].mxu0  ;;  %6104 = vmatmul.mubr.msk.bf16.vlgmr.msra.gmra.mrb[72].mxu0 %vm511_vm3, %v2138_v57  ;;  %v7859_v21 = vadd.f32 %v2127_v12, %v8846_v32 }
 0xe79   :  { %v2126_v42 = vmul.f32 %v6719_v19, %v2101_v4  ;;  %6144 = vmatpush3.bf16.msra.mxu0 %v7359_v26  ;;  %v7851_v45 = vadd.f32 %v2125_v14, %v8844_v39 }
 0xe7a   :  { %v7846_v6 = vadd.f32 %v2128_v51, %v8843_v24  ;;  %6145 = vmatprep.subr.bf16.mxu0 %v7356_v13 }
 0xe7b   :  { %v7855_v16 = vadd.f32 %v2126_v42, %v8845_v5 }
 0xe7c   :  { %v2140_v18 = vpack.c.bf16 %v7846_v6, %v7859_v21 }
 0xe7d   :  { %v2139_v34 = vpack.c.bf16 %v7855_v16, %v7851_v45  ;;  %6146 = vmatpush3.bf16.msra.mxu0 %v7356_v13 }
 0xe7e   :  { %6147 = vmatprep.subr.bf16.mxu0 %v7364_v63 }
 0xe7f   :  { %6107 = vmatprep.mubr.msk.bf16.mxu0 %vm511_vm3, %v2139_v34 }
 0xe80   :  { %6108 = vmatmul.mubr.msk.bf16.gmra.mrb[76].mxu0 %vm511_vm3, %v2140_v18 }
 0xe81   :  { %6148 = vmatpush3.bf16.msra.mxu0 %v7364_v63 }
 0xe82   :  { %6149 = vmatprep.subr.bf16.mxu0 %v7362_v61 }
 0xe85   :  { %6150 = vmatpush3.bf16.msra.mxu0 %v7362_v61 }
 0xe86   :  { %6529 = vmatprep.subr.msk.bf16.mxu0 %vm511_vm3, %v7266_v8 }
 0xf4b   :  { %v6105_v2 = vpop.f32.mrb[72].mxu0 }
 0xf4c   :  { %v2187_v52 = vpop.f32.mrb[73].mxu0  ;;  %v2220_v30 = vmul.f32 0.14433756, %v6105_v2 }
 0xf4d   :  { %v2218_v22 = vmul.f32 0.14433756, %v2187_v52  ;;  %v6106_v31 = vpop.f32.mrb[74].mxu0 }
 0xf4e   :  { %v2190_v59 = vpop.f32.mrb[75].mxu0  ;;  %v2221_v9 = vmul.f32 0.14433756, %v6106_v31  ;;  %v2232_v40 = vsel %vm609_vm4, %v2220_v30, -inf }
 0xf4f   :  { %v2219_v46 = vmul.f32 0.14433756, %v2190_v59  ;;  %v2226_v58 = vsel %vm609_vm4, %v2218_v22, -inf }
 0xf50   :  { %2227 = vmax.xlane.f32.xlu0 %v2226_v58  ;;  %v2235_v12 = vsel %vm609_vm4, %v2221_v9, -inf }
 0xf51   :  { %v2229_v57 = vsel %vm609_vm4, %v2219_v46, -inf }
 0xf52   :  { %2230 = vmax.xlane.f32.xlu1 %v2229_v57 }
 0xf53   :  { %v6109_v27 = vpop.f32.mrb[76].mxu0 }
 0xf54   :  { %2233 = vmax.xlane.f32.xlu0 %v2232_v40  ;;  %v2203_v14 = vpop.f32.mrb[77].mxu0  ;;  %v2224_v4 = vmul.f32 0.14433756, %v6109_v27 }
 0xf55   :  { %v2222_v35 = vmul.f32 0.14433756, %v2203_v14  ;;  %v6110_v19 = vpop.f32.mrb[78].mxu0 }
 0xf56   :  { %2236 = vmax.xlane.f32.xlu1 %v2235_v12  ;;  %v2206_v51 = vpop.f32.mrb[79].mxu0  ;;  %v2225_v39 = vmul.f32 0.14433756, %v6110_v19  ;;  %v2244_v32 = vsel %vm609_vm4, %v2224_v4, -inf }
 0xf57   :  { %v2223_v42 = vmul.f32 0.14433756, %v2206_v51  ;;  %v2238_v24 = vsel %vm609_vm4, %v2222_v35, -inf }
 0xf58   :  { %2239 = vmax.xlane.f32.xlu0 %v2238_v24  ;;  %v2247_v34 = vsel %vm609_vm4, %v2225_v39, -inf }
 0xf59   :  { %v2241_v5 = vsel %vm609_vm4, %v2223_v42, -inf }
 0xf5a   :  { %2242 = vmax.xlane.f32.xlu1 %v2241_v5 }
 0xf5c   :  { %2245 = vmax.xlane.f32.xlu0 %v2244_v32 }
 0xf5e   :  { %2248 = vmax.xlane.f32.xlu1 %v2247_v34 }
 0xfdd   :  { %v2228_v18 = vpop.xlane.xlu0 %2227 }
 0xfde   :  { %v2250_v2 = vsub.f32 %v2218_v22, %v2228_v18 }
 0xfdf   :  { %v2231_v52 = vpop.xlane.xlu1 %2230 }
 0xfe0   :  { %v2258_v31 = vmul.f32 1.442695, %v2250_v2  ;;  %v2251_v59 = vsub.f32 %v2219_v46, %v2231_v52 }
 0xfe1   :  { %v2234_v58 = vpop.xlane.xlu0 %2233 }
 0xfe2   :  { %6720 = vpow2.f32 %v2258_v31  ;;  %v2260_v57 = vmul.f32 1.442695, %v2251_v59  ;;  %v2252_v27 = vsub.f32 %v2220_v30, %v2234_v58 }
 0xfe3   :  { %v2237_v40 = vpop.xlane.xlu1 %2236 }
 0xfe4   :  { %6722 = vpow2.f32 %v2260_v57  ;;  %v2262_v14 = vmul.f32 1.442695, %v2252_v27  ;;  %v2253_v19 = vsub.f32 %v2221_v9, %v2237_v40 }
 0xfe5   :  { %v2240_v12 = vpop.xlane.xlu0 %2239 }
 0xfe6   :  { %6724 = vpow2.f32 %v2262_v14  ;;  %v2264_v51 = vmul.f32 1.442695, %v2253_v19  ;;  %v2254_v24 = vsub.f32 %v2222_v35, %v2240_v12 }
 0xfe7   :  { %v2243_v5 = vpop.xlane.xlu1 %2242 }
 0xfe8   :  { %6726 = vpow2.f32 %v2264_v51  ;;  %v2266_v32 = vmul.f32 1.442695, %v2254_v24  ;;  %v2255_v34 = vsub.f32 %v2223_v42, %v2243_v5 }
 0xfe9   :  { %v2246_v22 = vpop.xlane.xlu0 %2245 }
 0xfea   :  { %6728 = vpow2.f32 %v2266_v32  ;;  %v2268_v18 = vmul.f32 1.442695, %v2255_v34  ;;  %v2256_v46 = vsub.f32 %v2224_v4, %v2246_v22 }
 0xfeb   :  { %v2249_v2 = vpop.xlane.xlu1 %2248 }
 0xfec   :  { %v6721_v52 = vpop.eup %6720  ;;  %6730 = vpow2.f32 %v2268_v18  ;;  %v2270_v30 = vmul.f32 1.442695, %v2256_v46  ;;  %v2257_v31 = vsub.f32 %v2225_v39, %v2249_v2 }
 0xfed   :  { %v2274_v59 = vsel %vm609_vm4, %v6721_v52, 0.0 }
 0xfee   :  { %v6723_v9 = vpop.eup %6722  ;;  %6732 = vpow2.f32 %v2270_v30  ;;  %v2272_v58 = vmul.f32 1.442695, %v2257_v31  ;;  %2275 = vadd.xlane.f32.xlu0 %v2274_v59 }
 0xfef   :  { %v2277_v35 = vsel %vm609_vm4, %v6723_v9, 0.0  ;;  %v2298_v57 = vpack.c.bf16 %v6723_v9, %v6721_v52 }
 0xff0   :  { %v6725_v27 = vpop.eup %6724  ;;  %6734 = vpow2.f32 %v2272_v58  ;;  %2278 = vadd.xlane.f32.xlu1 %v2277_v35 }
 0xff1   :  { %6119 = vmatprep.mubr.msk.bf16.mxu1 %vm609_vm4, %v2298_v57  ;;  %v2280_v4 = vsel %vm609_vm4, %v6725_v27, 0.0 }
 0xff2   :  { %v6727_v42 = vpop.eup %6726  ;;  %2281 = vadd.xlane.f32.xlu0 %v2280_v4 }
 0xff3   :  { %v2299_v40 = vpack.c.bf16 %v6727_v42, %v6725_v27  ;;  %v2283_v39 = vsel %vm609_vm4, %v6727_v42, 0.0 }
 0xff4   :  { %v6729_v14 = vpop.eup %6728  ;;  %2284 = vadd.xlane.f32.xlu1 %v2283_v39 }
 0xff5   :  { %6120 = vmatmul.mubr.msk.bf16.vlgmr.msra.gmra.mrb[72].mxu1 %vm609_vm4, %v2299_v40  ;;  %v2286_v19 = vsel %vm609_vm4, %v6729_v14, 0.0 }
 0xff6   :  { %v6731_v12 = vpop.eup %6730  ;;  %6128 = vmatpush3.bf16.xpose.msra.mxu1 %v7671_v38  ;;  %2287 = vadd.xlane.f32.xlu0 %v2286_v19 }
 0xff7   :  { %6526 = vmatprep.subr.msk.bf16.mxu1 %vm511_vm3, %v7264_v7  ;;  %v2289_v51 = vsel %vm609_vm4, %v6731_v12, 0.0  ;;  %v2300_v24 = vpack.c.bf16 %v6731_v12, %v6729_v14 }
 0xff8   :  { %v6733_v5 = vpop.eup %6732  ;;  %2290 = vadd.xlane.f32.xlu1 %v2289_v51 }
 0xff9   :  { %6123 = vmatprep.mubr.msk.bf16.mxu1 %vm609_vm4, %v2300_v24  ;;  %v2292_v32 = vsel %vm609_vm4, %v6733_v5, 0.0 }
 0xffa   :  { %v6735_v34 = vpop.eup %6734  ;;  %2293 = vadd.xlane.f32.xlu0 %v2292_v32 }
 0xffb   :  { %v2295_v22 = vsel %vm609_vm4, %v6735_v34, 0.0  ;;  %v2301_v18 = vpack.c.bf16 %v6735_v34, %v6733_v5 }
 0xffc   :  { %2296 = vadd.xlane.f32.xlu1 %v2295_v22 }
 0xffd   :  { %6124 = vmatmul.mubr.msk.bf16.gmra.mrb[76].mxu1 %vm609_vm4, %v2301_v18 }
 0xffe   :  { %6130 = vmatpush3.bf16.xpose.msra.mxu1 %v7700_v62 }
 0xfff   :  { %6527 = vmatprep.subr.msk.bf16.mxu1 %vm511_vm3, %v7274_v29 }
0x1006   :  { %6132 = vmatpush3.bf16.xpose.msra.mxu1 %v7715_v49 }
0x1007   :  { %6528 = vmatprep.subr.msk.bf16.mxu1 %vm511_vm3, %v7272_v28 }
0x100e   :  { %6134 = vmatpush3.bf16.xpose.msra.mxu1 %v7734_v10 }
0x100f   :  { %6175 = vmatprep.subr.bf16.mxu1 %v7359_v26 }
0x107b   :  { %v2276_v46 = vpop.xlane.xlu0 %2275 }
0x107c   :  { %6736 = vrcp.f32 %v2276_v46 }
0x107d   :  { %v2279_v2 = vpop.xlane.xlu1 %2278 }
0x107f   :  { %v2282_v52 = vpop.xlane.xlu0 %2281 }
0x1080   :  { %6738 = vrcp.f32 %v2282_v52 }
0x1081   :  { %v2285_v30 = vpop.xlane.xlu1 %2284 }
0x1082   :  { %6740 = vrcp.f32 %v2285_v30 }
0x1083   :  { %v2288_v31 = vpop.xlane.xlu0 %2287  ;;  %6742 = vrcp.f32 %v2279_v2 }
0x1084   :  { %6744 = vrcp.f32 %v2288_v31 }
0x1085   :  { %v2291_v59 = vpop.xlane.xlu1 %2290 }
0x1086   :  { %v6737_v35 = vpop.eup %6736 }
0x1087   :  { %v2294_v9 = vpop.xlane.xlu0 %2293 }
0x1088   :  { %6746 = vrcp.f32 %v2294_v9 }
0x1089   :  { %v2297_v58 = vpop.xlane.xlu1 %2296 }
0x108a   :  { %6748 = vrcp.f32 %v2297_v58  ;;  %v6739_v27 = vpop.eup %6738 }
0x108b   :  { %6750 = vrcp.f32 %v2291_v59 }
0x108c   :  { %v6741_v42 = vpop.eup %6740 }
0x108d   :  { %v6743_v14 = vpop.eup %6742 }
0x108e   :  { %v6745_v18 = vpop.eup %6744 }
0x1092   :  { %v6747_v52 = vpop.eup %6746 }
0x1094   :  { %v6749_v31 = vpop.eup %6748 }
0x10c8   :  { %v6121_v57 = vpop.f32.mrb[72].mxu1 }
0x10c9   :  { %v2348_v4 = vpop.f32.mrb[73].mxu1  ;;  %v2389_v19 = vmul.f32 %v6739_v27, %v6121_v57 }
0x10ca   :  { %v2387_v40 = vmul.f32 %v6737_v35, %v2348_v4  ;;  %v6122_v39 = vpop.f32.mrb[74].mxu1 }
0x10cb   :  { %v2390_v12 = vmul.f32 %v6741_v42, %v6122_v39  ;;  %v2351_v51 = vpop.f32.mrb[75].mxu1  ;;  %v7915_v22 = vadd.f32 %v2389_v19, %v7835_v17 }
0x10cc   :  { %v2388_v24 = vmul.f32 %v6743_v14, %v2351_v51  ;;  %v7909_v32 = vadd.f32 %v2387_v40, %v7827_v55 }
0x10cd   :  { %v7906_v5 = vadd.f32 %v2390_v12, %v7823_v60 }
0x10ce   :  { %v7912_v34 = vadd.f32 %v2388_v24, %v7831_v37  ;;  %v6751_v37 = vpop.eup %6750 }
0x10cf   :  { %v2404_v30 = vpack.c.bf16 %v7906_v5, %v7915_v22 }
0x10d0   :  { %v2403_v46 = vpack.c.bf16 %v7912_v34, %v7909_v32  ;;  %v6125_v2 = vpop.f32.mrb[76].mxu1 }
0x10d1   :  { %v2364_v60 = vpop.f32.mrb[77].mxu1  ;;  %v2393_v9 = vmul.f32 %v6747_v52, %v6125_v2 }
0x10d2   :  { %v2391_v59 = vmul.f32 %v6745_v18, %v2364_v60  ;;  %v6126_v55 = vpop.f32.mrb[78].mxu1  ;;  %6135 = vmatprep.mubr.msk.bf16.mxu1 %vm511_vm3, %v2403_v46 }
0x10d3   :  { %v2394_v58 = vmul.f32 %v6749_v31, %v6126_v55  ;;  %v2367_v17 = vpop.f32.mrb[79].mxu1  ;;  %6136 = vmatmul.mubr.msk.bf16.vlgmr.msra.gmra.mrb[80].mxu1 %vm511_vm3, %v2404_v30  ;;  %v7935_v42 = vadd.f32 %v2393_v9, %v7859_v21 }
0x10d4   :  { %v2392_v35 = vmul.f32 %v6751_v37, %v2367_v17  ;;  %6176 = vmatpush3.bf16.msra.mxu1 %v7359_v26  ;;  %v7929_v27 = vadd.f32 %v2391_v59, %v7851_v45 }
0x10d5   :  { %v7925_v57 = vadd.f32 %v2394_v58, %v7846_v6  ;;  %6177 = vmatprep.subr.bf16.mxu1 %v7356_v13 }
0x10d6   :  { %v7932_v4 = vadd.f32 %v2392_v35, %v7855_v16 }
0x10d7   :  { %v2406_v6 = vpack.c.bf16 %v7925_v57, %v7935_v42 }
0x10d8   :  { %v2405_v40 = vpack.c.bf16 %v7932_v4, %v7929_v27  ;;  %6178 = vmatpush3.bf16.msra.mxu1 %v7356_v13 }
0x10d9   :  { %6179 = vmatprep.subr.bf16.mxu1 %v7364_v63 }
0x10da   :  { %6139 = vmatprep.mubr.msk.bf16.mxu1 %vm511_vm3, %v2405_v40 }
0x10db   :  { %6140 = vmatmul.mubr.msk.bf16.gmra.mrb[84].mxu1 %vm511_vm3, %v2406_v6 }
0x10dc   :  { %6180 = vmatpush3.bf16.msra.mxu1 %v7364_v63 }
0x10dd   :  { %6181 = vmatprep.subr.bf16.mxu1 %v7362_v61 }
0x10e0   :  { %6182 = vmatpush3.bf16.msra.mxu1 %v7362_v61 }
0x10e1   :  { %6533 = vmatprep.subr.msk.bf16.mxu1 %vm511_vm3, %v7266_v8 }
0x11a6   :  { %v6137_v45 = vpop.f32.mrb[80].mxu1 }
0x11a7   :  { %v2453_v16 = vpop.f32.mrb[81].mxu1  ;;  %v2486_v19 = vmul.f32 0.14433756, %v6137_v45 }
0x11a8   :  { %v2484_v21 = vmul.f32 0.14433756, %v2453_v16  ;;  %v6138_v39 = vpop.f32.mrb[82].mxu1 }
0x11a9   :  { %v2456_v14 = vpop.f32.mrb[83].mxu1  ;;  %v2487_v24 = vmul.f32 0.14433756, %v6138_v39  ;;  %v2498_v2 = vsel %vm609_vm4, %v2486_v19, -inf }
0x11aa   :  { %v2485_v12 = vmul.f32 0.14433756, %v2456_v14  ;;  %v2492_v51 = vsel %vm609_vm4, %v2484_v21, -inf }
0x11ab   :  { %2493 = vmax.xlane.f32.xlu0 %v2492_v51  ;;  %v2501_v60 = vsel %vm609_vm4, %v2487_v24, -inf }
0x11ac   :  { %v2495_v18 = vsel %vm609_vm4, %v2485_v12, -inf }
0x11ad   :  { %2496 = vmax.xlane.f32.xlu1 %v2495_v18 }
0x11ae   :  { %v6141_v46 = vpop.f32.mrb[84].mxu1 }
0x11af   :  { %2499 = vmax.xlane.f32.xlu0 %v2498_v2  ;;  %v2469_v52 = vpop.f32.mrb[85].mxu1  ;;  %v2490_v59 = vmul.f32 0.14433756, %v6141_v46 }
0x11b0   :  { %v2488_v8 = vmul.f32 0.14433756, %v2469_v52  ;;  %v6142_v30 = vpop.f32.mrb[86].mxu1 }
0x11b1   :  { %2502 = vmax.xlane.f32.xlu1 %v2501_v60  ;;  %v2472_v31 = vpop.f32.mrb[87].mxu1  ;;  %v2491_v9 = vmul.f32 0.14433756, %v6142_v30  ;;  %v2510_v17 = vsel %vm609_vm4, %v2490_v59, -inf }
0x11b2   :  { %v2489_v55 = vmul.f32 0.14433756, %v2472_v31  ;;  %v2504_v37 = vsel %vm609_vm4, %v2488_v8, -inf }
0x11b3   :  { %2505 = vmax.xlane.f32.xlu0 %v2504_v37  ;;  %v2513_v35 = vsel %vm609_vm4, %v2491_v9, -inf }
0x11b4   :  { %v2507_v58 = vsel %vm609_vm4, %v2489_v55, -inf }
0x11b5   :  { %2508 = vmax.xlane.f32.xlu1 %v2507_v58 }
0x11b7   :  { %2511 = vmax.xlane.f32.xlu0 %v2510_v17 }
0x11b9   :  { %2514 = vmax.xlane.f32.xlu1 %v2513_v35 }
0x1238   :  { %v2494_v40 = vpop.xlane.xlu0 %2493 }
0x1239   :  { %v2516_v6 = vsub.f32 %v2484_v21, %v2494_v40 }
0x123a   :  { %v2497_v45 = vpop.xlane.xlu1 %2496 }
0x123b   :  { %v2524_v16 = vmul.f32 1.442695, %v2516_v6  ;;  %v2517_v39 = vsub.f32 %v2485_v12, %v2497_v45 }
0x123c   :  { %v2500_v14 = vpop.xlane.xlu0 %2499 }
0x123d   :  { %6752 = vpow2.f32 %v2524_v16  ;;  %v2526_v51 = vmul.f32 1.442695, %v2517_v39  ;;  %v2518_v18 = vsub.f32 %v2486_v19, %v2500_v14 }
0x123e   :  { %v2503_v46 = vpop.xlane.xlu1 %2502 }
0x123f   :  { %6754 = vpow2.f32 %v2526_v51  ;;  %v2528_v2 = vmul.f32 1.442695, %v2518_v18  ;;  %v2519_v52 = vsub.f32 %v2487_v24, %v2503_v46 }
0x1240   :  { %v2506_v30 = vpop.xlane.xlu0 %2505 }
0x1241   :  { %6756 = vpow2.f32 %v2528_v2  ;;  %v2530_v60 = vmul.f32 1.442695, %v2519_v52  ;;  %v2520_v31 = vsub.f32 %v2488_v8, %v2506_v30 }
0x1242   :  { %v2509_v37 = vpop.xlane.xlu1 %2508 }
0x1243   :  { %6758 = vpow2.f32 %v2530_v60  ;;  %v2532_v58 = vmul.f32 1.442695, %v2520_v31  ;;  %v2521_v17 = vsub.f32 %v2489_v55, %v2509_v37 }
0x1244   :  { %v2512_v21 = vpop.xlane.xlu0 %2511 }
0x1245   :  { %6760 = vpow2.f32 %v2532_v58  ;;  %v2534_v35 = vmul.f32 1.442695, %v2521_v17  ;;  %v2522_v12 = vsub.f32 %v2490_v59, %v2512_v21 }
0x1246   :  { %v2515_v40 = vpop.xlane.xlu1 %2514 }
0x1247   :  { %v6753_v6 = vpop.eup %6752  ;;  %6762 = vpow2.f32 %v2534_v35  ;;  %v2536_v19 = vmul.f32 1.442695, %v2522_v12  ;;  %v2523_v45 = vsub.f32 %v2491_v9, %v2515_v40 }
0x1248   :  { %v2540_v16 = vsel %vm609_vm4, %v6753_v6, 0.0 }
0x1249   :  { %v6755_v24 = vpop.eup %6754  ;;  %6764 = vpow2.f32 %v2536_v19  ;;  %v2538_v39 = vmul.f32 1.442695, %v2523_v45  ;;  %2541 = vadd.xlane.f32.xlu0 %v2540_v16 }
0x124a   :  { %v2543_v8 = vsel %vm609_vm4, %v6755_v24, 0.0  ;;  %v2564_v14 = vpack.c.bf16 %v6755_v24, %v6753_v6 }
0x124b   :  { %v6757_v51 = vpop.eup %6756  ;;  %6766 = vpow2.f32 %v2538_v39  ;;  %2544 = vadd.xlane.f32.xlu1 %v2543_v8 }
0x124c   :  { %6151 = vmatprep.mubr.msk.bf16.mxu0 %vm609_vm4, %v2564_v14  ;;  %v2546_v59 = vsel %vm609_vm4, %v6757_v51, 0.0 }
0x124d   :  { %v6759_v55 = vpop.eup %6758  ;;  %2547 = vadd.xlane.f32.xlu0 %v2546_v59 }
0x124e   :  { %v2565_v18 = vpack.c.bf16 %v6759_v55, %v6757_v51  ;;  %v2549_v9 = vsel %vm609_vm4, %v6759_v55, 0.0 }
0x124f   :  { %v6761_v46 = vpop.eup %6760  ;;  %2550 = vadd.xlane.f32.xlu1 %v2549_v9 }
0x1250   :  { %6152 = vmatmul.mubr.msk.bf16.vlgmr.msra.gmra.mrb[80].mxu0 %vm609_vm4, %v2565_v18  ;;  %v2552_v2 = vsel %vm609_vm4, %v6761_v46, 0.0 }
0x1251   :  { %v6763_v52 = vpop.eup %6762  ;;  %6160 = vmatpush3.bf16.xpose.msra.mxu0 %v7671_v38  ;;  %2553 = vadd.xlane.f32.xlu0 %v2552_v2 }
0x1252   :  { %6530 = vmatprep.subr.msk.bf16.mxu0 %vm511_vm3, %v7264_v7  ;;  %v2555_v30 = vsel %vm609_vm4, %v6763_v52, 0.0  ;;  %v2566_v60 = vpack.c.bf16 %v6763_v52, %v6761_v46 }
0x1253   :  { %v6765_v31 = vpop.eup %6764  ;;  %2556 = vadd.xlane.f32.xlu1 %v2555_v30 }
0x1254   :  { %6155 = vmatprep.mubr.msk.bf16.mxu0 %vm609_vm4, %v2566_v60  ;;  %v2558_v37 = vsel %vm609_vm4, %v6765_v31, 0.0 }
0x1255   :  { %v6767_v58 = vpop.eup %6766  ;;  %2559 = vadd.xlane.f32.xlu0 %v2558_v37 }
0x1256   :  { %v2561_v17 = vsel %vm609_vm4, %v6767_v58, 0.0  ;;  %v2567_v21 = vpack.c.bf16 %v6767_v58, %v6765_v31 }
0x1257   :  { %2562 = vadd.xlane.f32.xlu1 %v2561_v17 }
0x1258   :  { %6156 = vmatmul.mubr.msk.bf16.gmra.mrb[84].mxu0 %vm609_vm4, %v2567_v21 }
0x1259   :  { %6162 = vmatpush3.bf16.xpose.msra.mxu0 %v7700_v62 }
0x125a   :  { %6531 = vmatprep.subr.msk.bf16.mxu0 %vm511_vm3, %v7274_v29 }
0x1261   :  { %6164 = vmatpush3.bf16.xpose.msra.mxu0 %v7715_v49 }
0x1262   :  { %6532 = vmatprep.subr.msk.bf16.mxu0 %vm511_vm3, %v7272_v28 }
0x1269   :  { %6166 = vmatpush3.bf16.xpose.msra.mxu0 %v7734_v10 }
0x126a   :  { %6207 = vmatprep.subr.bf16.mxu0 %v7359_v26 }
0x12d6   :  { %v2542_v35 = vpop.xlane.xlu0 %2541 }
0x12d7   :  { %6768 = vrcp.f32 %v2542_v35 }
0x12d8   :  { %v2545_v12 = vpop.xlane.xlu1 %2544 }
0x12da   :  { %v2548_v40 = vpop.xlane.xlu0 %2547 }
0x12db   :  { %6770 = vrcp.f32 %v2548_v40 }
0x12dc   :  { %v2551_v6 = vpop.xlane.xlu1 %2550 }
0x12dd   :  { %6772 = vrcp.f32 %v2551_v6 }
0x12de   :  { %v2554_v19 = vpop.xlane.xlu0 %2553  ;;  %6774 = vrcp.f32 %v2545_v12 }
0x12df   :  { %6776 = vrcp.f32 %v2554_v19 }
0x12e0   :  { %v2557_v45 = vpop.xlane.xlu1 %2556 }
0x12e1   :  { %v6769_v39 = vpop.eup %6768 }
0x12e2   :  { %v2560_v16 = vpop.xlane.xlu0 %2559 }
0x12e3   :  { %6778 = vrcp.f32 %v2560_v16 }
0x12e4   :  { %v2563_v24 = vpop.xlane.xlu1 %2562 }
0x12e5   :  { %6780 = vrcp.f32 %v2563_v24  ;;  %v6771_v14 = vpop.eup %6770 }
0x12e6   :  { %6782 = vrcp.f32 %v2557_v45 }
0x12e7   :  { %v6773_v59 = vpop.eup %6772 }
0x12e8   :  { %v6775_v9 = vpop.eup %6774 }
0x12e9   :  { %v6777_v17 = vpop.eup %6776 }
0x12ed   :  { %v6779_v12 = vpop.eup %6778 }
0x12ef   :  { %v6781_v6 = vpop.eup %6780 }
0x1323   :  { %v6153_v8 = vpop.f32.mrb[80].mxu0 }
0x1324   :  { %v2614_v51 = vpop.f32.mrb[81].mxu0  ;;  %v2655_v46 = vmul.f32 %v6771_v14, %v6153_v8 }
0x1325   :  { %v2653_v55 = vmul.f32 %v6769_v39, %v2614_v51  ;;  %v6154_v18 = vpop.f32.mrb[82].mxu0 }
0x1326   :  { %v2656_v2 = vmul.f32 %v6773_v59, %v6154_v18  ;;  %v2617_v52 = vpop.f32.mrb[83].mxu0  ;;  %v7991_v58 = vadd.f32 %v2655_v46, %v7915_v22 }
0x1327   :  { %v2654_v30 = vmul.f32 %v6775_v9, %v2617_v52  ;;  %v7985_v31 = vadd.f32 %v2653_v55, %v7909_v32 }
0x1328   :  { %v7982_v60 = vadd.f32 %v2656_v2, %v7906_v5 }
0x1329   :  { %v7988_v37 = vadd.f32 %v2654_v30, %v7912_v34  ;;  %v6783_v34 = vpop.eup %6782 }
0x132a   :  { %v2670_v40 = vpack.c.bf16 %v7982_v60, %v7991_v58 }
0x132b   :  { %v2669_v21 = vpack.c.bf16 %v7988_v37, %v7985_v31  ;;  %v6157_v35 = vpop.f32.mrb[84].mxu0 }
0x132c   :  { %v2630_v5 = vpop.f32.mrb[85].mxu0  ;;  %v2659_v45 = vmul.f32 %v6779_v12, %v6157_v35 }
0x132d   :  { %v2657_v19 = vmul.f32 %v6777_v17, %v2630_v5  ;;  %v6158_v32 = vpop.f32.mrb[86].mxu0  ;;  %6167 = vmatprep.mubr.msk.bf16.mxu0 %vm511_vm3, %v2669_v21 }
0x132e   :  { %v2660_v16 = vmul.f32 %v6781_v6, %v6158_v32  ;;  %v2633_v22 = vpop.f32.mrb[87].mxu0  ;;  %6168 = vmatmul.mubr.msk.bf16.vlgmr.msra.gmra.mrb[88].mxu0 %vm511_vm3, %v2670_v40  ;;  %v8011_v51 = vadd.f32 %v2659_v45, %v7935_v42 }
0x132f   :  { %v2658_v24 = vmul.f32 %v6783_v34, %v2633_v22  ;;  %6208 = vmatpush3.bf16.msra.mxu0 %v7359_v26  ;;  %v8005_v8 = vadd.f32 %v2657_v19, %v7929_v27 }
0x1330   :  { %v8001_v39 = vadd.f32 %v2660_v16, %v7925_v57  ;;  %6209 = vmatprep.subr.bf16.mxu0 %v7356_v13 }
0x1331   :  { %v8008_v14 = vadd.f32 %v2658_v24, %v7932_v4 }
0x1332   :  { %v2672_v26 = vpack.c.bf16 %v8001_v39, %v8011_v51 }
0x1333   :  { %v2671_v59 = vpack.c.bf16 %v8008_v14, %v8005_v8  ;;  %6210 = vmatpush3.bf16.msra.mxu0 %v7356_v13 }
0x1334   :  { %6211 = vmatprep.subr.bf16.mxu0 %v7364_v63 }
0x1335   :  { %6171 = vmatprep.mubr.msk.bf16.mxu0 %vm511_vm3, %v2671_v59 }
0x1336   :  { %6172 = vmatmul.mubr.msk.bf16.gmra.mrb[92].mxu0 %vm511_vm3, %v2672_v26 }
0x1337   :  { %6212 = vmatpush3.bf16.msra.mxu0 %v7364_v63 }
0x1338   :  { %6213 = vmatprep.subr.bf16.mxu0 %v7362_v61 }
0x133b   :  { %6214 = vmatpush3.bf16.msra.mxu0 %v7362_v61 }
0x1401   :  { %v6169_v57 = vpop.f32.mrb[88].mxu0 }
0x1402   :  { %v2719_v27 = vpop.f32.mrb[89].mxu0  ;;  %v2752_v55 = vmul.f32 0.14433756, %v6169_v57 }
0x1403   :  { %v2750_v4 = vmul.f32 0.14433756, %v2719_v27  ;;  %v6170_v42 = vpop.f32.mrb[90].mxu0 }
0x1404   :  { %v2722_v13 = vpop.f32.mrb[91].mxu0  ;;  %v2753_v46 = vmul.f32 0.14433756, %v6170_v42  ;;  %v2764_v63 = vsel %vm609_vm4, %v2752_v55, -inf }
0x1405   :  { %v2751_v18 = vmul.f32 0.14433756, %v2722_v13  ;;  %v2758_v9 = vsel %vm609_vm4, %v2750_v4, -inf }
0x1406   :  { %2759 = vmax.xlane.f32.xlu0 %v2758_v9  ;;  %v2767_v21 = vsel %vm609_vm4, %v2753_v46, -inf }
0x1407   :  { %v2761_v2 = vsel %vm609_vm4, %v2751_v18, -inf }
0x1408   :  { %2762 = vmax.xlane.f32.xlu1 %v2761_v2 }
0x1409   :  { %v6173_v52 = vpop.f32.mrb[92].mxu0 }
0x140a   :  { %2765 = vmax.xlane.f32.xlu0 %v2764_v63  ;;  %v2735_v30 = vpop.f32.mrb[93].mxu0  ;;  %v2756_v12 = vmul.f32 0.14433756, %v6173_v52 }
0x140b   :  { %v2754_v61 = vmul.f32 0.14433756, %v2735_v30  ;;  %v6174_v17 = vpop.f32.mrb[94].mxu0 }
0x140c   :  { %2768 = vmax.xlane.f32.xlu1 %v2767_v21  ;;  %v2738_v35 = vpop.f32.mrb[95].mxu0  ;;  %v2757_v6 = vmul.f32 0.14433756, %v6174_v17  ;;  %v2776_v32 = vsel %vm609_vm4, %v2756_v12, -inf }
0x140d   :  { %v2755_v40 = vmul.f32 0.14433756, %v2738_v35  ;;  %v2770_v5 = vsel %vm609_vm4, %v2754_v61, -inf }
0x140e   :  { %2771 = vmax.xlane.f32.xlu0 %v2770_v5  ;;  %v2779_v34 = vsel %vm609_vm4, %v2757_v6, -inf }
0x140f   :  { %v2773_v19 = vsel %vm609_vm4, %v2755_v40, -inf }
0x1410   :  { %2774 = vmax.xlane.f32.xlu1 %v2773_v19 }
0x1412   :  { %2777 = vmax.xlane.f32.xlu0 %v2776_v32 }
0x1414   :  { %2780 = vmax.xlane.f32.xlu1 %v2779_v34 }
0x1493   :  { %v2760_v45 = vpop.xlane.xlu0 %2759 }
0x1494   :  { %v2782_v16 = vsub.f32 %v2750_v4, %v2760_v45 }
0x1495   :  { %v2763_v22 = vpop.xlane.xlu1 %2762 }
0x1496   :  { %v2790_v24 = vmul.f32 1.442695, %v2782_v16  ;;  %v2783_v59 = vsub.f32 %v2751_v18, %v2763_v22 }
0x1497   :  { %v2766_v26 = vpop.xlane.xlu0 %2765 }
0x1498   :  { %6784 = vpow2.f32 %v2790_v24  ;;  %v2792_v57 = vmul.f32 1.442695, %v2783_v59  ;;  %v2784_v27 = vsub.f32 %v2752_v55, %v2766_v26 }
0x1499   :  { %v2769_v42 = vpop.xlane.xlu1 %2768 }
0x149a   :  { %6786 = vpow2.f32 %v2792_v57  ;;  %v2794_v13 = vmul.f32 1.442695, %v2784_v27  ;;  %v2785_v9 = vsub.f32 %v2753_v46, %v2769_v42 }
0x149b   :  { %v2772_v2 = vpop.xlane.xlu0 %2771 }
0x149c   :  { %6788 = vpow2.f32 %v2794_v13  ;;  %v2796_v52 = vmul.f32 1.442695, %v2785_v9  ;;  %v2786_v63 = vsub.f32 %v2754_v61, %v2772_v2 }
0x149d   :  { %v2775_v30 = vpop.xlane.xlu1 %2774 }
0x149e   :  { %6790 = vpow2.f32 %v2796_v52  ;;  %v2798_v17 = vmul.f32 1.442695, %v2786_v63  ;;  %v2787_v21 = vsub.f32 %v2755_v40, %v2775_v30 }
0x149f   :  { %v2778_v4 = vpop.xlane.xlu0 %2777 }
0x14a0   :  { %6792 = vpow2.f32 %v2798_v17  ;;  %v2800_v35 = vmul.f32 1.442695, %v2787_v21  ;;  %v2788_v18 = vsub.f32 %v2756_v12, %v2778_v4 }
0x14a1   :  { %v2781_v5 = vpop.xlane.xlu1 %2780 }
0x14a2   :  { %v6785_v19 = vpop.eup %6784  ;;  %6794 = vpow2.f32 %v2800_v35  ;;  %v2802_v55 = vmul.f32 1.442695, %v2788_v18  ;;  %v2789_v32 = vsub.f32 %v2757_v6, %v2781_v5 }
0x14a3   :  { %v2806_v34 = vsel %vm609_vm4, %v6785_v19, 0.0 }
0x14a4   :  { %v6787_v46 = vpop.eup %6786  ;;  %6796 = vpow2.f32 %v2802_v55  ;;  %v2804_v45 = vmul.f32 1.442695, %v2789_v32  ;;  %2807 = vadd.xlane.f32.xlu0 %v2806_v34 }
0x14a5   :  { %v2809_v61 = vsel %vm609_vm4, %v6787_v46, 0.0  ;;  %v2830_v16 = vpack.c.bf16 %v6787_v46, %v6785_v19 }
0x14a6   :  { %v6789_v22 = vpop.eup %6788  ;;  %6798 = vpow2.f32 %v2804_v45  ;;  %2810 = vadd.xlane.f32.xlu1 %v2809_v61 }
0x14a7   :  { %6183 = vmatprep.mubr.msk.bf16.mxu1 %vm609_vm4, %v2830_v16  ;;  %v2812_v12 = vsel %vm609_vm4, %v6789_v22, 0.0 }
0x14a8   :  { %v6791_v40 = vpop.eup %6790  ;;  %2813 = vadd.xlane.f32.xlu0 %v2812_v12 }
0x14a9   :  { %v2831_v24 = vpack.c.bf16 %v6791_v40, %v6789_v22  ;;  %v2815_v6 = vsel %vm609_vm4, %v6791_v40, 0.0 }
0x14aa   :  { %v6793_v59 = vpop.eup %6792  ;;  %2816 = vadd.xlane.f32.xlu1 %v2815_v6 }
0x14ab   :  { %6184 = vmatmul.mubr.msk.bf16.vlgmr.msra.gmra.mrb[88].mxu1 %vm609_vm4, %v2831_v24  ;;  %v2818_v26 = vsel %vm609_vm4, %v6793_v59, 0.0 }
0x14ac   :  { %v6795_v57 = vpop.eup %6794  ;;  %6192 = vmatpush3.bf16.xpose.msra.mxu1 %v7671_v38  ;;  %2819 = vadd.xlane.f32.xlu0 %v2818_v26 }
0x14ad   :  { %6534 = vmatprep.subr.msk.bf16.mxu1 %vm511_vm3, %v7264_v7  ;;  %v2821_v27 = vsel %vm609_vm4, %v6795_v57, 0.0  ;;  %v2832_v42 = vpack.c.bf16 %v6795_v57, %v6793_v59 }
0x14ae   :  { %v6797_v13 = vpop.eup %6796  ;;  %2822 = vadd.xlane.f32.xlu1 %v2821_v27 }
0x14af   :  { %6187 = vmatprep.mubr.msk.bf16.mxu1 %vm609_vm4, %v2832_v42  ;;  %v2824_v9 = vsel %vm609_vm4, %v6797_v13, 0.0 }
0x14b0   :  { %v6799_v2 = vpop.eup %6798  ;;  %2825 = vadd.xlane.f32.xlu0 %v2824_v9 }
0x14b1   :  { %v2827_v52 = vsel %vm609_vm4, %v6799_v2, 0.0  ;;  %v2833_v63 = vpack.c.bf16 %v6799_v2, %v6797_v13 }
0x14b2   :  { %2828 = vadd.xlane.f32.xlu1 %v2827_v52 }
0x14b3   :  { %6188 = vmatmul.mubr.msk.bf16.gmra.mrb[92].mxu1 %vm609_vm4, %v2833_v63 }
0x14b4   :  { %6194 = vmatpush3.bf16.xpose.msra.mxu1 %v7700_v62 }
0x14b5   :  { %6535 = vmatprep.subr.msk.bf16.mxu1 %vm511_vm3, %v7274_v29 }
0x14bc   :  { %6196 = vmatpush3.bf16.xpose.msra.mxu1 %v7715_v49 }
0x14bd   :  { %6536 = vmatprep.subr.msk.bf16.mxu1 %vm511_vm3, %v7272_v28 }
0x14c4   :  { %6198 = vmatpush3.bf16.xpose.msra.mxu1 %v7734_v10 }
0x1531   :  { %v2808_v7 = vpop.xlane.xlu0 %2807 }
0x1532   :  { %6800 = vrcp.f32 %v2808_v7 }
0x1533   :  { %v2811_v38 = vpop.xlane.xlu1 %2810 }
0x1535   :  { %v2814_v30 = vpop.xlane.xlu0 %2813 }
0x1536   :  { %6802 = vrcp.f32 %v2814_v30 }
0x1537   :  { %v2817_v17 = vpop.xlane.xlu1 %2816 }
0x1538   :  { %6804 = vrcp.f32 %v2817_v17 }
0x1539   :  { %v2820_v21 = vpop.xlane.xlu0 %2819  ;;  %6806 = vrcp.f32 %v2811_v38 }
0x153a   :  { %6808 = vrcp.f32 %v2820_v21 }
0x153b   :  { %v2823_v4 = vpop.xlane.xlu1 %2822 }
0x153c   :  { %v6801_v29 = vpop.eup %6800 }
0x153d   :  { %v2826_v62 = vpop.xlane.xlu0 %2825 }
0x153e   :  { %6810 = vrcp.f32 %v2826_v62 }
0x153f   :  { %v2829_v35 = vpop.xlane.xlu1 %2828 }
0x1540   :  { %6812 = vrcp.f32 %v2829_v35  ;;  %v6803_v28 = vpop.eup %6802 }
0x1541   :  { %6814 = vrcp.f32 %v2823_v4 }
0x1542   :  { %v6805_v18 = vpop.eup %6804 }
0x1543   :  { %v6807_v55 = vpop.eup %6806 }
0x1544   :  { %v6809_v40 = vpop.eup %6808 }
0x1548   :  { %v6811_v59 = vpop.eup %6810 }
0x154a   :  { %v6813_v57 = vpop.eup %6812 }
0x157e   :  { %v6185_v49 = vpop.f32.mrb[88].mxu1 }
0x157f   :  { %v2880_v10 = vpop.f32.mrb[89].mxu1  ;;  %v2921_v32 = vmul.f32 %v6803_v28, %v6185_v49 }
0x1580   :  { %v2919_v5 = vmul.f32 %v6801_v29, %v2880_v10  ;;  %v6186_v19 = vpop.f32.mrb[90].mxu1 }
0x1581   :  { %v2922_v34 = vmul.f32 %v6805_v18, %v6186_v19  ;;  %v2883_v46 = vpop.f32.mrb[91].mxu1  ;;  %v8064_v12 = vadd.f32 %v2921_v32, %v7991_v58 }
0x1582   :  { %v2920_v45 = vmul.f32 %v6807_v55, %v2883_v46  ;;  %v8058_v16 = vadd.f32 %v2919_v5, %v7985_v31 }
0x1583   :  { %v8055_v61 = vadd.f32 %v2922_v34, %v7982_v60 }
0x1584   :  { %v8061_v22 = vadd.f32 %v2920_v45, %v7988_v37  ;;  %v6815_v37 = vpop.eup %6814 }
0x1585   :  { %v2936_v26 = vpack.c.bf16 %v8055_v61, %v8064_v12 }
0x1586   :  { %v2935_v24 = vpack.c.bf16 %v8061_v22, %v8058_v16  ;;  %v6189_v6 = vpop.f32.mrb[92].mxu1 }
0x1587   :  { %v2896_v60 = vpop.f32.mrb[93].mxu1  ;;  %v2925_v42 = vmul.f32 %v6811_v59, %v6189_v6  ;;  %v1722_v59 = vsel %vm609_vm4, %v7655_v15, 0.0  ;;  %v1737_v15 = vsel %vm609_vm4, %v7687_v11, 0.0 }
0x1588   :  { %v2923_v27 = vmul.f32 %v6809_v40, %v2896_v60  ;;  %v6190_v31 = vpop.f32.mrb[94].mxu1  ;;  %6199 = vmatprep.mubr.msk.bf16.mxu1 %vm511_vm3, %v2935_v24  ;;  %v1728_v60 = vsel %vm609_vm4, %v7661_v1, 0.0  ;;  %v1743_v1 = vsel %vm609_vm4, %v7696_v33, 0.0 }
0x1589   :  { %v2926_v13 = vmul.f32 %v6813_v57, %v6190_v31  ;;  %v2899_v58 = vpop.f32.mrb[95].mxu1  ;;  %6200 = vmatmul.mubr.msk.bf16.vlgmr.msra.gmra.mrb[96].mxu1 %vm511_vm3, %v2936_v26  ;;  %v8082_v7 = vadd.f32 %v2925_v42, %v8011_v51  ;;  %v1725_v26 = vsel %vm609_vm4, %v7657_v54, 0.0  ;;  %v1731_v57 = vsel %vm609_vm4, %v7664_v41, 0.0  ;;  %v3201_v41 = vld [vmem:[%s8816_s1 + $0x60] sm:$0xff] }
0x158a   :  { %v2924_v9 = vmul.f32 %v6815_v37, %v2899_v58  ;;  %v8076_v52 = vadd.f32 %v2923_v27, %v8005_v8  ;;  %v1734_v27 = vsel %vm609_vm4, %v7683_v44, 0.0  ;;  %v1740_v54 = vsel %vm609_vm4, %v7693_v43, 0.0  ;;  %v3202_v44 = vld [vmem:[%s8816_s1 + $0x68] sm:$0xff] }
0x158b   :  { %v8073_v2 = vadd.f32 %v2926_v13, %v8001_v39  ;;  %v8120_v31 = vpack.c.bf16 %v3202_v44, %v3201_v41  ;;  %v3205_v41 = vld [vmem:[%s8816_s1 + $0x80] sm:$0xff]  ;;  %v3206_v44 = vld [vmem:[%s8816_s1 + $0x88] sm:$0xff] }
0x158c   :  { %v8079_v63 = vadd.f32 %v2924_v9, %v8008_v14 }
0x158d   :  { %v2938_v30 = vpack.c.bf16 %v8073_v2, %v8082_v7  ;;  %6223 = vmatprep.subr.bf16.mxu0 %v8120_v31 }
0x158e   :  { %v2937_v38 = vpack.c.bf16 %v8079_v63, %v8076_v52 }
0x1590   :  { %6203 = vmatprep.mubr.msk.bf16.mxu1 %vm511_vm3, %v2937_v38 }
0x1591   :  { %6204 = vmatmul.mubr.msk.bf16.gmra.mrb[100].mxu1 %vm511_vm3, %v2938_v30 }
0x165c   :  { %v6201_v39 = vpop.f32.mrb[96].mxu1 }
0x165d   :  { %v2985_v17 = vpop.f32.mrb[97].mxu1  ;;  %v3018_v14 = vmul.f32 0.14433756, %v6201_v39 }
0x165e   :  { %v3016_v8 = vmul.f32 0.14433756, %v2985_v17  ;;  %v6202_v21 = vpop.f32.mrb[98].mxu1 }
0x165f   :  { %v2988_v4 = vpop.f32.mrb[99].mxu1  ;;  %v3019_v35 = vmul.f32 0.14433756, %v6202_v21  ;;  %v3030_v28 = vsel %vm609_vm4, %v3018_v14, -inf }
0x1660   :  { %v3017_v62 = vmul.f32 0.14433756, %v2988_v4  ;;  %v3024_v51 = vsel %vm609_vm4, %v3016_v8, -inf }
0x1661   :  { %3025 = vmax.xlane.f32.xlu0 %v3024_v51  ;;  %v3033_v19 = vsel %vm609_vm4, %v3019_v35, -inf }
0x1662   :  { %v3027_v29 = vsel %vm609_vm4, %v3017_v62, -inf }
0x1663   :  { %3028 = vmax.xlane.f32.xlu1 %v3027_v29 }
0x1664   :  { %v6205_v49 = vpop.f32.mrb[100].mxu1 }
0x1665   :  { %3031 = vmax.xlane.f32.xlu0 %v3030_v28  ;;  %v3001_v10 = vpop.f32.mrb[101].mxu1  ;;  %v3022_v32 = vmul.f32 0.14433756, %v6205_v49 }
0x1666   :  { %v3020_v18 = vmul.f32 0.14433756, %v3001_v10  ;;  %v6206_v5 = vpop.f32.mrb[102].mxu1 }
0x1667   :  { %3034 = vmax.xlane.f32.xlu1 %v3033_v19  ;;  %v3004_v55 = vpop.f32.mrb[103].mxu1  ;;  %v3023_v45 = vmul.f32 0.14433756, %v6206_v5  ;;  %v3042_v24 = vsel %vm609_vm4, %v3022_v32, -inf }
0x1668   :  { %v3021_v34 = vmul.f32 0.14433756, %v3004_v55  ;;  %v3036_v46 = vsel %vm609_vm4, %v3020_v18, -inf }
0x1669   :  { %3037 = vmax.xlane.f32.xlu0 %v3036_v46  ;;  %v3045_v6 = vsel %vm609_vm4, %v3023_v45, -inf }
0x166a   :  { %v3039_v40 = vsel %vm609_vm4, %v3021_v34, -inf }
0x166b   :  { %3040 = vmax.xlane.f32.xlu1 %v3039_v40 }
0x166d   :  { %3043 = vmax.xlane.f32.xlu0 %v3042_v24 }
0x166f   :  { %3046 = vmax.xlane.f32.xlu1 %v3045_v6 }
0x1671   :  { %1723 = vadd.xlane.f32.xlu0 %v1722_v59 }
0x1673   :  { %1726 = vadd.xlane.f32.xlu1 %v1725_v26 }
0x1675   :  { %1729 = vadd.xlane.f32.xlu0 %v1728_v60 }
0x1677   :  { %1732 = vadd.xlane.f32.xlu1 %v1731_v57 }
0x1679   :  { %1735 = vadd.xlane.f32.xlu0 %v1734_v27 }
0x167b   :  { %1738 = vadd.xlane.f32.xlu1 %v1737_v15 }
0x167d   :  { %1741 = vadd.xlane.f32.xlu0 %v1740_v54 }
0x167f   :  { %1744 = vadd.xlane.f32.xlu1 %v1743_v1 }
0x16ee   :  { %v3026_v11 = vpop.xlane.xlu0 %3025 }
0x16ef   :  { %v3048_v37 = vsub.f32 %v3016_v8, %v3026_v11 }
0x16f0   :  { %v3029_v43 = vpop.xlane.xlu1 %3028 }
0x16f1   :  { %v3056_v42 = vmul.f32 1.442695, %v3048_v37  ;;  %v3049_v13 = vsub.f32 %v3017_v62, %v3029_v43 }
0x16f2   :  { %v3032_v58 = vpop.xlane.xlu0 %3031 }
0x16f3   :  { %6816 = vpow2.f32 %v3056_v42  ;;  %v3058_v33 = vmul.f32 1.442695, %v3049_v13  ;;  %v3050_v9 = vsub.f32 %v3018_v14, %v3032_v58 }
0x16f4   :  { %v3035_v38 = vpop.xlane.xlu1 %3034 }
0x16f5   :  { %6818 = vpow2.f32 %v3058_v33  ;;  %v3060_v30 = vmul.f32 1.442695, %v3050_v9  ;;  %v3051_v39 = vsub.f32 %v3019_v35, %v3035_v38  ;;  %v3209_v33 = vpack.c.bf16 %v3206_v44, %v3205_v41  ;;  %v3365_v41 = vld [vmem:[%s8816_s1 + $0xc8] sm:$0xff] }
0x16f6   :  { %v3038_v17 = vpop.xlane.xlu0 %3037 }
0x16f7   :  { %6820 = vpow2.f32 %v3060_v30  ;;  %v3062_v21 = vmul.f32 1.442695, %v3051_v39  ;;  %v3052_v4 = vsub.f32 %v3020_v18, %v3038_v17 }
0x16f8   :  { %v3041_v51 = vpop.xlane.xlu1 %3040 }
0x16f9   :  { %6822 = vpow2.f32 %v3062_v21  ;;  %v3064_v29 = vmul.f32 1.442695, %v3052_v4  ;;  %v3053_v49 = vsub.f32 %v3021_v34, %v3041_v51 }
0x16fa   :  { %v3044_v8 = vpop.xlane.xlu0 %3043 }
0x16fb   :  { %6824 = vpow2.f32 %v3064_v29  ;;  %v3066_v28 = vmul.f32 1.442695, %v3053_v49  ;;  %v3054_v62 = vsub.f32 %v3022_v32, %v3044_v8  ;;  %v3203_v32 = vld [vmem:[%s8816_s1 + $0x70] sm:$0xff] }
0x16fc   :  { %v3047_v10 = vpop.xlane.xlu1 %3046 }
0x16fd   :  { %v6817_v5 = vpop.eup %6816  ;;  %6826 = vpow2.f32 %v3066_v28  ;;  %v3068_v14 = vmul.f32 1.442695, %v3054_v62  ;;  %v3055_v19 = vsub.f32 %v3023_v45, %v3047_v10  ;;  %v3204_v45 = vld [vmem:[%s8816_s1 + $0x78] sm:$0xff] }
0x16fe   :  { %v1724_v55 = vpop.xlane.xlu0 %1723  ;;  %v3072_v35 = vsel %vm609_vm4, %v6817_v5, 0.0  ;;  %v3208_v54 = vpack.c.bf16 %v3204_v45, %v3203_v32 }
0x16ff   :  { %v6819_v46 = vpop.eup %6818  ;;  %6828 = vpow2.f32 %v3068_v14  ;;  %v3070_v40 = vmul.f32 1.442695, %v3055_v19  ;;  %3073 = vadd.xlane.f32.xlu0 %v3072_v35 }
0x1700   :  { %6830 = vrcp.f32 %v1724_v55  ;;  %v1727_v18 = vpop.xlane.xlu1 %1726  ;;  %v3075_v34 = vsel %vm609_vm4, %v6819_v46, 0.0  ;;  %v3096_v24 = vpack.c.bf16 %v6819_v46, %v6817_v5 }
0x1701   :  { %v6821_v6 = vpop.eup %6820  ;;  %6832 = vpow2.f32 %v3070_v40  ;;  %3076 = vadd.xlane.f32.xlu1 %v3075_v34  ;;  %v8848_v34 = vld [vmem:[#allocation8_spill] sm:$0xff] }
0x1702   :  { %6834 = vrcp.f32 %v1727_v18  ;;  %v1730_v59 = vpop.xlane.xlu0 %1729  ;;  %6215 = vmatprep.mubr.msk.bf16.mxu0 %vm609_vm4, %v3096_v24  ;;  %v3078_v26 = vsel %vm609_vm4, %v6821_v6, 0.0 }
0x1703   :  { %v6823_v60 = vpop.eup %6822  ;;  %6836 = vrcp.f32 %v1730_v59  ;;  %3079 = vadd.xlane.f32.xlu0 %v3078_v26  ;;  %v8851_v59 = vld [vmem:[#allocation5_spill] sm:$0xff] }
0x1704   :  { %v3097_v57 = vpack.c.bf16 %v6823_v60, %v6821_v6  ;;  %v1733_v27 = vpop.xlane.xlu1 %1732  ;;  %v3081_v15 = vsel %vm609_vm4, %v6823_v60, 0.0  ;;  %v3361_v60 = vld [vmem:[%s8816_s1 + $0xa8] sm:$0xff] }
0x1705   :  { %v6825_v1 = vpop.eup %6824  ;;  %6838 = vrcp.f32 %v1733_v27  ;;  %3082 = vadd.xlane.f32.xlu1 %v3081_v15  ;;  %v3362_v27 = vld [vmem:[%s8816_s1 + $0xb0] sm:$0xff]  ;;  %v3363_v15 = vld [vmem:[%s8816_s1 + $0xb8] sm:$0xff] }
0x1706   :  { %v1736_v11 = vpop.xlane.xlu0 %1735  ;;  %6216 = vmatmul.mubr.msk.bf16.vlgmr.msra.gmra.mrb[96].mxu0 %vm609_vm4, %v3097_v57  ;;  %v3084_v37 = vsel %vm609_vm4, %v6825_v1, 0.0 }
0x1707   :  { %v6827_v43 = vpop.eup %6826  ;;  %6840 = vrcp.f32 %v1736_v11  ;;  %3085 = vadd.xlane.f32.xlu0 %v3084_v37  ;;  %6224 = vmatpush3.bf16.msra.mxu0 %v8120_v31 }
0x1708   :  { %v1739_v42 = vpop.xlane.xlu1 %1738  ;;  %v3087_v13 = vsel %vm609_vm4, %v6827_v43, 0.0  ;;  %v3098_v58 = vpack.c.bf16 %v6827_v43, %v6825_v1  ;;  %6225 = vmatprep.subr.bf16.mxu0 %v3208_v54  ;;  %v3364_v1 = vld [vmem:[%s8816_s1 + $0xc0] sm:$0xff] }
0x1709   :  { %v6829_v9 = vpop.eup %6828  ;;  %6842 = vrcp.f32 %v1739_v42  ;;  %3088 = vadd.xlane.f32.xlu1 %v3087_v13  ;;  %v3368_v44 = vpack.c.bf16 %v3365_v41, %v3364_v1 }
0x170a   :  { %v6831_v38 = vpop.eup %6830  ;;  %v1742_v30 = vpop.xlane.xlu0 %1741  ;;  %6219 = vmatprep.mubr.msk.bf16.mxu0 %vm609_vm4, %v3098_v58  ;;  %v3090_v39 = vsel %vm609_vm4, %v6829_v9, 0.0 }
0x170b   :  { %v6833_v17 = vpop.eup %6832  ;;  %6844 = vrcp.f32 %v1742_v30  ;;  %3091 = vadd.xlane.f32.xlu0 %v3090_v39  ;;  %6226 = vmatpush3.bf16.msra.mxu0 %v3208_v54  ;;  %v1835_v31 = vmul.f32 %v6831_v38, %v7776_v23  ;;  %v3367_v54 = vpack.c.bf16 %v3363_v15, %v3362_v27 }
0x170c   :  { %v6835_v21 = vpop.eup %6834  ;;  %v1745_v4 = vpop.xlane.xlu1 %1744  ;;  %v3093_v51 = vsel %vm609_vm4, %v6833_v17, 0.0  ;;  %v3099_v29 = vpack.c.bf16 %v6833_v17, %v6829_v9  ;;  %6227 = vmatprep.subr.bf16.mxu0 %v3209_v33 }
0x170d   :  { %v6837_v49 = vpop.eup %6836  ;;  %6846 = vrcp.f32 %v1745_v4  ;;  %3094 = vadd.xlane.f32.xlu1 %v3093_v51  ;;  %v1836_v8 = vmul.f32 %v6835_v21, %v7780_v0  ;;  %v1843_v10 = vadd.f32 %v1835_v31, %v7606_v53 }
0x170e   :  { %v1837_v28 = vmul.f32 %v6837_v49, %v7774_v36  ;;  %6220 = vmatmul.mubr.msk.bf16.gmra.mrb[100].mxu0 %vm609_vm4, %v3099_v29 }
0x170f   :  { %v6839_v62 = vpop.eup %6838  ;;  %v1844_v23 = vadd.f32 %v1836_v8, %v7609_v25  ;;  %6228 = vmatpush3.bf16.msra.mxu0 %v3209_v33 }
0x1710   :  { %v1838_v5 = vmul.f32 %v6839_v62, %v7778_v47  ;;  %v1845_v55 = vadd.f32 %v1837_v28, %v7612_v50  ;;  %v8847_v47 = vld [vmem:[#allocation6_spill] sm:$0xff] }
0x1711   :  { %v6841_v14 = vpop.eup %6840  ;;  %v3210_v19 = vpack.c.bf16 %v1844_v23, %v1843_v10 }
0x1712   :  { %v1846_v35 = vadd.f32 %v1838_v5, %v7603_v56  ;;  %v1839_v0 = vmul.f32 %v6841_v14, %v7784_v20  ;;  %v8849_v56 = vld [vmem:[#allocation9_spill] sm:$0xff]  ;;  %v8850_v20 = vld [vmem:[#allocation7_spill] sm:$0xff] }
0x1713   :  { %v6843_v46 = vpop.eup %6842  ;;  %6229 = vmatprep.mubr.msk.bf16.mxu0 %vm511_vm3, %v3210_v19 }
0x1714   :  { %v3211_v36 = vpack.c.bf16 %v1846_v35, %v1845_v55  ;;  %v1840_v40 = vmul.f32 %v6843_v46, %v7788_v48  ;;  %v1847_v25 = vadd.f32 %v1839_v0, %v7626_v3  ;;  %v3360_v3 = vld [vmem:[%s8816_s1 + $0xa0] sm:$0xff] }
0x1715   :  { %v6845_v53 = vpop.eup %6844  ;;  %v3366_v57 = vpack.c.bf16 %v3361_v60, %v3360_v3 }
0x1716   :  { %6230 = vmatmul.mubr.msk.bf16.vlgmr.msra.gmra.mrb[104].mxu0 %vm511_vm3, %v3211_v36  ;;  %v1848_v18 = vadd.f32 %v1840_v40, %v8847_v47  ;;  %v1841_v24 = vmul.f32 %v6845_v53, %v8848_v34 }
0x1717   :  { %v6847_v50 = vpop.eup %6846  ;;  %6245 = vmatprep.subr.bf16.mxu1 %v3366_v57 }
0x1718   :  { %v3212_v6 = vpack.c.bf16 %v1848_v18, %v1847_v25  ;;  %v1842_v32 = vmul.f32 %v6847_v50, %v8849_v56  ;;  %v1849_v45 = vadd.f32 %v1841_v24, %v8850_v20  ;;  %6246 = vmatpush3.bf16.msra.mxu1 %v3366_v57  ;;  %v8199_v50 = vld [vmem:[%s8816_s1 + $0x90] ss:$0 sm:$0xff] }
0x1719   :  { %6247 = vmatprep.subr.bf16.mxu1 %v3367_v54 }
0x171a   :  { %6233 = vmatprep.mubr.msk.bf16.mxu0 %vm511_vm3, %v3212_v6  ;;  %v1850_v26 = vadd.f32 %v1842_v32, %v8851_v59 }
0x171c   :  { %v3213_v48 = vpack.c.bf16 %v1850_v26, %v1849_v45  ;;  %6248 = vmatpush3.bf16.msra.mxu1 %v3367_v54 }
0x171d   :  { %6249 = vmatprep.subr.bf16.mxu1 %v3368_v44 }
0x171e   :  { %6234 = vmatmul.mubr.msk.bf16.gmra.mrb[108].mxu0 %vm511_vm3, %v3213_v48 }
0x1720   :  { %6250 = vmatpush3.bf16.msra.mxu1 %v3368_v44 }
0x178c   :  { %v3074_v11 = vpop.xlane.xlu0 %3073 }
0x178e   :  { %v3077_v37 = vpop.xlane.xlu1 %3076 }
0x1790   :  { %v3080_v43 = vpop.xlane.xlu0 %3079 }
0x1791   :  { %6848 = vrcp.f32 %v3080_v43 }
0x1792   :  { %v3083_v42 = vpop.xlane.xlu1 %3082  ;;  %6850 = vrcp.f32 %v3074_v11 }
0x1793   :  { %6852 = vrcp.f32 %v3083_v42 }
0x1794   :  { %v3086_v13 = vpop.xlane.xlu0 %3085  ;;  %6854 = vrcp.f32 %v3077_v37 }
0x1796   :  { %v3089_v58 = vpop.xlane.xlu1 %3088 }
0x1798   :  { %v3092_v33 = vpop.xlane.xlu0 %3091 }
0x1799   :  { %6856 = vrcp.f32 %v3092_v33 }
0x179a   :  { %v3095_v9 = vpop.xlane.xlu1 %3094  ;;  %6858 = vrcp.f32 %v3086_v13 }
0x179b   :  { %v6849_v38 = vpop.eup %6848  ;;  %6860 = vrcp.f32 %v3095_v9 }
0x179c   :  { %v6851_v39 = vpop.eup %6850  ;;  %6862 = vrcp.f32 %v3089_v58 }
0x179d   :  { %v6853_v21 = vpop.eup %6852 }
0x179e   :  { %v6855_v29 = vpop.eup %6854 }
0x17a3   :  { %v6857_v19 = vpop.eup %6856 }
0x17a4   :  { %v6859_v0 = vpop.eup %6858 }
0x17a5   :  { %v6861_v40 = vpop.eup %6860 }
0x17a6   :  { %v6863_v47 = vpop.eup %6862 }
0x17d9   :  { %v6217_v30 = vpop.f32.mrb[96].mxu0 }
0x17da   :  { %v3187_v17 = vmul.f32 %v6849_v38, %v6217_v30  ;;  %v3146_v31 = vpop.f32.mrb[97].mxu0  ;;  %v3519_v30 = vld [vmem:[%s8816_s1 + $0xe0] sm:$0xff] }
0x17db   :  { %v3185_v4 = vmul.f32 %v6851_v39, %v3146_v31  ;;  %v6218_v51 = vpop.f32.mrb[98].mxu0  ;;  %v3520_v39 = vld [vmem:[%s8816_s1 + $0xe8] sm:$0xff]  ;;  %v3521_v31 = vld [vmem:[%s8816_s1 + $0xf0] sm:$0xff] }
0x17dc   :  { %v3188_v49 = vmul.f32 %v6853_v21, %v6218_v51  ;;  %v3149_v8 = vpop.f32.mrb[99].mxu0  ;;  %v3195_v62 = vadd.f32 %v3187_v17, %v8064_v12  ;;  %v3523_v17 = vpack.c.bf16 %v3520_v39, %v3519_v30  ;;  %v3522_v21 = vld [vmem:[%s8816_s1 + $0xf8] sm:$0xff] }
0x17dd   :  { %v3186_v28 = vmul.f32 %v6855_v29, %v3149_v8  ;;  %v3193_v23 = vadd.f32 %v3185_v4, %v8058_v16  ;;  %v3524_v4 = vpack.c.bf16 %v3522_v21, %v3521_v31  ;;  %v3677_v30 = vld [vmem:[%s8816_s1 + $0x118] sm:$0xff] }
0x17de   :  { %v3196_v10 = vadd.f32 %v3188_v49, %v8055_v61  ;;  %6267 = vmatprep.subr.bf16.mxu0 %v3523_v17 }
0x17df   :  { %v3194_v5 = vadd.f32 %v3186_v28, %v8061_v22  ;;  %6268 = vmatpush3.bf16.msra.mxu0 %v3523_v17 }
0x17e0   :  { %v3215_v14 = vpack.c.bf16 %v3196_v10, %v3195_v62  ;;  %6269 = vmatprep.subr.bf16.mxu0 %v3524_v4 }
0x17e1   :  { %v3214_v55 = vpack.c.bf16 %v3194_v5, %v3193_v23  ;;  %v6221_v35 = vpop.f32.mrb[100].mxu0 }
0x17e2   :  { %v3191_v46 = vmul.f32 %v6857_v19, %v6221_v35  ;;  %v3162_v36 = vpop.f32.mrb[101].mxu0 }
0x17e3   :  { %v3189_v53 = vmul.f32 %v6859_v0, %v3162_v36  ;;  %v6222_v25 = vpop.f32.mrb[102].mxu0  ;;  %6237 = vmatprep.mubr.msk.bf16.mxu0 %vm511_vm3, %v3214_v55  ;;  %6270 = vmatpush3.bf16.msra.mxu0 %v3524_v4 }
0x17e4   :  { %v3192_v12 = vmul.f32 %v6861_v40, %v6222_v25  ;;  %v3165_v18 = vpop.f32.mrb[103].mxu0  ;;  %6238 = vmatmul.mubr.msk.bf16.gmra.mrb[112].mxu0 %vm511_vm3, %v3215_v14  ;;  %v3199_v16 = vadd.f32 %v3191_v46, %v8082_v7 }
0x17e5   :  { %v3190_v61 = vmul.f32 %v6863_v47, %v3165_v18  ;;  %v3197_v34 = vadd.f32 %v3189_v53, %v8076_v52 }
0x17e6   :  { %v3200_v22 = vadd.f32 %v3192_v12, %v8073_v2 }
0x17e7   :  { %v3198_v24 = vadd.f32 %v3190_v61, %v8079_v63 }
0x17e8   :  { %v3217_v6 = vpack.c.bf16 %v3200_v22, %v3199_v16 }
0x17e9   :  { %v3216_v56 = vpack.c.bf16 %v3198_v24, %v3197_v34  ;;  %v6231_v32 = vpop.f32.mrb[104].mxu0  ;;  %v8240_v24 = vld [vmem:[%s8816_s1 + $0xd0] ss:$0 sm:$0xff] }
0x17ea   :  { %v3290_v20 = vadd.f32 %v6231_v32, %v8199_v50  ;;  %v3281_v45 = vpop.f32.mrb[105].mxu0 }
0x17eb   :  { %v3282_v59 = vadd.f32 %v8199_v50, %v3281_v45  ;;  %v6232_v7 = vpop.f32.mrb[106].mxu0  ;;  %6241 = vmatprep.mubr.msk.bf16.mxu0 %vm511_vm3, %v3216_v56 }
0x17ec   :  { %v3293_v2 = vadd.f32 %v6232_v7, %v8199_v50  ;;  %v3284_v52 = vpop.f32.mrb[107].mxu0  ;;  %6242 = vmatmul.mubr.msk.bf16.gmra.mrb[116].mxu0 %vm511_vm3, %v3217_v6  ;;  %v3346_v26 = vmax.f32 %v3290_v20, 0.0 }
0x17ed   :  { %v3285_v63 = vadd.f32 %v8199_v50, %v3284_v52  ;;  %v3344_v3 = vmax.f32 %v3282_v59, 0.0 }
0x17ee   :  { %v3347_v48 = vmax.f32 %v3293_v2, 0.0 }
0x17ef   :  { %v3345_v60 = vmax.f32 %v3285_v63, 0.0 }
0x17f0   :  { %v3370_v57 = vpack.c.bf16 %v3347_v48, %v3346_v26 }
0x17f1   :  { %v3369_v27 = vpack.c.bf16 %v3345_v60, %v3344_v3  ;;  %v6235_v15 = vpop.f32.mrb[108].mxu0 }
0x17f2   :  { %v3306_v54 = vadd.f32 %v6235_v15, %v8199_v50  ;;  %v3297_v1 = vpop.f32.mrb[109].mxu0 }
0x17f3   :  { %v3298_v41 = vadd.f32 %v8199_v50, %v3297_v1  ;;  %v6236_v44 = vpop.f32.mrb[110].mxu0  ;;  %6251 = vmatprep.mubr.msk.bf16.mxu1 %vm511_vm3, %v3369_v27 }
0x17f4   :  { %v3309_v11 = vadd.f32 %v6236_v44, %v8199_v50  ;;  %v3300_v37 = vpop.f32.mrb[111].mxu0  ;;  %6252 = vmatmul.mubr.msk.bf16.vlgmr.msra.gmra.mrb[104].mxu1 %vm511_vm3, %v3370_v57  ;;  %v3350_v42 = vmax.f32 %v3306_v54, 0.0 }
0x17f5   :  { %v3301_v43 = vadd.f32 %v8199_v50, %v3300_v37  ;;  %v3348_v58 = vmax.f32 %v3298_v41, 0.0 }
0x17f6   :  { %v3351_v13 = vmax.f32 %v3309_v11, 0.0 }
0x17f7   :  { %v3349_v33 = vmax.f32 %v3301_v43, 0.0 }
0x17f8   :  { %v3372_v9 = vpack.c.bf16 %v3351_v13, %v3350_v42 }
0x17f9   :  { %v3371_v38 = vpack.c.bf16 %v3349_v33, %v3348_v58 }
0x17fb   :  { %6255 = vmatprep.mubr.msk.bf16.mxu1 %vm511_vm3, %v3371_v38  ;;  %v3676_v38 = vld [vmem:[%s8816_s1 + $0x110] sm:$0xff] }
0x17fc   :  { %6256 = vmatmul.mubr.msk.bf16.gmra.mrb[108].mxu1 %vm511_vm3, %v3372_v9  ;;  %v3678_v39 = vpack.c.bf16 %v3677_v30, %v3676_v38 }
0x17fe   :  { %6287 = vmatprep.subr.bf16.mxu1 %v3678_v39 }
0x17ff   :  { %6288 = vmatpush3.bf16.msra.mxu1 %v3678_v39 }
0x18b7   :  { %v6239_v51 = vpop.f32.mrb[112].mxu0 }
0x18b8   :  { %v3322_v29 = vadd.f32 %v6239_v51, %v8199_v50  ;;  %v3313_v49 = vpop.f32.mrb[113].mxu0 }
0x18b9   :  { %v3314_v8 = vadd.f32 %v8199_v50, %v3313_v49  ;;  %v6240_v28 = vpop.f32.mrb[114].mxu0 }
0x18ba   :  { %v3325_v62 = vadd.f32 %v6240_v28, %v8199_v50  ;;  %v3316_v10 = vpop.f32.mrb[115].mxu0  ;;  %v3354_v5 = vmax.f32 %v3322_v29, 0.0 }
0x18bb   :  { %v3317_v23 = vadd.f32 %v8199_v50, %v3316_v10  ;;  %v3352_v19 = vmax.f32 %v3314_v8, 0.0 }
0x18bc   :  { %v3355_v14 = vmax.f32 %v3325_v62, 0.0 }
0x18bd   :  { %v3353_v55 = vmax.f32 %v3317_v23, 0.0 }
0x18be   :  { %v3374_v35 = vpack.c.bf16 %v3355_v14, %v3354_v5 }
0x18bf   :  { %v3373_v0 = vpack.c.bf16 %v3353_v55, %v3352_v19  ;;  %v6243_v46 = vpop.f32.mrb[116].mxu0 }
0x18c0   :  { %v3338_v36 = vadd.f32 %v6243_v46, %v8199_v50  ;;  %v3329_v40 = vpop.f32.mrb[117].mxu0 }
0x18c1   :  { %v3330_v53 = vadd.f32 %v8199_v50, %v3329_v40  ;;  %v6244_v25 = vpop.f32.mrb[118].mxu0  ;;  %6259 = vmatprep.mubr.msk.bf16.mxu1 %vm511_vm3, %v3373_v0 }
0x18c2   :  { %v3341_v47 = vadd.f32 %v6244_v25, %v8199_v50  ;;  %v3332_v12 = vpop.f32.mrb[119].mxu0  ;;  %6260 = vmatmul.mubr.msk.bf16.gmra.mrb[112].mxu1 %vm511_vm3, %v3374_v35  ;;  %v3358_v61 = vmax.f32 %v3338_v36, 0.0 }
0x18c3   :  { %v3333_v18 = vadd.f32 %v8199_v50, %v3332_v12  ;;  %v3356_v22 = vmax.f32 %v3330_v53, 0.0 }
0x18c4   :  { %v3359_v16 = vmax.f32 %v3341_v47, 0.0 }
0x18c5   :  { %v3357_v34 = vmax.f32 %v3333_v18, 0.0 }
0x18c6   :  { %v3376_v6 = vpack.c.bf16 %v3359_v16, %v3358_v61  ;;  %v8275_v61 = vld [vmem:[%s8816_s1 + $0x100] ss:$0 sm:$0xff] }
0x18c7   :  { %v3375_v56 = vpack.c.bf16 %v3357_v34, %v3356_v22  ;;  %v6253_v32 = vpop.f32.mrb[104].mxu1 }
0x18c8   :  { %v3449_v20 = vadd.f32 %v6253_v32, %v8240_v24  ;;  %v3440_v45 = vpop.f32.mrb[105].mxu1 }
0x18c9   :  { %v3441_v59 = vadd.f32 %v8240_v24, %v3440_v45  ;;  %v6254_v7 = vpop.f32.mrb[106].mxu1  ;;  %6263 = vmatprep.mubr.msk.bf16.mxu1 %vm511_vm3, %v3375_v56 }
0x18ca   :  { %v3452_v50 = vadd.f32 %v6254_v7, %v8240_v24  ;;  %v3443_v2 = vpop.f32.mrb[107].mxu1  ;;  %6264 = vmatmul.mubr.msk.bf16.gmra.mrb[116].mxu1 %vm511_vm3, %v3376_v6  ;;  %v3505_v63 = vmax.f32 %v3449_v20, 0.0 }
0x18cb   :  { %v3444_v52 = vadd.f32 %v8240_v24, %v3443_v2  ;;  %v3503_v48 = vmax.f32 %v3441_v59, 0.0 }
0x18cc   :  { %v3506_v26 = vmax.f32 %v3452_v50, 0.0 }
0x18cd   :  { %v3504_v3 = vmax.f32 %v3444_v52, 0.0 }
0x18ce   :  { %v3526_v60 = vpack.c.bf16 %v3506_v26, %v3505_v63 }
0x18cf   :  { %v3525_v57 = vpack.c.bf16 %v3504_v3, %v3503_v48  ;;  %v6257_v27 = vpop.f32.mrb[108].mxu1 }
0x18d0   :  { %v3465_v15 = vadd.f32 %v6257_v27, %v8240_v24  ;;  %v3456_v54 = vpop.f32.mrb[109].mxu1 }
0x18d1   :  { %v3457_v1 = vadd.f32 %v8240_v24, %v3456_v54  ;;  %v6258_v41 = vpop.f32.mrb[110].mxu1  ;;  %6271 = vmatprep.mubr.msk.bf16.mxu0 %vm3538_vm5, %v3525_v57 }
0x18d2   :  { %v3468_v44 = vadd.f32 %v6258_v41, %v8240_v24  ;;  %v3459_v11 = vpop.f32.mrb[111].mxu1  ;;  %6272 = vmatmul.mubr.msk.bf16.vlgmr.msra.gmra.mrb[120].mxu0 %vm3538_vm5, %v3526_v60  ;;  %v3509_v43 = vmax.f32 %v3465_v15, 0.0 }
0x18d3   :  { %v3460_v37 = vadd.f32 %v8240_v24, %v3459_v11  ;;  %v3507_v13 = vmax.f32 %v3457_v1, 0.0 }
0x18d4   :  { %v3510_v42 = vmax.f32 %v3468_v44, 0.0 }
0x18d5   :  { %v3508_v58 = vmax.f32 %v3460_v37, 0.0 }
0x18d6   :  { %v3528_v33 = vpack.c.bf16 %v3510_v42, %v3509_v43 }
0x18d7   :  { %v3527_v9 = vpack.c.bf16 %v3508_v58, %v3507_v13  ;;  %v6985_v13 = vmov 0   ;;  %v6986_v58 = vmov 0.0  }
0x18d8   :  { %6543 = vset.pattern.permute.xlu1 %v6985_v13  ;;  %6542 = vset.pattern.permute.xlu0 %v6985_v13 }
0x18d9   :  { %6275 = vmatprep.mubr.msk.bf16.mxu0 %vm3538_vm5, %v3527_v9  ;;  %6341 = vmatprep.subr.bf16.mxu1 %v6986_v58 }
0x18da   :  { %6276 = vmatmul.mubr.msk.bf16.gmra.mrb[124].mxu0 %vm3538_vm5, %v3528_v33 }
0x1995   :  { %v6261_v17 = vpop.f32.mrb[112].mxu1 }
0x1996   :  { %v3481_v31 = vadd.f32 %v6261_v17, %v8240_v24  ;;  %v3472_v21 = vpop.f32.mrb[113].mxu1 }
0x1997   :  { %v3473_v4 = vadd.f32 %v8240_v24, %v3472_v21  ;;  %v6262_v51 = vpop.f32.mrb[114].mxu1 }
0x1998   :  { %v3484_v29 = vadd.f32 %v6262_v51, %v8240_v24  ;;  %v3475_v49 = vpop.f32.mrb[115].mxu1  ;;  %v3513_v28 = vmax.f32 %v3481_v31, 0.0 }
0x1999   :  { %v3476_v8 = vadd.f32 %v8240_v24, %v3475_v49  ;;  %v3511_v10 = vmax.f32 %v3473_v4, 0.0 }
0x199a   :  { %v3514_v62 = vmax.f32 %v3484_v29, 0.0 }
0x199b   :  { %v3512_v23 = vmax.f32 %v3476_v8, 0.0 }
0x199c   :  { %v3530_v5 = vpack.c.bf16 %v3514_v62, %v3513_v28 }
0x199d   :  { %v3529_v14 = vpack.c.bf16 %v3512_v23, %v3511_v10  ;;  %v6265_v19 = vpop.f32.mrb[116].mxu1 }
0x199e   :  { %v3497_v55 = vadd.f32 %v6265_v19, %v8240_v24  ;;  %v3488_v35 = vpop.f32.mrb[117].mxu1 }
0x199f   :  { %v3489_v0 = vadd.f32 %v8240_v24, %v3488_v35  ;;  %v6266_v46 = vpop.f32.mrb[118].mxu1  ;;  %6279 = vmatprep.mubr.msk.bf16.mxu0 %vm3538_vm5, %v3529_v14 }
0x19a0   :  { %v3500_v36 = vadd.f32 %v6266_v46, %v8240_v24  ;;  %v3491_v40 = vpop.f32.mrb[119].mxu1  ;;  %6280 = vmatmul.mubr.msk.bf16.gmra.mrb[128].mxu0 %vm3538_vm5, %v3530_v5  ;;  %v3517_v25 = vmax.f32 %v3497_v55, 0.0 }
0x19a1   :  { %v3492_v53 = vadd.f32 %v8240_v24, %v3491_v40  ;;  %v3515_v12 = vmax.f32 %v3489_v0, 0.0 }
0x19a2   :  { %v3518_v47 = vmax.f32 %v3500_v36, 0.0 }
0x19a3   :  { %v3516_v18 = vmax.f32 %v3492_v53, 0.0  ;;  %v8302_v53 = vstv %s3687_s22 }
0x19a4   :  { %v3532_v16 = vpack.c.bf16 %v3518_v47, %v3517_v25 }
0x19a5   :  { %v3531_v22 = vpack.c.bf16 %v3516_v18, %v3515_v12  ;;  %v6273_v34 = vpop.f32.mrb[120].mxu0 }
0x19a6   :  { %v3606_v6 = vadd.f32 %v6273_v34, %v8275_v61  ;;  %v3597_v56 = vpop.f32.mrb[121].mxu0 }
0x19a7   :  { %v3598_v32 = vadd.f32 %v8275_v61, %v3597_v56  ;;  %v6274_v20 = vpop.f32.mrb[122].mxu0  ;;  %6283 = vmatprep.mubr.msk.bf16.mxu0 %vm3538_vm5, %v3531_v22 }
0x19a8   :  { %v3609_v24 = vadd.f32 %v6274_v20, %v8275_v61  ;;  %v3600_v45 = vpop.f32.mrb[123].mxu0  ;;  %6284 = vmatmul.mubr.msk.bf16.gmra.mrb[132].mxu0 %vm3538_vm5, %v3532_v16  ;;  %v3662_v7 = vmax.f32 %v3606_v6, 0.0 }
0x19a9   :  { %v3601_v59 = vadd.f32 %v8275_v61, %v3600_v45  ;;  %v3660_v2 = vmax.f32 %v3598_v32, 0.0 }
0x19aa   :  { %v3663_v50 = vmax.f32 %v3609_v24, 0.0 }
0x19ab   :  { %v3661_v52 = vmax.f32 %v3601_v59, 0.0 }
0x19ac   :  { %v3680_v63 = vpack.c.bf16 %v3663_v50, %v3662_v7 }
0x19ad   :  { %v3679_v26 = vpack.c.bf16 %v3661_v52, %v3660_v2  ;;  %v6277_v48 = vpop.f32.mrb[124].mxu0 }
0x19ae   :  { %v3622_v3 = vadd.f32 %v6277_v48, %v8275_v61  ;;  %v3613_v60 = vpop.f32.mrb[125].mxu0 }
0x19af   :  { %v3614_v57 = vadd.f32 %v8275_v61, %v3613_v60  ;;  %v6278_v27 = vpop.f32.mrb[126].mxu0  ;;  %6289 = vmatprep.mubr.msk.bf16.mxu1 %vm3689_vm6, %v3679_v26 }
0x19b0   :  { %v3625_v15 = vadd.f32 %v6278_v27, %v8275_v61  ;;  %v3616_v54 = vpop.f32.mrb[127].mxu0  ;;  %6290 = vmatmul.mubr.msk.bf16.vlgmr.msra.gmra.mrb[120].mxu1 %vm3689_vm6, %v3680_v63  ;;  %v3666_v41 = vmax.f32 %v3622_v3, 0.0 }
0x19b1   :  { %v3617_v1 = vadd.f32 %v8275_v61, %v3616_v54  ;;  %v3664_v11 = vmax.f32 %v3614_v57, 0.0  ;;  %v4191_v54 = vld [vmem:[%s8816_s1 + $0x128] sm:$0xff] }
0x19b2   :  { %v3667_v44 = vmax.f32 %v3625_v15, 0.0  ;;  %v4190_v15 = vld [vmem:[%s8816_s1 + $0x120] sm:$0xff] }
0x19b3   :  { %v3665_v37 = vmax.f32 %v3617_v1, 0.0  ;;  %v8320_v1 = vpack.c.bf16 %v4191_v54, %v4190_v15  ;;  %v4201_v15 = vld [vmem:[%s8816_s1 + $0x178] sm:$0xff]  ;;  %v4202_v54 = vld [vmem:[%s8816_s1 + $0x180] sm:$0xff] }
0x19b4   :  { %v3682_v43 = vpack.c.bf16 %v3667_v44, %v3666_v41  ;;  %v3827_v41 = vlaneseq }
0x19b5   :  { %v3681_v42 = vpack.c.bf16 %v3665_v37, %v3664_v11  ;;  %6313 = vmatprep.mubr.msk.bf16.mxu0 %vm609_vm4, %v8320_v1 }
0x19b6   :  { %v8324_v44 = vshrl.u32 %v3827_v41, 7 }
0x19b7   :  { %6293 = vmatprep.mubr.msk.bf16.mxu1 %vm3689_vm6, %v3681_v42  ;;  %v8329_v42 = vand.u32 127, %v3827_v41  ;;  %v4203_v41 = vld [vmem:[%s8816_s1 + $0x188] sm:$0xff] }
0x19b8   :  { %6294 = vmatmul.mubr.msk.bf16.gmra.mrb[124].mxu1 %vm3689_vm6, %v3682_v43  ;;  %v3831_v11 = vadd.s32 24, %v8324_v44  ;;  %v3829_v37 = vadd.s32 8, %v8324_v44  ;;  %v3830_v43 = vadd.s32 16, %v8324_v44  ;;  %v3850_v13 = vand.u32 7, %v8324_v44 }
0x19ba   :  { %vm4038_vm7 = vcmp.eq.s32.totalorder %v3850_v13, %v8329_v42  ;;  %v4205_v13 = vld [vmem:[%s8816_s1 + $0x198] sm:$0xff] }
0x1a73   :  { %v6281_v33 = vpop.f32.mrb[128].mxu0 }
0x1a74   :  { %v3638_v9 = vadd.f32 %v6281_v33, %v8275_v61  ;;  %v3629_v38 = vpop.f32.mrb[129].mxu0  ;;  %v3871_v33 = vand.u32 7, %v3831_v11 }
0x1a75   :  { %v3630_v30 = vadd.f32 %v8275_v61, %v3629_v38  ;;  %v6282_v39 = vpop.f32.mrb[130].mxu0 }
0x1a76   :  { %v3641_v17 = vadd.f32 %v6282_v39, %v8275_v61  ;;  %v3632_v31 = vpop.f32.mrb[131].mxu0  ;;  %v3670_v4 = vmax.f32 %v3638_v9, 0.0  ;;  %v3857_v9 = vand.u32 7, %v3829_v37  ;;  %vm4041_vm8 = vcmp.eq.s32.totalorder %v3871_v33, %v8329_v42  ;;  %v4206_v33 = vld [vmem:[%s8816_s1 + $0x1a0] sm:$0xff] }
0x1a77   :  { %v3633_v21 = vadd.f32 %v8275_v61, %v3632_v31  ;;  %v3668_v29 = vmax.f32 %v3630_v30, 0.0  ;;  %v3864_v30 = vand.u32 7, %v3830_v43  ;;  %v8407_v37 = vpack.c.bf16 %v4203_v41, %v4202_v54  ;;  %v4204_v43 = vld [vmem:[%s8816_s1 + $0x190] sm:$0xff] }
0x1a78   :  { %v3671_v51 = vmax.f32 %v3641_v17, 0.0  ;;  %vm4039_vm9 = vcmp.eq.s32.totalorder %v3857_v9, %v8329_v42  ;;  %v5440_v17 = vsel %vm4038_vm7, 1.0, %v6986_v58  ;;  %v4207_v9 = vld [vmem:[%s8816_s1 + $0x1a8] sm:$0xff]  ;;  %v3837_v54 = vadd.s32 72, %v8324_v44 }
0x1a79   :  { %v3669_v49 = vmax.f32 %v3633_v21, 0.0  ;;  %vm4040_vm10 = vcmp.eq.s32.totalorder %v3864_v30, %v8329_v42  ;;  %v5443_v21 = vsel %vm4041_vm8, 1.0, %v6986_v58  ;;  %v8427_v30 = vpack.c.bf16 %v4207_v9, %v4206_v33 }
0x1a7a   :  { %v3684_v8 = vpack.c.bf16 %v3671_v51, %v3670_v4  ;;  %v5441_v4 = vsel %vm4039_vm9, 1.0, %v6986_v58  ;;  %v3832_v51 = vadd.s32 32, %v8324_v44  ;;  %vm4446_vm8 = vcmask 64512  }
0x1a7b   :  { %v3683_v28 = vpack.c.bf16 %v3669_v49, %v3668_v29  ;;  %v6285_v62 = vpop.f32.mrb[132].mxu0  ;;  %v3833_v29 = vadd.s32 40, %v8324_v44  ;;  %v5442_v49 = vsel %vm4040_vm10, 1.0, %v6986_v58 }
0x1a7c   :  { %v3654_v10 = vadd.f32 %v6285_v62, %v8275_v61  ;;  %v3645_v23 = vpop.f32.mrb[133].mxu0 }
0x1a7d   :  { %v3646_v5 = vadd.f32 %v8275_v61, %v3645_v23  ;;  %v6286_v14 = vpop.f32.mrb[134].mxu0  ;;  %6297 = vmatprep.mubr.msk.bf16.mxu1 %vm3689_vm6, %v3683_v28  ;;  %v3834_v23 = vadd.s32 48, %v8324_v44 }
0x1a7e   :  { %v3657_v19 = vadd.f32 %v6286_v14, %v8275_v61  ;;  %v3648_v55 = vpop.f32.mrb[135].mxu0  ;;  %6298 = vmatmul.mubr.msk.bf16.gmra.mrb[128].mxu1 %vm3689_vm6, %v3684_v8  ;;  %v3674_v0 = vmax.f32 %v3654_v10, 0.0 }
0x1a7f   :  { %v3649_v35 = vadd.f32 %v8275_v61, %v3648_v55  ;;  %v3672_v36 = vmax.f32 %v3646_v5, 0.0  ;;  %v3878_v5 = vand.u32 7, %v3832_v51  ;;  %v3885_v55 = vand.u32 7, %v3833_v29  ;;  %v4212_v29 = vld [vmem:[%s8816_s1 + $0x1d0] sm:$0xff] }
0x1a80   :  { %v3675_v46 = vmax.f32 %v3657_v19, 0.0 }
0x1a81   :  { %v3673_v40 = vmax.f32 %v3649_v35, 0.0  ;;  %v3835_v35 = vadd.s32 56, %v8324_v44  ;;  %vm4042_vm11 = vcmp.eq.s32.totalorder %v3878_v5, %v8329_v42  ;;  %vm4043_vm12 = vcmp.eq.s32.totalorder %v3885_v55, %v8329_v42  ;;  %v4216_v5 = vld [vmem:[%s8816_s1 + $0x1f0] sm:$0xff] }
0x1a82   :  { %v3686_v25 = vpack.c.bf16 %v3675_v46, %v3674_v0 }
0x1a83   :  { %v3685_v47 = vpack.c.bf16 %v3673_v40, %v3672_v36  ;;  %v6291_v12 = vpop.f32.mrb[120].mxu1  ;;  %v3892_v36 = vand.u32 7, %v3834_v23  ;;  %v3899_v40 = vand.u32 7, %v3835_v35 }
0x1a84   :  { %v3757_v18 = vadd.f32 %v6291_v12, %v8302_v53  ;;  %v3748_v16 = vpop.f32.mrb[121].mxu1  ;;  %v5445_v12 = vsel %vm4043_vm12, 1.0, %v6986_v58 }
0x1a85   :  { %v3749_v22 = vadd.f32 %v3748_v16, %v8302_v53  ;;  %v6292_v34 = vpop.f32.mrb[122].mxu1  ;;  %6301 = vmatprep.mubr.msk.bf16.mxu1 %vm3689_vm6, %v3685_v47  ;;  %v5444_v47 = vsel %vm4042_vm11, 1.0, %v6986_v58  ;;  %vm4044_vm13 = vcmp.eq.s32.totalorder %v3892_v36, %v8329_v42  ;;  %vm4045_vm14 = vcmp.eq.s32.totalorder %v3899_v40, %v8329_v42 }
0x1a86   :  { %v3813_v6 = vmax.f32 %v3757_v18, 0.0  ;;  %v3760_v61 = vadd.f32 %v6292_v34, %v8302_v53  ;;  %v3751_v56 = vpop.f32.mrb[123].mxu1  ;;  %6302 = vmatmul.mubr.msk.bf16.gmra.mrb[132].mxu1 %vm3689_vm6, %v3686_v25  ;;  %v5446_v34 = vsel %vm4044_vm13, 1.0, %v6986_v58 }
0x1a87   :  { %v3811_v32 = vmax.f32 %v3749_v22, 0.0  ;;  %v3752_v24 = vadd.f32 %v3751_v56, %v8302_v53  ;;  %6343 = vmatprep.mubr.msk.bf16.mxu1 %vm6987_vm0, %v6986_v58 }
0x1a88   :  { %4098 = vperm.xlu1 %6543, %v3813_v6   ;;  %v3814_v20 = vmax.f32 %v3760_v61, 0.0  ;;  %v5447_v6 = vsel %vm4045_vm14, 1.0, %v6986_v58 }
0x1a89   :  { %4088 = vperm.xlu0 %6542, %v3811_v32   ;;  %v3812_v50 = vmax.f32 %v3752_v24, 0.0  ;;  %v4192_v24 = vld [vmem:[%s8816_s1 + $0x130] sm:$0xff] }
0x1a8b   :  { %v6295_v45 = vpop.f32.mrb[124].mxu1 }
0x1a8c   :  { %4103 = vperm.xlu1 %6543, %v3814_v20   ;;  %v3764_v59 = vpop.f32.mrb[125].mxu1  ;;  %v3773_v2 = vadd.f32 %v6295_v45, %v8302_v53  ;;  %v4193_v45 = vld [vmem:[%s8816_s1 + $0x138] sm:$0xff] }
0x1a8d   :  { %v6296_v7 = vpop.f32.mrb[126].mxu1  ;;  %v3765_v26 = vadd.f32 %v3764_v59, %v8302_v53 }
0x1a8e   :  { %v3767_v52 = vpop.f32.mrb[127].mxu1  ;;  %v3817_v63 = vmax.f32 %v3773_v2, 0.0  ;;  %v3776_v60 = vadd.f32 %v6296_v7, %v8302_v53  ;;  %v4194_v7 = vld [vmem:[%s8816_s1 + $0x140] sm:$0xff]  ;;  %v8364_v2 = vpack.c.bf16 %v4193_v45, %v4192_v24 }
0x1a8f   :  { %v3815_v48 = vmax.f32 %v3765_v26, 0.0  ;;  %v3768_v3 = vadd.f32 %v3767_v52, %v8302_v53  ;;  %v4197_v26 = vld [vmem:[%s8816_s1 + $0x158] sm:$0xff] }
0x1a90   :  { %4093 = vperm.xlu1 %6543, %v3812_v50   ;;  %v3818_v27 = vmax.f32 %v3776_v60, 0.0  ;;  %v4195_v50 = vld [vmem:[%s8816_s1 + $0x148] sm:$0xff] }
0x1a91   :  { %v3816_v57 = vmax.f32 %v3768_v3, 0.0  ;;  %v8366_v52 = vpack.c.bf16 %v4195_v50, %v4194_v7  ;;  %v4199_v3 = vld [vmem:[%s8816_s1 + $0x168] sm:$0xff] }
0x1a94   :  { %4118 = vperm.xlu1 %6543, %v3817_v63   ;;  %v4196_v63 = vld [vmem:[%s8816_s1 + $0x150] sm:$0xff] }
0x1a95   :  { %v8385_v60 = vpack.c.bf16 %v4197_v26, %v4196_v63 }
0x1a98   :  { %4108 = vperm.xlu1 %6543, %v3815_v48   ;;  %v4198_v48 = vld [vmem:[%s8816_s1 + $0x160] sm:$0xff] }
0x1a9c   :  { %4113 = vperm.xlu1 %6543, %v3816_v57   ;;  %v8387_v57 = vpack.c.bf16 %v4199_v3, %v4198_v48  ;;  %v4234_v3 = vld [vmem:[%s8816_s1 + $0x210] sm:$0xff] }
0x1aa0   :  { %4123 = vperm.xlu1 %6543, %v3818_v27   ;;  %v4200_v27 = vld [vmem:[%s8816_s1 + $0x170] sm:$0xff] }
0x1aa1   :  { %v8405_v11 = vpack.c.bf16 %v4201_v15, %v4200_v27  ;;  %v4235_v27 = vpack.c.bf16 %v4234_v3, %v4234_v3 }
0x1aa3   :  { %v8502_v15 = vsel %vm4468_vm15, %v4235_v27, 0 }
0x1b07   :  { %v4099_v38 = vpop.permute.xlu1 %4098 }
0x1b08   :  { %v4089_v31 = vpop.permute.xlu0 %4088  ;;  %v4168_v14 = vmul.f32 %v5442_v49, %v4099_v38  ;;  %v8425_v38 = vpack.c.bf16 %v4205_v13, %v4204_v43  ;;  %v4213_v49 = vld [vmem:[%s8816_s1 + $0x1d8] sm:$0xff]  ;;  %v3913_v43 = vand.u32 7, %v3837_v54 }
0x1b09   :  { %v4166_v28 = vmul.f32 %v5440_v17, %v4089_v31  ;;  %v4209_v17 = vld [vmem:[%s8816_s1 + $0x1b8] sm:$0xff]  ;;  %v4210_v31 = vld [vmem:[%s8816_s1 + $0x1c0] sm:$0xff] }
0x1b0a   :  { %vm4047_vm2 = vcmp.eq.s32.totalorder %v3913_v43, %v8329_v42 }
0x1b0b   :  { %v4104_v39 = vpop.permute.xlu1 %4103  ;;  %v5449_v9 = vsel %vm4047_vm2, 1.0, %v6986_v58 }
0x1b0c   :  { %v4169_v62 = vmul.f32 %v5443_v21, %v4104_v39  ;;  %v4208_v39 = vld [vmem:[%s8816_s1 + $0x1b0] sm:$0xff]  ;;  %v4211_v21 = vld [vmem:[%s8816_s1 + $0x1c8] sm:$0xff] }
0x1b0d   :  { %v8447_v51 = vpack.c.bf16 %v4211_v21, %v4210_v31 }
0x1b0e   :  { %v4183_v46 = vpack.c.bf16 %v4169_v62, %v4168_v14  ;;  %v8465_v62 = vpack.c.bf16 %v4213_v49, %v4212_v29  ;;  %v4217_v14 = vld [vmem:[%s8816_s1 + $0x1f8] sm:$0xff] }
0x1b0f   :  { %v4094_v8 = vpop.permute.xlu1 %4093 }
0x1b10   :  { %v4167_v10 = vmul.f32 %v5441_v4, %v4094_v8  ;;  %v8445_v4 = vpack.c.bf16 %v4209_v17, %v4208_v39  ;;  %v4214_v8 = vld [vmem:[%s8816_s1 + $0x1e0] sm:$0xff] }
0x1b12   :  { %v4182_v19 = vpack.c.bf16 %v4167_v10, %v4166_v28  ;;  %v4215_v28 = vld [vmem:[%s8816_s1 + $0x1e8] sm:$0xff] }
0x1b13   :  { %v4119_v0 = vpop.permute.xlu1 %4118  ;;  %v8467_v10 = vpack.c.bf16 %v4215_v28, %v4214_v8 }
0x1b14   :  { %6305 = vmatprep.subr.bf16.mxu0 %v4182_v19  ;;  %v4172_v32 = vmul.f32 %v5446_v34, %v4119_v0 }
0x1b15   :  { %6306 = vmatpush3.bf16.msra.mxu0 %v4182_v19 }
0x1b16   :  { %6307 = vmatprep.subr.bf16.mxu0 %v4183_v46 }
0x1b17   :  { %v4109_v25 = vpop.permute.xlu1 %4108 }
0x1b18   :  { %v4170_v16 = vmul.f32 %v5444_v47, %v4109_v25 }
0x1b19   :  { %6308 = vmatpush3.bf16.msra.mxu0 %v4183_v46  ;;  %v8480_v46 = vpack.c.bf16 %v4217_v14, %v4216_v5 }
0x1b1b   :  { %v4114_v18 = vpop.permute.xlu1 %4113 }
0x1b1c   :  { %v4171_v22 = vmul.f32 %v5445_v12, %v4114_v18 }
0x1b1e   :  { %v4184_v61 = vpack.c.bf16 %v4171_v22, %v4170_v16  ;;  %v4232_v22 = vld [vmem:[%s8816_s1 + $0x200] sm:$0xff]  ;;  %s5456_s1 = sld [smem:[#allocation2 + $0x1]] }
0x1b1f   :  { %v4124_v56 = vpop.permute.xlu1 %4123 }
0x1b20   :  { %v4173_v20 = vmul.f32 %v5447_v6, %v4124_v56  ;;  %6309 = vmatprep.subr.bf16.mxu0 %v4184_v61  ;;  %v4233_v6 = vpack.c.bf16 %v4232_v22, %v4232_v22 }
0x1b21   :  { %6310 = vmatpush3.bf16.msra.mxu0 %v4184_v61 }
0x1b22   :  { %v4185_v59 = vpack.c.bf16 %v4173_v20, %v4172_v32  ;;  %v8492_v24 = vsel %vm4468_vm15, %v4233_v6, 0  ;;  %v3843_v6 = vadd.s32 120, %v8324_v44 }
0x1b23   :  { %6342 = vmatpush3.bf16.msra.mxu1 %v8492_v24 }
0x1b24   :  { %6311 = vmatprep.subr.bf16.mxu0 %v4185_v59 }
0x1b25   :  { %6312 = vmatpush3.bf16.msra.mxu0 %v4185_v59 }
0x1b26   :  { %6371 = vmatprep.subr.bf16.mxu0 %v6986_v58 }
0x1b28   :  { %6314 = vmatmul.mubr.msk.bf16.vlgmr.msra.gmra.mrb[136].mxu0 %vm609_vm4, %v8364_v2 }
0x1b29   :  { %6317 = vmatprep.mubr.msk.bf16.mxu0 %vm609_vm4, %v8366_v52  ;;  %6372 = vmatpush3.bf16.msra.mxu0 %v8502_v15 }
0x1b2a   :  { %6437 = vmatprep.subr.bf16.mxu0 %v6986_v58 }
0x1b30   :  { %6318 = vmatmul.mubr.msk.bf16.gmra.mrb[140].mxu0 %vm609_vm4, %v8385_v60 }
0x1b31   :  { %6321 = vmatprep.mubr.msk.bf16.mxu0 %vm609_vm4, %v8387_v57 }
0x1b38   :  { %6322 = vmatmul.mubr.msk.bf16.gmra.mrb[144].mxu0 %vm609_vm4, %v8405_v11 }
0x1b39   :  { %6325 = vmatprep.mubr.msk.bf16.mxu0 %vm609_vm4, %v8407_v37 }
0x1b40   :  { %6326 = vmatmul.mubr.msk.bf16.gmra.mrb[148].mxu0 %vm609_vm4, %v8425_v38 }
0x1b41   :  { %6329 = vmatprep.mubr.msk.bf16.mxu0 %vm609_vm4, %v8427_v30 }
0x1b48   :  { %6330 = vmatmul.mubr.msk.bf16.gmra.mrb[152].mxu0 %vm609_vm4, %v8445_v4 }
0x1b49   :  { %6333 = vmatprep.mubr.msk.bf16.mxu0 %vm609_vm4, %v8447_v51 }
0x1b50   :  { %6334 = vmatmul.mubr.msk.bf16.gmra.mrb[156].mxu0 %vm609_vm4, %v8465_v62 }
0x1b51   :  { %v6299_v23 = vpop.f32.mrb[128].mxu1  ;;  %6337 = vmatprep.mubr.msk.bf16.mxu0 %vm609_vm4, %v8467_v10 }
0x1b52   :  { %v3780_v19 = vpop.f32.mrb[129].mxu1  ;;  %v3789_v36 = vadd.f32 %v6299_v23, %v8302_v53 }
0x1b53   :  { %v3781_v55 = vadd.f32 %v3780_v19, %v8302_v53  ;;  %v6300_v35 = vpop.f32.mrb[130].mxu1 }
0x1b54   :  { %v3783_v0 = vpop.f32.mrb[131].mxu1  ;;  %v3792_v47 = vadd.f32 %v6300_v35, %v8302_v53  ;;  %v3821_v18 = vmax.f32 %v3789_v36, 0.0  ;;  %v3838_v35 = vadd.s32 80, %v8324_v44 }
0x1b55   :  { %v3819_v40 = vmax.f32 %v3781_v55, 0.0  ;;  %v3784_v25 = vadd.f32 %v3783_v0, %v8302_v53  ;;  %v3839_v55 = vadd.s32 88, %v8324_v44 }
0x1b56   :  { %v3822_v61 = vmax.f32 %v3792_v47, 0.0 }
0x1b57   :  { %v3820_v12 = vmax.f32 %v3784_v25, 0.0  ;;  %4128 = vperm.xlu1 %6543, %v3819_v40   ;;  %v3927_v36 = vand.u32 7, %v3839_v55  ;;  %v3841_v40 = vadd.s32 104, %v8324_v44 }
0x1b58   :  { %6338 = vmatmul.mubr.msk.bf16.gmra.mrb[160].mxu0 %vm609_vm4, %v8480_v46 }
0x1b59   :  { %4133 = vperm.xlu0 %6542, %v3820_v12   ;;  %v6303_v16 = vpop.f32.mrb[132].mxu1  ;;  %6373 = vmatprep.mubr.msk.bf16.mxu0 %vm6987_vm0, %v6986_v58  ;;  %v3920_v12 = vand.u32 7, %v3838_v35  ;;  %vm4049_vm3 = vcmp.eq.s32.totalorder %v3927_v36, %v8329_v42 }
0x1b5a   :  { %v3796_v34 = vpop.f32.mrb[133].mxu1  ;;  %v3805_v45 = vadd.f32 %v6303_v16, %v8302_v53 }
0x1b5b   :  { %v3797_v56 = vadd.f32 %v3796_v34, %v8302_v53  ;;  %4138 = vperm.xlu1 %6543, %v3821_v18   ;;  %v6304_v32 = vpop.f32.mrb[134].mxu1  ;;  %v3840_v18 = vadd.s32 96, %v8324_v44  ;;  %v3941_v34 = vand.u32 7, %v3841_v40  ;;  %vm4048_vm5 = vcmp.eq.s32.totalorder %v3920_v12, %v8329_v42 }
0x1b5c   :  { %v3799_v20 = vpop.f32.mrb[135].mxu1  ;;  %v3808_v50 = vadd.f32 %v6304_v32, %v8302_v53  ;;  %v3825_v26 = vmax.f32 %v3805_v45, 0.0  ;;  %v3842_v32 = vadd.s32 112, %v8324_v44 }
0x1b5d   :  { %v3823_v59 = vmax.f32 %v3797_v56, 0.0  ;;  %v3800_v7 = vadd.f32 %v3799_v20, %v8302_v53  ;;  %4143 = vperm.xlu0 %6542, %v3822_v61   ;;  %v3836_v53 = vadd.s32 64, %v8324_v44  ;;  %v3934_v56 = vand.u32 7, %v3840_v18 }
0x1b5e   :  { %v3826_v48 = vmax.f32 %v3808_v50, 0.0  ;;  %v5451_v20 = vsel %vm4049_vm3, 1.0, %v6986_v58  ;;  %vm4051_vm6 = vcmp.eq.s32.totalorder %v3941_v34, %v8329_v42  ;;  %v3948_v27 = vand.u32 7, %v3842_v32 }
0x1b5f   :  { %v3824_v63 = vmax.f32 %v3800_v7, 0.0  ;;  %4148 = vperm.xlu1 %6543, %v3823_v59   ;;  %v3906_v41 = vand.u32 7, %v3836_v53  ;;  %v3955_v59 = vand.u32 7, %v3843_v6  ;;  %vm4050_vm7 = vcmp.eq.s32.totalorder %v3934_v56, %v8329_v42 }
0x1b60   :  { %vm4052_vm10 = vcmp.eq.s32.totalorder %v3948_v27, %v8329_v42 }
0x1b61   :  { %4153 = vperm.xlu0 %6542, %v3824_v63   ;;  %vm4046_vm1 = vcmp.eq.s32.totalorder %v3906_v41, %v8329_v42  ;;  %v5450_v63 = vsel %vm4048_vm5, 1.0, %v6986_v58  ;;  %v5453_v41 = vsel %vm4051_vm6, 1.0, %v6986_v58  ;;  %vm4053_vm9 = vcmp.eq.s32.totalorder %v3955_v59, %v8329_v42 }
0x1b62   :  { %v5448_v13 = vsel %vm4046_vm1, 1.0, %v6986_v58  ;;  %v5454_v42 = vsel %vm4052_vm10, 1.0, %v6986_v58 }
0x1b63   :  { %4158 = vperm.xlu1 %6543, %v3825_v26  }
0x1b65   :  { %4163 = vperm.xlu0 %6542, %v3826_v48  }
0x1bd6   :  { %v4129_v33 = vpop.permute.xlu1 %4128 }
0x1bd7   :  { %v4174_v17 = vmul.f32 %v5448_v13, %v4129_v33  ;;  %v5452_v33 = vsel %vm4050_vm7, 1.0, %v6986_v58 }
0x1bd8   :  { %v4134_v39 = vpop.permute.xlu0 %4133 }
0x1bd9   :  { %v4175_v31 = vmul.f32 %v5449_v9, %v4134_v39 }
0x1bda   :  { %v4139_v61 = vpop.permute.xlu1 %4138 }
0x1bdb   :  { %v4186_v21 = vpack.c.bf16 %v4175_v31, %v4174_v17  ;;  %v4176_v43 = vmul.f32 %v5450_v63, %v4139_v61  ;;  %v5455_v17 = vsel %vm4053_vm9, 1.0, %v6986_v58 }
0x1bdc   :  { %v4144_v22 = vpop.permute.xlu0 %4143 }
0x1bdd   :  { %6401 = vmatprep.subr.bf16.mxu1 %v4186_v21  ;;  %v4177_v3 = vmul.f32 %v5451_v20, %v4144_v22 }
0x1bde   :  { %v4149_v44 = vpop.permute.xlu1 %4148 }
0x1bdf   :  { %v4187_v9 = vpack.c.bf16 %v4177_v3, %v4176_v43 }
0x1be0   :  { %v4154_v26 = vpop.permute.xlu0 %4153 }
0x1be1   :  { %v4179_v39 = vmul.f32 %v5453_v41, %v4154_v26 }
0x1be2   :  { %v4159_v36 = vpop.permute.xlu1 %4158 }
0x1be3   :  { %v4180_v6 = vmul.f32 %v5454_v42, %v4159_v36 }
0x1be4   :  { %v4164_v31 = vpop.permute.xlu0 %4163 }
0x1be5   :  { %v4181_v18 = vmul.f32 %v5455_v17, %v4164_v31 }
0x1be7   :  { %v4189_v32 = vpack.c.bf16 %v4181_v18, %v4180_v6 }
0x1bfb   :  { %v8516_v29 = vpop.f32.mrb[136].mxu0 }
0x1bfc   :  { %v4314_v49 = vpop.f32.mrb[137].mxu0 }
0x1bfd   :  { %v8518_v8 = vpop.f32.mrb[138].mxu0 }
0x1bfe   :  { %v4317_v28 = vpop.f32.mrb[139].mxu0 }
0x1c03   :  { %v8520_v23 = vpop.f32.mrb[140].mxu0 }
0x1c04   :  { %v8522_v5 = vpop.f32.mrb[141].mxu0 }
0x1c05   :  { %v8524_v14 = vpop.f32.mrb[142].mxu0 }
0x1c06   :  { %v8526_v19 = vpop.f32.mrb[143].mxu0 }
0x1c0b   :  { %v8530_v0 = vpop.f32.mrb[144].mxu0 }
0x1c0c   :  { %v8533_v25 = vpop.f32.mrb[145].mxu0 }
0x1c0d   :  { %v8535_v47 = vpop.f32.mrb[146].mxu0 }
0x1c0e   :  { %v8538_v16 = vpop.f32.mrb[147].mxu0 }
0x1c13   :  { %v6327_v45 = vpop.f32.mrb[148].mxu0 }
0x1c14   :  { %v4425_v7 = vmax.f32 %v4314_v49, %v6327_v45  ;;  %v8546_v50 = vpop.f32.mrb[149].mxu0 }
0x1c15   :  { %v6328_v48 = vpop.f32.mrb[150].mxu0 }
0x1c16   :  { %v4426_v53 = vmax.f32 %v4317_v28, %v6328_v48  ;;  %v8550_v54 = vpop.f32.mrb[151].mxu0  ;;  %v4178_v28 = vmul.f32 %v5452_v33, %v4149_v44 }
0x1c18   :  { %v4439_v13 = vpack.c.bf16 %v4426_v53, %v4425_v7 }
0x1c1a   :  { %6344 = vmatmul.mubr.msk.bf16.vlgmr.msra.gmra.mrb[136].mxu1 %vm4446_vm8, %v4439_v13  ;;  %6374 = vmatmul.mubr.msk.bf16.vlgmr.msra.gmra.mrb[164].mxu0 %vm4446_vm8, %v4439_v13 }
0x1c1b   :  { %6402 = vmatpush3.bf16.msra.mxu1 %v4186_v21  ;;  %v6331_v49 = vpop.f32.mrb[152].mxu0  ;;  %6347 = vmatprep.mubr.msk.bf16.mxu1 %vm6987_vm0, %v6986_v58  ;;  %v4188_v21 = vpack.c.bf16 %v4179_v39, %v4178_v28 }
0x1c1c   :  { %v4429_v55 = vmax.f32 %v8522_v5, %v6331_v49  ;;  %6403 = vmatprep.subr.bf16.mxu1 %v4187_v9  ;;  %v4378_v35 = vpop.f32.mrb[153].mxu0  ;;  %6377 = vmatprep.mubr.msk.bf16.mxu0 %vm6987_vm0, %v6986_v58 }
0x1c1d   :  { %v4427_v40 = vmax.f32 %v8516_v29, %v4378_v35  ;;  %v6332_v12 = vpop.f32.mrb[154].mxu0  ;;  %6438 = vmatpush3.bf16.msra.mxu0 %v8492_v24 }
0x1c1e   :  { %v4430_v22 = vmax.f32 %v8526_v19, %v6332_v12  ;;  %v4381_v34 = vpop.f32.mrb[155].mxu0 }
0x1c1f   :  { %v4428_v5 = vmax.f32 %v8518_v8, %v4381_v34  ;;  %6404 = vmatpush3.bf16.msra.mxu1 %v4187_v9 }
0x1c20   :  { %v4441_v61 = vpack.c.bf16 %v4430_v22, %v4429_v55  ;;  %6405 = vmatprep.subr.bf16.mxu1 %v4188_v21 }
0x1c21   :  { %v4440_v56 = vpack.c.bf16 %v4428_v5, %v4427_v40 }
0x1c23   :  { %6406 = vmatpush3.bf16.msra.mxu1 %v4188_v21  ;;  %v6335_v20 = vpop.f32.mrb[156].mxu0  ;;  %6378 = vmatmul.mubr.msk.bf16.gmra.mrb[168].mxu0 %vm4446_vm8, %v4440_v56 }
0x1c24   :  { %v4433_v29 = vmax.f32 %v8533_v25, %v6335_v20  ;;  %6348 = vmatmul.mubr.msk.bf16.gmra.mrb[140].mxu1 %vm4446_vm8, %v4440_v56  ;;  %6407 = vmatprep.subr.bf16.mxu1 %v4189_v32  ;;  %v4394_v24 = vpop.f32.mrb[157].mxu0 }
0x1c25   :  { %v4431_v19 = vmax.f32 %v8520_v23, %v4394_v24  ;;  %v6336_v45 = vpop.f32.mrb[158].mxu0  ;;  %6351 = vmatprep.mubr.msk.bf16.mxu1 %vm6987_vm0, %v6986_v58  ;;  %6381 = vmatprep.mubr.msk.bf16.mxu0 %vm6987_vm0, %v6986_v58 }
0x1c26   :  { %v4434_v8 = vmax.f32 %v8538_v16, %v6336_v45  ;;  %v4397_v59 = vpop.f32.mrb[159].mxu0 }
0x1c27   :  { %v4432_v7 = vmax.f32 %v8524_v14, %v4397_v59  ;;  %6408 = vmatpush3.bf16.msra.mxu1 %v4189_v32 }
0x1c28   :  { %v4443_v25 = vpack.c.bf16 %v4434_v8, %v4433_v29  ;;  %6467 = vmatprep.subr.bf16.mxu1 %v6986_v58 }
0x1c29   :  { %v4442_v63 = vpack.c.bf16 %v4432_v7, %v4431_v19 }
0x1c2b   :  { %v6339_v26 = vpop.f32.mrb[160].mxu0  ;;  %6382 = vmatmul.mubr.msk.bf16.gmra.mrb[172].mxu0 %vm4446_vm8, %v4441_v61 }
0x1c2c   :  { %v4437_v23 = vmax.f32 %v8546_v50, %v6339_v26  ;;  %6352 = vmatmul.mubr.msk.bf16.gmra.mrb[144].mxu1 %vm4446_vm8, %v4441_v61  ;;  %v4410_v48 = vpop.f32.mrb[161].mxu0  ;;  %6385 = vmatprep.mubr.msk.bf16.mxu0 %vm6987_vm0, %v6986_v58 }
0x1c2d   :  { %v4435_v16 = vmax.f32 %v8530_v0, %v4410_v48  ;;  %v6340_v3 = vpop.f32.mrb[162].mxu0  ;;  %6355 = vmatprep.mubr.msk.bf16.mxu1 %vm6987_vm0, %v6986_v58 }
0x1c2e   :  { %v4438_v14 = vmax.f32 %v8550_v54, %v6340_v3  ;;  %v4413_v27 = vpop.f32.mrb[163].mxu0 }
0x1c2f   :  { %v4436_v53 = vmax.f32 %v8535_v47, %v4413_v27 }
0x1c30   :  { %v4445_v44 = vpack.c.bf16 %v4438_v14, %v4437_v23 }
0x1c31   :  { %v4444_v41 = vpack.c.bf16 %v4436_v53, %v4435_v16 }
0x1c33   :  { %6386 = vmatmul.mubr.msk.bf16.gmra.mrb[176].mxu0 %vm4446_vm8, %v4442_v63 }
0x1c34   :  { %6356 = vmatmul.mubr.msk.bf16.gmra.mrb[148].mxu1 %vm4446_vm8, %v4442_v63  ;;  %6389 = vmatprep.mubr.msk.bf16.mxu0 %vm6987_vm0, %v6986_v58 }
0x1c35   :  { %6359 = vmatprep.mubr.msk.bf16.mxu1 %vm6987_vm0, %v6986_v58 }
0x1c3b   :  { %6390 = vmatmul.mubr.msk.bf16.gmra.mrb[180].mxu0 %vm4446_vm8, %v4443_v25 }
0x1c3c   :  { %6360 = vmatmul.mubr.msk.bf16.gmra.mrb[152].mxu1 %vm4446_vm8, %v4443_v25  ;;  %6393 = vmatprep.mubr.msk.bf16.mxu0 %vm6987_vm0, %v6986_v58 }
0x1c3d   :  { %6363 = vmatprep.mubr.msk.bf16.mxu1 %vm6987_vm0, %v6986_v58 }
0x1c43   :  { %6394 = vmatmul.mubr.msk.bf16.gmra.mrb[184].mxu0 %vm4446_vm8, %v4444_v41 }
0x1c44   :  { %6364 = vmatmul.mubr.msk.bf16.gmra.mrb[156].mxu1 %vm4446_vm8, %v4444_v41  ;;  %6397 = vmatprep.mubr.msk.bf16.mxu0 %vm6987_vm0, %v6986_v58 }
0x1c45   :  { %6367 = vmatprep.mubr.msk.bf16.mxu1 %vm6987_vm0, %v6986_v58 }
0x1c4b   :  { %6398 = vmatmul.mubr.msk.bf16.gmra.mrb[188].mxu0 %vm4446_vm8, %v4445_v44 }
0x1c4c   :  { %6368 = vmatmul.mubr.msk.bf16.gmra.mrb[160].mxu1 %vm4446_vm8, %v4445_v44  ;;  %6439 = vmatprep.mubr.msk.bf16.mxu0 %vm6987_vm0, %v6986_v58 }
0x1c4d   :  { %6409 = vmatprep.mubr.msk.bf16.mxu1 %vm609_vm4, %v8320_v1 }
0x1c54   :  { %6410 = vmatmul.mubr.msk.bf16.vlgmr.msra.gmra.mrb[164].mxu1 %vm609_vm4, %v8364_v2 }
0x1c55   :  { %6413 = vmatprep.mubr.msk.bf16.mxu1 %vm609_vm4, %v8366_v52  ;;  %6468 = vmatpush3.bf16.msra.mxu1 %v8502_v15  ;;  %v8643_v52 = vstv %s5456_s1 }
0x1c5c   :  { %6414 = vmatmul.mubr.msk.bf16.gmra.mrb[168].mxu1 %vm609_vm4, %v8385_v60 }
0x1c5d   :  { %6417 = vmatprep.mubr.msk.bf16.mxu1 %vm609_vm4, %v8387_v57 }
0x1c64   :  { %6418 = vmatmul.mubr.msk.bf16.gmra.mrb[172].mxu1 %vm609_vm4, %v8405_v11 }
0x1c65   :  { %6421 = vmatprep.mubr.msk.bf16.mxu1 %vm609_vm4, %v8407_v37  ;;  %v8645_v37 = vstv %s5457_s25 }
0x1c6c   :  { %6422 = vmatmul.mubr.msk.bf16.gmra.mrb[176].mxu1 %vm609_vm4, %v8425_v38 }
0x1c6d   :  { %6425 = vmatprep.mubr.msk.bf16.mxu1 %vm609_vm4, %v8427_v30 }
0x1c74   :  { %6426 = vmatmul.mubr.msk.bf16.gmra.mrb[180].mxu1 %vm609_vm4, %v8445_v4 }
0x1c75   :  { %6429 = vmatprep.mubr.msk.bf16.mxu1 %vm609_vm4, %v8447_v51 }
0x1c7c   :  { %6430 = vmatmul.mubr.msk.bf16.gmra.mrb[184].mxu1 %vm609_vm4, %v8465_v62 }
0x1c7d   :  { %6433 = vmatprep.mubr.msk.bf16.mxu1 %vm609_vm4, %v8467_v10 }
0x1c84   :  { %6434 = vmatmul.mubr.msk.bf16.gmra.mrb[188].mxu1 %vm609_vm4, %v8480_v46 }
0x1c85   :  { %6469 = vmatprep.mubr.msk.bf16.mxu1 %vm6987_vm0, %v6986_v58 }
0x1ced   :  { %v4506_v1 = vpop.f32.mrb[136].mxu1  ;;  %v4597_v2 = vpop.f32.mrb[164].mxu0 }
0x1cee   :  { %v4651_v60 = vmax.f32 %v4506_v1, %v4597_v2  ;;  %v6345_v57 = vpop.f32.mrb[137].mxu1  ;;  %v6375_v11 = vpop.f32.mrb[165].mxu0 }
0x1cef   :  { %v4509_v38 = vpop.f32.mrb[138].mxu1  ;;  %v4600_v30 = vpop.f32.mrb[166].mxu0 }
0x1cf0   :  { %v4665_v4 = vmul.f32 %v8643_v52, %v4651_v60  ;;  %v4652_v51 = vmax.f32 %v4509_v38, %v4600_v30  ;;  %v6346_v62 = vpop.f32.mrb[139].mxu1  ;;  %v6376_v10 = vpop.f32.mrb[167].mxu0 }
0x1cf2   :  { %v4679_v46 = vadd.f32 %v8645_v37, %v4665_v4  ;;  %v4666_v15 = vmul.f32 %v8643_v52, %v4652_v51 }
0x1cf4   :  { %v5486_v0 = vmul.f32 -1.442695, %v4679_v46  ;;  %v4680_v47 = vadd.f32 %v8645_v37, %v4666_v15 }
0x1cf6   :  { %6864 = vpow2.f32 %v5486_v0  ;;  %v5487_v50 = vmul.f32 -1.442695, %v4680_v47  ;;  %v4605_v54 = vpop.f32.mrb[168].mxu0 }
0x1cf7   :  { %v4514_v43 = vpop.f32.mrb[140].mxu1  ;;  %v6379_v13 = vpop.f32.mrb[169].mxu0 }
0x1cf8   :  { %6866 = vpow2.f32 %v5487_v50  ;;  %v4653_v33 = vmax.f32 %v4514_v43, %v4605_v54  ;;  %v6349_v9 = vpop.f32.mrb[141].mxu1  ;;  %v4608_v39 = vpop.f32.mrb[170].mxu0 }
0x1cf9   :  { %v4517_v17 = vpop.f32.mrb[142].mxu1  ;;  %v6380_v31 = vpop.f32.mrb[171].mxu0 }
0x1cfa   :  { %v4667_v49 = vmul.f32 %v8643_v52, %v4653_v33  ;;  %v4654_v28 = vmax.f32 %v4517_v17, %v4608_v39  ;;  %v6350_v55 = vpop.f32.mrb[143].mxu1 }
0x1cfc   :  { %v4681_v35 = vadd.f32 %v8645_v37, %v4667_v49  ;;  %v4668_v42 = vmul.f32 %v8643_v52, %v4654_v28 }
0x1cfe   :  { %v5488_v36 = vmul.f32 -1.442695, %v4681_v35  ;;  %v4682_v40 = vadd.f32 %v8645_v37, %v4668_v42  ;;  %v4613_v12 = vpop.f32.mrb[172].mxu0 }
0x1cff   :  { %v4522_v21 = vpop.f32.mrb[144].mxu1  ;;  %v6383_v18 = vpop.f32.mrb[173].mxu0 }
0x1d00   :  { %v6865_v22 = vpop.eup %6864  ;;  %6868 = vpow2.f32 %v5488_v36  ;;  %v5489_v34 = vmul.f32 -1.442695, %v4682_v40  ;;  %v4655_v5 = vmax.f32 %v4522_v21, %v4613_v12  ;;  %v6353_v6 = vpop.f32.mrb[145].mxu1 }
0x1d01   :  { %v4616_v61 = vpop.f32.mrb[174].mxu0  ;;  %v4731_v56 = vadd.f32 1.0, %v6865_v22  ;;  %v4525_v32 = vpop.f32.mrb[146].mxu1 }
0x1d02   :  { %v6384_v20 = vpop.f32.mrb[175].mxu0  ;;  %v6867_v29 = vpop.eup %6866  ;;  %6870 = vpow2.f32 %v5489_v34  ;;  %v4669_v24 = vmul.f32 %v8643_v52, %v4655_v5  ;;  %v4656_v19 = vmax.f32 %v4525_v32, %v4616_v61 }
0x1d03   :  { %v6354_v45 = vpop.f32.mrb[147].mxu1  ;;  %6872 = vrcp.f32 %v4731_v56  ;;  %v4732_v8 = vadd.f32 1.0, %v6867_v29 }
0x1d04   :  { %v4683_v59 = vadd.f32 %v8645_v37, %v4669_v24  ;;  %v4670_v7 = vmul.f32 %v8643_v52, %v4656_v19 }
0x1d05   :  { %6874 = vrcp.f32 %v4732_v8 }
0x1d06   :  { %v5490_v25 = vmul.f32 -1.442695, %v4683_v59  ;;  %v4684_v63 = vadd.f32 %v8645_v37, %v4670_v7  ;;  %v4621_v26 = vpop.f32.mrb[176].mxu0 }
0x1d07   :  { %v4530_v23 = vpop.f32.mrb[148].mxu1  ;;  %v6387_v48 = vpop.f32.mrb[177].mxu0 }
0x1d08   :  { %6876 = vpow2.f32 %v5490_v25  ;;  %v5491_v16 = vmul.f32 -1.442695, %v4684_v63  ;;  %v4657_v3 = vmax.f32 %v4530_v23, %v4621_v26  ;;  %v6357_v14 = vpop.f32.mrb[149].mxu1  ;;  %v4624_v27 = vpop.f32.mrb[178].mxu0 }
0x1d09   :  { %v4533_v53 = vpop.f32.mrb[150].mxu1  ;;  %v6388_v44 = vpop.f32.mrb[179].mxu0 }
0x1d0a   :  { %v6869_v41 = vpop.eup %6868  ;;  %6878 = vpow2.f32 %v5491_v16  ;;  %v4671_v1 = vmul.f32 %v8643_v52, %v4657_v3  ;;  %v4658_v2 = vmax.f32 %v4533_v53, %v4624_v27  ;;  %v6358_v60 = vpop.f32.mrb[151].mxu1 }
0x1d0b   :  { %v4733_v57 = vadd.f32 1.0, %v6869_v41 }
0x1d0c   :  { %v6871_v11 = vpop.eup %6870  ;;  %v4685_v38 = vadd.f32 %v8645_v37, %v4671_v1  ;;  %v4672_v30 = vmul.f32 %v8643_v52, %v4658_v2 }
0x1d0d   :  { %v6873_v4 = vpop.eup %6872  ;;  %6880 = vrcp.f32 %v4733_v57  ;;  %v4734_v51 = vadd.f32 1.0, %v6871_v11 }
0x1d0e   :  { %4770 = vst [vmem:[%s8818_s3] sm:$0xff] %v6873_v4  ;;  %v5492_v62 = vmul.f32 -1.442695, %v4685_v38  ;;  %v4686_v10 = vadd.f32 %v8645_v37, %v4672_v30  ;;  %v4629_v46 = vpop.f32.mrb[180].mxu0 }
0x1d0f   :  { %v6875_v15 = vpop.eup %6874  ;;  %6882 = vrcp.f32 %v4734_v51  ;;  %v4538_v0 = vpop.f32.mrb[152].mxu1 }
0x1d10   :  { %v6391_v47 = vpop.f32.mrb[181].mxu0  ;;  %4771 = vst [vmem:[%s8818_s3 + $0x8] sm:$0xff] %v6875_v15  ;;  %6884 = vpow2.f32 %v5492_v62  ;;  %v5493_v50 = vmul.f32 -1.442695, %v4686_v10  ;;  %v4659_v54 = vmax.f32 %v4538_v0, %v4629_v46  ;;  %v6361_v43 = vpop.f32.mrb[153].mxu1 }
0x1d11   :  { %v4632_v13 = vpop.f32.mrb[182].mxu0  ;;  %v4541_v33 = vpop.f32.mrb[154].mxu1 }
0x1d12   :  { %v6392_v9 = vpop.f32.mrb[183].mxu0  ;;  %v6877_v39 = vpop.eup %6876  ;;  %6886 = vpow2.f32 %v5493_v50  ;;  %v4673_v17 = vmul.f32 %v8643_v52, %v4659_v54  ;;  %v4660_v31 = vmax.f32 %v4541_v33, %v4632_v13 }
0x1d13   :  { %v6362_v49 = vpop.f32.mrb[155].mxu1  ;;  %v4735_v28 = vadd.f32 1.0, %v6877_v39 }
0x1d14   :  { %v6879_v55 = vpop.eup %6878  ;;  %v4687_v35 = vadd.f32 %v8645_v37, %v4673_v17  ;;  %v4674_v42 = vmul.f32 %v8643_v52, %v4660_v31 }
0x1d15   :  { %6888 = vrcp.f32 %v4735_v28  ;;  %v4736_v36 = vadd.f32 1.0, %v6879_v55 }
0x1d16   :  { %v5494_v40 = vmul.f32 -1.442695, %v4687_v35  ;;  %v4688_v12 = vadd.f32 %v8645_v37, %v4674_v42  ;;  %v4637_v21 = vpop.f32.mrb[184].mxu0 }
0x1d17   :  { %v6881_v18 = vpop.eup %6880  ;;  %6890 = vrcp.f32 %v4736_v36  ;;  %v4546_v22 = vpop.f32.mrb[156].mxu1 }
0x1d18   :  { %v6395_v34 = vpop.f32.mrb[185].mxu0  ;;  %4772 = vst [vmem:[%s8818_s3 + $0x10] sm:$0xff] %v6881_v18  ;;  %6892 = vpow2.f32 %v5494_v40  ;;  %v5495_v5 = vmul.f32 -1.442695, %v4688_v12  ;;  %v4661_v6 = vmax.f32 %v4546_v22, %v4637_v21  ;;  %v6365_v61 = vpop.f32.mrb[157].mxu1 }
0x1d19   :  { %v4640_v56 = vpop.f32.mrb[186].mxu0  ;;  %v6883_v32 = vpop.eup %6882 }
0x1d1a   :  { %v4549_v20 = vpop.f32.mrb[158].mxu1  ;;  %v6396_v29 = vpop.f32.mrb[187].mxu0  ;;  %4773 = vst [vmem:[%s8818_s3 + $0x18] sm:$0xff] %v6883_v32  ;;  %6894 = vpow2.f32 %v5495_v5  ;;  %v4675_v19 = vmul.f32 %v8643_v52, %v4661_v6 }
0x1d1b   :  { %v6885_v24 = vpop.eup %6884  ;;  %v4662_v45 = vmax.f32 %v4549_v20, %v4640_v56  ;;  %v6366_v8 = vpop.f32.mrb[159].mxu1 }
0x1d1c   :  { %v4737_v59 = vadd.f32 1.0, %v6885_v24  ;;  %v6887_v7 = vpop.eup %6886  ;;  %v4689_v25 = vadd.f32 %v8645_v37, %v4675_v19 }
0x1d1d   :  { %v4676_v63 = vmul.f32 %v8643_v52, %v4662_v45  ;;  %v4738_v26 = vadd.f32 1.0, %v6887_v7 }
0x1d1e   :  { %6896 = vrcp.f32 %v4737_v59  ;;  %v5496_v23 = vmul.f32 -1.442695, %v4689_v25  ;;  %v4645_v16 = vpop.f32.mrb[188].mxu0 }
0x1d1f   :  { %v4690_v48 = vadd.f32 %v8645_v37, %v4676_v63  ;;  %v6889_v3 = vpop.eup %6888  ;;  %6898 = vrcp.f32 %v4738_v26  ;;  %v4554_v14 = vpop.f32.mrb[160].mxu1 }
0x1d20   :  { %v6399_v27 = vpop.f32.mrb[189].mxu0  ;;  %4774 = vst [vmem:[%s8818_s3 + $0x20] sm:$0xff] %v6889_v3  ;;  %6900 = vpow2.f32 %v5496_v23  ;;  %v4663_v44 = vmax.f32 %v4554_v14, %v4645_v16  ;;  %v6369_v41 = vpop.f32.mrb[161].mxu1 }
0x1d21   :  { %v5497_v53 = vmul.f32 -1.442695, %v4690_v48  ;;  %v4648_v1 = vpop.f32.mrb[190].mxu0  ;;  %v6891_v2 = vpop.eup %6890 }
0x1d22   :  { %v4557_v60 = vpop.f32.mrb[162].mxu1  ;;  %v6400_v57 = vpop.f32.mrb[191].mxu0  ;;  %4775 = vst [vmem:[%s8818_s3 + $0x28] sm:$0xff] %v6891_v2  ;;  %v4677_v38 = vmul.f32 %v8643_v52, %v4663_v44 }
0x1d23   :  { %v6893_v11 = vpop.eup %6892  ;;  %6902 = vpow2.f32 %v5497_v53  ;;  %v6370_v30 = vpop.f32.mrb[163].mxu1 }
0x1d24   :  { %v4739_v4 = vadd.f32 1.0, %v6893_v11  ;;  %v6895_v51 = vpop.eup %6894  ;;  %v4691_v62 = vadd.f32 %v8645_v37, %v4677_v38 }
0x1d25   :  { %v4740_v10 = vadd.f32 1.0, %v6895_v51 }
0x1d26   :  { %6904 = vrcp.f32 %v4739_v4  ;;  %v5498_v46 = vmul.f32 -1.442695, %v4691_v62 }
0x1d27   :  { %6906 = vrcp.f32 %v4740_v10  ;;  %v6411_v0 = vpop.f32.mrb[164].mxu1 }
0x1d28   :  { %v6897_v15 = vpop.eup %6896  ;;  %6908 = vpow2.f32 %v5498_v46  ;;  %v4817_v47 = vpop.f32.mrb[165].mxu1 }
0x1d29   :  { %4776 = vst [vmem:[%s8818_s3 + $0x30] sm:$0xff] %v6897_v15  ;;  %v6899_v50 = vpop.eup %6898  ;;  %v6412_v54 = vpop.f32.mrb[166].mxu1 }
0x1d2a   :  { %v6901_v43 = vpop.eup %6900  ;;  %4777 = vst [vmem:[%s8818_s3 + $0x38] sm:$0xff] %v6899_v50  ;;  %v4820_v13 = vpop.f32.mrb[167].mxu1 }
0x1d2b   :  { %v4741_v33 = vadd.f32 1.0, %v6901_v43 }
0x1d2d   :  { %v6903_v9 = vpop.eup %6902  ;;  %6910 = vrcp.f32 %v4741_v33 }
0x1d2e   :  { %v4742_v39 = vadd.f32 1.0, %v6903_v9 }
0x1d2f   :  { %v6415_v31 = vpop.f32.mrb[168].mxu1 }
0x1d30   :  { %v6905_v17 = vpop.eup %6904  ;;  %6912 = vrcp.f32 %v4742_v39  ;;  %v4833_v49 = vpop.f32.mrb[169].mxu1 }
0x1d31   :  { %4778 = vst [vmem:[%s8818_s3 + $0x40] sm:$0xff] %v6905_v17  ;;  %v6907_v28 = vpop.eup %6906  ;;  %v6416_v55 = vpop.f32.mrb[170].mxu1 }
0x1d32   :  { %v6909_v35 = vpop.eup %6908  ;;  %4779 = vst [vmem:[%s8818_s3 + $0x48] sm:$0xff] %v6907_v28  ;;  %v4836_v42 = vpop.f32.mrb[171].mxu1 }
0x1d33   :  { %v4743_v36 = vadd.f32 1.0, %v6909_v35 }
0x1d35   :  { %6914 = vrcp.f32 %v4743_v36 }
0x1d37   :  { %v6911_v40 = vpop.eup %6910  ;;  %v6419_v12 = vpop.f32.mrb[172].mxu1 }
0x1d38   :  { %4780 = vst [vmem:[%s8818_s3 + $0x50] sm:$0xff] %v6911_v40  ;;  %v4849_v21 = vpop.f32.mrb[173].mxu1 }
0x1d39   :  { %v6420_v22 = vpop.f32.mrb[174].mxu1 }
0x1d3a   :  { %v6913_v18 = vpop.eup %6912  ;;  %v4852_v34 = vpop.f32.mrb[175].mxu1 }
0x1d3b   :  { %4781 = vst [vmem:[%s8818_s3 + $0x58] sm:$0xff] %v6913_v18 }
0x1d3f   :  { %v6915_v5 = vpop.eup %6914  ;;  %v6423_v6 = vpop.f32.mrb[176].mxu1 }
0x1d40   :  { %4782 = vst [vmem:[%s8818_s3 + $0x60] sm:$0xf] %v6915_v5  ;;  %v4928_v61 = vmax.f32 %v4817_v47, %v6423_v6  ;;  %v4865_v56 = vpop.f32.mrb[177].mxu1 }
0x1d41   :  { %v6424_v32 = vpop.f32.mrb[178].mxu1 }
0x1d42   :  { %v4929_v20 = vmax.f32 %v4820_v13, %v6424_v32  ;;  %v4868_v29 = vpop.f32.mrb[179].mxu1 }
0x1d44   :  { %v4942_v24 = vpack.c.bf16 %v4929_v20, %v4928_v61 }
0x1d46   :  { %6440 = vmatmul.mubr.msk.bf16.vlgmr.msra.gmra.mrb[192].mxu0 %vm4446_vm8, %v4942_v24  ;;  %6470 = vmatmul.mubr.msk.bf16.vlgmr.msra.gmra.mrb[192].mxu1 %vm4446_vm8, %v4942_v24 }
0x1d47   :  { %v6427_v19 = vpop.f32.mrb[180].mxu1  ;;  %6443 = vmatprep.mubr.msk.bf16.mxu0 %vm6987_vm0, %v6986_v58  ;;  %6473 = vmatprep.mubr.msk.bf16.mxu1 %vm6987_vm0, %v6986_v58 }
0x1d48   :  { %v4932_v45 = vmax.f32 %v4833_v49, %v6427_v19  ;;  %v4881_v8 = vpop.f32.mrb[181].mxu1 }
0x1d49   :  { %v4930_v59 = vmax.f32 %v6411_v0, %v4881_v8  ;;  %v6428_v7 = vpop.f32.mrb[182].mxu1 }
0x1d4a   :  { %v4933_v25 = vmax.f32 %v4836_v42, %v6428_v7  ;;  %v4884_v63 = vpop.f32.mrb[183].mxu1 }
0x1d4b   :  { %v4931_v26 = vmax.f32 %v6412_v54, %v4884_v63 }
0x1d4c   :  { %v4944_v23 = vpack.c.bf16 %v4933_v25, %v4932_v45 }
0x1d4d   :  { %v4943_v48 = vpack.c.bf16 %v4931_v26, %v4930_v59 }
0x1d4f   :  { %v6431_v16 = vpop.f32.mrb[184].mxu1  ;;  %6444 = vmatmul.mubr.msk.bf16.gmra.mrb[196].mxu0 %vm4446_vm8, %v4943_v48  ;;  %6474 = vmatmul.mubr.msk.bf16.gmra.mrb[196].mxu1 %vm4446_vm8, %v4943_v48 }
0x1d50   :  { %v4936_v3 = vmax.f32 %v4849_v21, %v6431_v16  ;;  %v4897_v14 = vpop.f32.mrb[185].mxu1  ;;  %6447 = vmatprep.mubr.msk.bf16.mxu0 %vm6987_vm0, %v6986_v58  ;;  %6477 = vmatprep.mubr.msk.bf16.mxu1 %vm6987_vm0, %v6986_v58 }
0x1d51   :  { %v4934_v27 = vmax.f32 %v6415_v31, %v4897_v14  ;;  %v6432_v53 = vpop.f32.mrb[186].mxu1 }
0x1d52   :  { %v4937_v44 = vmax.f32 %v4852_v34, %v6432_v53  ;;  %v4900_v41 = vpop.f32.mrb[187].mxu1 }
0x1d53   :  { %v4935_v1 = vmax.f32 %v6416_v55, %v4900_v41 }
0x1d54   :  { %v4946_v2 = vpack.c.bf16 %v4937_v44, %v4936_v3 }
0x1d55   :  { %v4945_v60 = vpack.c.bf16 %v4935_v1, %v4934_v27 }
0x1d57   :  { %v6435_v57 = vpop.f32.mrb[188].mxu1  ;;  %6448 = vmatmul.mubr.msk.bf16.gmra.mrb[200].mxu0 %vm4446_vm8, %v4944_v23  ;;  %6478 = vmatmul.mubr.msk.bf16.gmra.mrb[200].mxu1 %vm4446_vm8, %v4944_v23 }
0x1d58   :  { %v4940_v11 = vmax.f32 %v4865_v56, %v6435_v57  ;;  %v4913_v38 = vpop.f32.mrb[189].mxu1  ;;  %6451 = vmatprep.mubr.msk.bf16.mxu0 %vm6987_vm0, %v6986_v58  ;;  %6481 = vmatprep.mubr.msk.bf16.mxu1 %vm6987_vm0, %v6986_v58 }
0x1d59   :  { %v4938_v30 = vmax.f32 %v6419_v12, %v4913_v38  ;;  %v6436_v4 = vpop.f32.mrb[190].mxu1 }
0x1d5a   :  { %v4941_v51 = vmax.f32 %v4868_v29, %v6436_v4  ;;  %v4916_v62 = vpop.f32.mrb[191].mxu1 }
0x1d5b   :  { %v4939_v10 = vmax.f32 %v6420_v22, %v4916_v62 }
0x1d5c   :  { %v4948_v46 = vpack.c.bf16 %v4941_v51, %v4940_v11 }
0x1d5d   :  { %v4947_v15 = vpack.c.bf16 %v4939_v10, %v4938_v30 }
0x1d5f   :  { %6452 = vmatmul.mubr.msk.bf16.gmra.mrb[204].mxu0 %vm4446_vm8, %v4945_v60  ;;  %6482 = vmatmul.mubr.msk.bf16.gmra.mrb[204].mxu1 %vm4446_vm8, %v4945_v60 }
0x1d60   :  { %6455 = vmatprep.mubr.msk.bf16.mxu0 %vm6987_vm0, %v6986_v58  ;;  %6485 = vmatprep.mubr.msk.bf16.mxu1 %vm6987_vm0, %v6986_v58 }
0x1d67   :  { %6456 = vmatmul.mubr.msk.bf16.gmra.mrb[208].mxu0 %vm4446_vm8, %v4946_v2  ;;  %6486 = vmatmul.mubr.msk.bf16.gmra.mrb[208].mxu1 %vm4446_vm8, %v4946_v2 }
0x1d68   :  { %6459 = vmatprep.mubr.msk.bf16.mxu0 %vm6987_vm0, %v6986_v58  ;;  %6489 = vmatprep.mubr.msk.bf16.mxu1 %vm6987_vm0, %v6986_v58 }
0x1d6f   :  { %6460 = vmatmul.mubr.msk.bf16.gmra.mrb[212].mxu0 %vm4446_vm8, %v4947_v15  ;;  %6490 = vmatmul.mubr.msk.bf16.gmra.mrb[212].mxu1 %vm4446_vm8, %v4947_v15 }
0x1d70   :  { %6463 = vmatprep.mubr.msk.bf16.mxu0 %vm6987_vm0, %v6986_v58  ;;  %6493 = vmatprep.mubr.msk.bf16.mxu1 %vm6987_vm0, %v6986_v58 }
0x1d77   :  { %6464 = vmatmul.mubr.msk.bf16.gmra.mrb[216].mxu0 %vm4446_vm8, %v4948_v46  ;;  %6494 = vmatmul.mubr.msk.bf16.gmra.mrb[216].mxu1 %vm4446_vm8, %v4948_v46 }
0x1e19   :  { %v5004_v0 = vpop.f32.mrb[192].mxu0  ;;  %v5092_v47 = vpop.f32.mrb[192].mxu1 }
0x1e1a   :  { %v5146_v50 = vmax.f32 %v5004_v0, %v5092_v47  ;;  %v6441_v54 = vpop.f32.mrb[193].mxu0  ;;  %v6471_v43 = vpop.f32.mrb[193].mxu1 }
0x1e1b   :  { %v5007_v13 = vpop.f32.mrb[194].mxu0  ;;  %v5095_v33 = vpop.f32.mrb[194].mxu1 }
0x1e1c   :  { %v5159_v9 = vmul.f32 %v5146_v50, %v8643_v52  ;;  %v5147_v39 = vmax.f32 %v5007_v13, %v5095_v33  ;;  %v6442_v17 = vpop.f32.mrb[195].mxu0  ;;  %v6472_v31 = vpop.f32.mrb[195].mxu1 }
0x1e1e   :  { %v5172_v49 = vadd.f32 %v5159_v9, %v8645_v37  ;;  %v5160_v58 = vmul.f32 %v5147_v39, %v8643_v52 }
0x1e20   :  { %v5527_v28 = vmul.f32 -1.442695, %v5172_v49  ;;  %v5173_v55 = vadd.f32 %v5160_v58, %v8645_v37 }
0x1e22   :  { %6916 = vpow2.f32 %v5527_v28  ;;  %v5528_v35 = vmul.f32 -1.442695, %v5173_v55  ;;  %v5012_v42 = vpop.f32.mrb[196].mxu0  ;;  %v5100_v36 = vpop.f32.mrb[196].mxu1 }
0x1e23   :  { %v5148_v40 = vmax.f32 %v5012_v42, %v5100_v36  ;;  %v6445_v12 = vpop.f32.mrb[197].mxu0  ;;  %v6475_v21 = vpop.f32.mrb[197].mxu1 }
0x1e24   :  { %6918 = vpow2.f32 %v5528_v35  ;;  %v5015_v18 = vpop.f32.mrb[198].mxu0  ;;  %v5103_v22 = vpop.f32.mrb[198].mxu1 }
0x1e25   :  { %v5161_v34 = vmul.f32 %v5148_v40, %v8643_v52  ;;  %v5149_v5 = vmax.f32 %v5015_v18, %v5103_v22  ;;  %v6446_v6 = vpop.f32.mrb[199].mxu0  ;;  %v6476_v61 = vpop.f32.mrb[199].mxu1 }
0x1e27   :  { %v5174_v56 = vadd.f32 %v5161_v34, %v8645_v37  ;;  %v5162_v32 = vmul.f32 %v5149_v5, %v8643_v52 }
0x1e29   :  { %v5529_v20 = vmul.f32 -1.442695, %v5174_v56  ;;  %v5175_v29 = vadd.f32 %v5162_v32, %v8645_v37 }
0x1e2a   :  { %v5020_v24 = vpop.f32.mrb[200].mxu0  ;;  %v5108_v19 = vpop.f32.mrb[200].mxu1 }
0x1e2b   :  { %6920 = vpow2.f32 %v5529_v20  ;;  %v5530_v45 = vmul.f32 -1.442695, %v5175_v29  ;;  %v5150_v8 = vmax.f32 %v5020_v24, %v5108_v19  ;;  %v6449_v59 = vpop.f32.mrb[201].mxu0  ;;  %v6479_v7 = vpop.f32.mrb[201].mxu1 }
0x1e2c   :  { %v6917_v25 = vpop.eup %6916  ;;  %v5023_v63 = vpop.f32.mrb[202].mxu0 }
0x1e2d   :  { %v5111_v26 = vpop.f32.mrb[202].mxu1  ;;  %v5224_v23 = vadd.f32 1.0, %v6917_v25  ;;  %6922 = vpow2.f32 %v5530_v45  ;;  %v5163_v48 = vmul.f32 %v5150_v8, %v8643_v52  ;;  %v6450_v3 = vpop.f32.mrb[203].mxu0 }
0x1e2e   :  { %v5151_v16 = vmax.f32 %v5023_v63, %v5111_v26  ;;  %v6480_v14 = vpop.f32.mrb[203].mxu1  ;;  %v6919_v27 = vpop.eup %6918 }
0x1e2f   :  { %6924 = vrcp.f32 %v5224_v23  ;;  %v5225_v53 = vadd.f32 1.0, %v6919_v27  ;;  %v5176_v44 = vadd.f32 %v5163_v48, %v8645_v37 }
0x1e30   :  { %v5164_v41 = vmul.f32 %v5151_v16, %v8643_v52 }
0x1e31   :  { %6926 = vrcp.f32 %v5225_v53  ;;  %v5531_v1 = vmul.f32 -1.442695, %v5176_v44 }
0x1e32   :  { %v5177_v2 = vadd.f32 %v5164_v41, %v8645_v37  ;;  %v5028_v60 = vpop.f32.mrb[204].mxu0  ;;  %v5116_v57 = vpop.f32.mrb[204].mxu1 }
0x1e33   :  { %6928 = vpow2.f32 %v5531_v1  ;;  %v5152_v38 = vmax.f32 %v5028_v60, %v5116_v57  ;;  %v6453_v30 = vpop.f32.mrb[205].mxu0  ;;  %v6483_v4 = vpop.f32.mrb[205].mxu1 }
0x1e34   :  { %v5532_v11 = vmul.f32 -1.442695, %v5177_v2  ;;  %v5031_v51 = vpop.f32.mrb[206].mxu0  ;;  %v5119_v62 = vpop.f32.mrb[206].mxu1 }
0x1e35   :  { %v6921_v10 = vpop.eup %6920  ;;  %v5165_v46 = vmul.f32 %v5152_v38, %v8643_v52  ;;  %v5153_v15 = vmax.f32 %v5031_v51, %v5119_v62  ;;  %v6454_v0 = vpop.f32.mrb[207].mxu0 }
0x1e36   :  { %6930 = vpow2.f32 %v5532_v11  ;;  %v6484_v47 = vpop.f32.mrb[207].mxu1  ;;  %v5226_v50 = vadd.f32 1.0, %v6921_v10 }
0x1e37   :  { %v6923_v54 = vpop.eup %6922  ;;  %v5178_v43 = vadd.f32 %v5165_v46, %v8645_v37  ;;  %v5166_v13 = vmul.f32 %v5153_v15, %v8643_v52 }
0x1e38   :  { %6932 = vrcp.f32 %v5226_v50  ;;  %v5227_v33 = vadd.f32 1.0, %v6923_v54 }
0x1e39   :  { %v6925_v9 = vpop.eup %6924  ;;  %v5533_v39 = vmul.f32 -1.442695, %v5178_v43  ;;  %v5179_v17 = vadd.f32 %v5166_v13, %v8645_v37 }
0x1e3a   :  { %5540 = vst [vmem:[%s8818_s3 + $0x68] sm:$0xff] %v6925_v9  ;;  %6934 = vrcp.f32 %v5227_v33  ;;  %v5036_v31 = vpop.f32.mrb[208].mxu0  ;;  %v5124_v49 = vpop.f32.mrb[208].mxu1 }
0x1e3b   :  { %v6927_v58 = vpop.eup %6926  ;;  %6936 = vpow2.f32 %v5533_v39  ;;  %v5534_v28 = vmul.f32 -1.442695, %v5179_v17  ;;  %v5154_v55 = vmax.f32 %v5036_v31, %v5124_v49  ;;  %v6457_v35 = vpop.f32.mrb[209].mxu0 }
0x1e3c   :  { %v6487_v42 = vpop.f32.mrb[209].mxu1  ;;  %5541 = vst [vmem:[%s8818_s3 + $0x70] sm:$0xff] %v6927_v58  ;;  %v5039_v36 = vpop.f32.mrb[210].mxu0 }
0x1e3d   :  { %v5127_v40 = vpop.f32.mrb[210].mxu1  ;;  %v6929_v12 = vpop.eup %6928  ;;  %6938 = vpow2.f32 %v5534_v28  ;;  %v5167_v21 = vmul.f32 %v5154_v55, %v8643_v52 }
0x1e3e   :  { %v5155_v18 = vmax.f32 %v5039_v36, %v5127_v40  ;;  %v6458_v22 = vpop.f32.mrb[211].mxu0  ;;  %v6488_v34 = vpop.f32.mrb[211].mxu1  ;;  %v5228_v5 = vadd.f32 1.0, %v6929_v12 }
0x1e3f   :  { %v5180_v61 = vadd.f32 %v5167_v21, %v8645_v37 }
0x1e40   :  { %v6931_v6 = vpop.eup %6930  ;;  %v5168_v56 = vmul.f32 %v5155_v18, %v8643_v52  ;;  %6940 = vrcp.f32 %v5228_v5 }
0x1e41   :  { %v5229_v32 = vadd.f32 1.0, %v6931_v6  ;;  %v5535_v20 = vmul.f32 -1.442695, %v5180_v61 }
0x1e42   :  { %v5181_v29 = vadd.f32 %v5168_v56, %v8645_v37  ;;  %v6933_v24 = vpop.eup %6932  ;;  %v5044_v19 = vpop.f32.mrb[212].mxu0 }
0x1e43   :  { %6942 = vrcp.f32 %v5229_v32  ;;  %v5132_v45 = vpop.f32.mrb[212].mxu1  ;;  %5542 = vst [vmem:[%s8818_s3 + $0x78] sm:$0xff] %v6933_v24  ;;  %v6461_v7 = vpop.f32.mrb[213].mxu0 }
0x1e44   :  { %6944 = vpow2.f32 %v5535_v20  ;;  %v5536_v8 = vmul.f32 -1.442695, %v5181_v29  ;;  %v5156_v59 = vmax.f32 %v5044_v19, %v5132_v45  ;;  %v6491_v25 = vpop.f32.mrb[213].mxu1  ;;  %v6935_v63 = vpop.eup %6934 }
0x1e45   :  { %v5047_v26 = vpop.f32.mrb[214].mxu0  ;;  %v5135_v23 = vpop.f32.mrb[214].mxu1  ;;  %5543 = vst [vmem:[%s8818_s3 + $0x80] sm:$0xff] %v6935_v63 }
0x1e46   :  { %v6937_v48 = vpop.eup %6936  ;;  %6946 = vpow2.f32 %v5536_v8  ;;  %v5169_v16 = vmul.f32 %v5156_v59, %v8643_v52  ;;  %v5157_v3 = vmax.f32 %v5047_v26, %v5135_v23  ;;  %v6462_v14 = vpop.f32.mrb[215].mxu0 }
0x1e47   :  { %v6492_v27 = vpop.f32.mrb[215].mxu1  ;;  %v5230_v53 = vadd.f32 1.0, %v6937_v48  ;;  %v6939_v44 = vpop.eup %6938 }
0x1e48   :  { %v5182_v41 = vadd.f32 %v5169_v16, %v8645_v37  ;;  %v5170_v1 = vmul.f32 %v5157_v3, %v8643_v52  ;;  %v5231_v2 = vadd.f32 1.0, %v6939_v44 }
0x1e49   :  { %6948 = vrcp.f32 %v5230_v53 }
0x1e4a   :  { %v5537_v60 = vmul.f32 -1.442695, %v5182_v41  ;;  %v5183_v57 = vadd.f32 %v5170_v1, %v8645_v37  ;;  %v6941_v11 = vpop.eup %6940  ;;  %6950 = vrcp.f32 %v5231_v2  ;;  %v5052_v38 = vpop.f32.mrb[216].mxu0 }
0x1e4b   :  { %v5140_v30 = vpop.f32.mrb[216].mxu1  ;;  %5544 = vst [vmem:[%s8818_s3 + $0x88] sm:$0xff] %v6941_v11  ;;  %v6465_v62 = vpop.f32.mrb[217].mxu0 }
0x1e4c   :  { %6952 = vpow2.f32 %v5537_v60  ;;  %v5538_v4 = vmul.f32 -1.442695, %v5183_v57  ;;  %v5158_v51 = vmax.f32 %v5052_v38, %v5140_v30  ;;  %v6495_v10 = vpop.f32.mrb[217].mxu1  ;;  %v5055_v15 = vpop.f32.mrb[218].mxu0 }
0x1e4d   :  { %v6943_v46 = vpop.eup %6942  ;;  %v5143_v0 = vpop.f32.mrb[218].mxu1 }
0x1e4e   :  { %v6945_v47 = vpop.eup %6944  ;;  %5545 = vst [vmem:[%s8818_s3 + $0x90] sm:$0xff] %v6943_v46  ;;  %6954 = vpow2.f32 %v5538_v4  ;;  %v5171_v50 = vmul.f32 %v5158_v51, %v8643_v52  ;;  %v6466_v54 = vpop.f32.mrb[219].mxu0 }
0x1e4f   :  { %v6496_v43 = vpop.f32.mrb[219].mxu1  ;;  %v5232_v13 = vadd.f32 1.0, %v6945_v47 }
0x1e50   :  { %v6947_v33 = vpop.eup %6946  ;;  %v5184_v9 = vadd.f32 %v5171_v50, %v8645_v37 }
0x1e51   :  { %6956 = vrcp.f32 %v5232_v13  ;;  %v5233_v39 = vadd.f32 1.0, %v6947_v33 }
0x1e52   :  { %v5539_v17 = vmul.f32 -1.442695, %v5184_v9 }
0x1e53   :  { %v6949_v31 = vpop.eup %6948  ;;  %6958 = vrcp.f32 %v5233_v39 }
0x1e54   :  { %5546 = vst [vmem:[%s8818_s3 + $0x98] sm:$0xff] %v6949_v31  ;;  %6960 = vpow2.f32 %v5539_v17  ;;  %v6951_v49 = vpop.eup %6950 }
0x1e55   :  { %5547 = vst [vmem:[%s8818_s3 + $0xa0] sm:$0xff] %v6951_v49 }
0x1e56   :  { %v6953_v58 = vpop.eup %6952 }
0x1e57   :  { %v5234_v52 = vadd.f32 1.0, %v6953_v58 }
0x1e58   :  { %v6955_v28 = vpop.eup %6954 }
0x1e59   :  { %6962 = vrcp.f32 %v5234_v52  ;;  %v5235_v37 = vadd.f32 1.0, %v6955_v28 }
0x1e5b   :  { %v6957_v55 = vpop.eup %6956  ;;  %6964 = vrcp.f32 %v5235_v37 }
0x1e5c   :  { %5548 = vst [vmem:[%s8818_s3 + $0xa8] sm:$0xff] %v6957_v55 }
0x1e5d   :  { %v6959_v35 = vpop.eup %6958 }
0x1e5e   :  { %v6961_v42 = vpop.eup %6960  ;;  %5549 = vst [vmem:[%s8818_s3 + $0xb0] sm:$0xff] %v6959_v35 }
0x1e5f   :  { %v5236_v36 = vadd.f32 1.0, %v6961_v42 }
0x1e61   :  { %6966 = vrcp.f32 %v5236_v36 }
0x1e63   :  { %v6963_v40 = vpop.eup %6962 }
0x1e64   :  { %5550 = vst [vmem:[%s8818_s3 + $0xb8] sm:$0xff] %v6963_v40 }
0x1e65   :  { %v6965_v12 = vpop.eup %6964 }
0x1e66   :  { %5551 = vst [vmem:[%s8818_s3 + $0xc0] sm:$0xff] %v6965_v12 }
0x1e6b   :  { %v6967_v21 = vpop.eup %6966 }
0x1e6c   :  { %5552 = vst [vmem:[%s8818_s3 + $0xc8] sm:$0xf] %v6967_v21 }
0x1e6d   :  { %5281 = vsyncpa [#allocation3], 1 }

</bundles_post_ra>
